<compile_context>
chip_gen: v7x
topology: tpu7x:2x2x1
jax: 0.10.0
libtpu: 0.0.40
codegen_flags: <defaults>
</compile_context>

<pallas_src>
import jax
import jax.numpy as jnp
import numpy as np
from jax import lax
from jax.experimental import pallas as pl
from jax.experimental.pallas import tpu as pltpu

F32 = jnp.float32
BF16 = jnp.bfloat16


def _round_up(v, m):
    return (v + m - 1) // m * m


def _num_tensorcores():
    # Best-effort: v7x exposes 2 TensorCores per chip; v5e/v6e have 1.
    try:
        kind = jax.devices()[0].device_kind.lower()
    except Exception:
        return 1
    return 2 if "7" in kind else 1


# ----------------------------------------------------------------------------
# Kernel
# ----------------------------------------------------------------------------
def make_kernel(T, Cin, H, num_layers, Bt):
    T2, T4 = T // 2, T // 4
    G4 = 4 * H

    def conv3_relu(x2d_bf, wf_ref, b_ref, trows):
        """Conv1d(k=3, pad=1) + ReLU on a time-major (trows*Bt, Cin) bf16 slab.

        im2col along K: lane-axis concat of the 3 halo-shifted views, then ONE
        matmul against the host-fused (3*Cin, Cout) weight.
        """
        cin = x2d_bf.shape[1]
        zb = jnp.zeros((Bt, cin), BF16)
        xpad = jnp.concatenate([zb, x2d_bf, zb], axis=0)        # ((trows+2)*Bt, cin)
        slab = jnp.concatenate(
            [xpad[k * Bt:(k + trows) * Bt] for k in range(3)], axis=1)
        acc = jnp.dot(slab, wf_ref[...], preferred_element_type=F32) + b_ref[...]
        return jnp.maximum(acc, 0.0)                            # (trows*Bt, Cout) f32

    def pool2(y2d, trows):
        """MaxPool1d(2) over time on a time-major (trows*Bt, C) slab."""
        c = y2d.shape[1]
        y3 = y2d.reshape(trows // 2, 2 * Bt, c)
        return jnp.maximum(y3[:, :Bt, :], y3[:, Bt:, :]).reshape((trows // 2) * Bt, c)

    def kernel(*refs):
        idx = 0
        x_ref = refs[idx]; idx += 1                             # (T, Bt, Cin) f32
        w1_ref, b1_ref = refs[idx], refs[idx + 1]; idx += 2     # (3Cin,64) bf16,(1,64)
        w2_ref, b2_ref = refs[idx], refs[idx + 1]; idx += 2     # (192,128) bf16,(1,128)
        lstm_refs = []
        for _ in range(num_layers):
            lstm_refs.append((refs[idx], refs[idx + 1], refs[idx + 2]))
            idx += 3                                            # (4H,in),(4H,H),(4H,1)
        fc1w_ref, fc1b_ref, fc2w_ref, fc2b_ref = refs[idx:idx + 4]; idx += 4
        out_ref = refs[idx]; idx += 1                           # (1, O_pad, Bt)
        xprojT_sc = refs[idx]                                   # (T4, 4H, Bt) f32
        hseqT_sc = refs[idx + 1]                                # (T4, H, Bt) bf16

        # ---- CNN front end: time-major batch-stacked, single-matmul convs --
        x = x_ref[...].astype(BF16).reshape(T * Bt, Cin)
        y = conv3_relu(x, w1_ref, b1_ref, T)                    # (T*Bt, 64)
        y = pool2(y, T)                                         # (T2*Bt, 64)
        y = conv3_relu(y.astype(BF16), w2_ref, b2_ref, T2)      # (T2*Bt, 128)
        y = pool2(y, T2)                                        # (T4*Bt, 128)
        y3 = y.reshape(T4, Bt, 128)                             # f32, time-major blocks

        # ---- multi-layer LSTM, (feature, batch)-transposed recurrence ------
        h_last = jnp.zeros((H, Bt), F32)
        for layer, (wih_ref, whh_ref, b_ref) in enumerate(lstm_refs):
            wihT = wih_ref[...]                                 # (4H, in_l) bf16
            whhT = whh_ref[...]                                 # (4H, H)    bf16  (hoisted)
            bT = b_ref[...]                                     # (4H, 1)    f32

            # Hoisted input projection, stored transposed:
            #   xprojT[t] = Wih_T @ x_t^T + b      (4H, Bt)
            if layer == 0:
                # Bridge from the row-major conv output with the standard
                # `A @ B.T` dot (same pattern as q @ k.T in attention).
                for t in range(T4):                             # static, off serial path
                    xprojT_sc[t] = jnp.dot(
                        wihT, y3[t].T.astype(BF16),
                        preferred_element_type=F32) + bT
            else:
                def prep(t, _):
                    xprojT_sc[t] = jnp.dot(
                        wihT, hseqT_sc[t], preferred_element_type=F32) + bT
                    return 0
                lax.fori_loop(0, T4, prep, 0, unroll=min(T4, 4))

            # Serial recurrence: every gate slice is an 8-aligned sublane
            # slice; all elementwise / transcendental work is batch-lane wide.
            def step(t, carry, whhT=whhT):
                h, c = carry                                    # (H, Bt) f32
                gates = xprojT_sc[t] + jnp.dot(
                    whhT, h.astype(BF16), preferred_element_type=F32)  # (4H, Bt)
                i_g = jax.nn.sigmoid(gates[0 * H:1 * H])
                f_g = jax.nn.sigmoid(gates[1 * H:2 * H])
                g_g = jnp.tanh(gates[2 * H:3 * H])
                o_g = jax.nn.sigmoid(gates[3 * H:4 * H])
                c = f_g * c + i_g * g_g
                h = o_g * jnp.tanh(c)
                hseqT_sc[t] = h.astype(BF16)                    # next layer's input
                return (h, c)

            h0 = jnp.zeros((H, Bt), F32)
            c0 = jnp.zeros((H, Bt), F32)
            h_last, _ = lax.fori_loop(0, T4, step, (h0, c0), unroll=min(T4, 8))

        # ---- fc1 + ReLU + fc2 (still transposed; small padded head) --------
        zT = jnp.maximum(
            jnp.dot(fc1w_ref[...], h_last.astype(BF16),
                    preferred_element_type=F32) + fc1b_ref[...], 0.0)   # (128, Bt)
        outT = jnp.dot(fc2w_ref[...], zT.astype(BF16),
                       preferred_element_type=F32) + fc2b_ref[...]      # (O_pad, Bt)
        out_ref[0] = outT

    return kernel


# ----------------------------------------------------------------------------
# Wrapper
# ----------------------------------------------------------------------------
def pm10_cnn_lstm_forward(x, params):
    B, T, Cin = x.shape
    assert T % 4 == 0 and T >= 4, "two MaxPool1d(2) stages require T % 4 == 0"
    num_layers = len(params["lstm"])
    H = params["lstm"][0][1].shape[-1]                          # whh: (4, H, H)
    O = params["fc2_w"].shape[-1]
    G4 = 4 * H
    T4 = T // 4
    FC1P = 128                                                  # fc1 padded to 128 rows
    O_pad = _round_up(O, 16)

    # ---- batch tiling: multiple of 16 (bf16 packing); one tile per TC -------
    B16 = _round_up(B, 16)
    ntc = _num_tensorcores()
    if ntc > 1 and B16 >= 2 * 16:
        B_tile = _round_up((B16 + ntc - 1) // ntc, 16)          # feed both v7x TCs
    else:
        B_tile = B16                                            # single big tile (v5e/v6e)
    B_tile = min(B_tile, 256)                                   # VMEM cap
    grid = (B16 + B_tile - 1) // B_tile
    B_pad = grid * B_tile

    # ---- layout plumbing: time-major input, padded batch --------------------
    x_tm = jnp.transpose(x, (1, 0, 2)).astype(F32)              # (T, B, Cin)
    if B_pad != B:
        x_tm = jnp.pad(x_tm, ((0, 0), (0, B_pad - B), (0, 0)))

    # ---- conv weights fused along K for single-matmul im2col convs ----------
    w1f = params["w1"].reshape(3 * Cin, 64).astype(BF16)
    w2f = params["w2"].reshape(3 * 64, 128).astype(BF16)

    # ---- LSTM weights: fuse the 4 gates and transpose to (4H, in) / (4H, H).
    # Gate order (i, f, g, o) matches PyTorch's chunk order.
    # TODO(synk): a real PyTorch state-dict import must sum b_ih + b_hh first.
    def fuse_lstm_T(wih, whh, bl):
        in_l = wih.shape[1]
        wihT = jnp.transpose(wih, (0, 2, 1)).reshape(G4, in_l).astype(BF16)
        whhT = jnp.transpose(whh, (0, 2, 1)).reshape(G4, H).astype(BF16)
        bT = jnp.transpose(bl, (0, 2, 1)).reshape(G4, 1).astype(F32)
        return wihT, whhT, bT

    # ---- fc head, transposed + zero-padded --------------------------------
    fc1wT = jnp.zeros((FC1P, H), F32).at[:64, :].set(params["fc1_w"].T).astype(BF16)
    fc1bT = jnp.zeros((FC1P, 1), F32).at[:64, :].set(params["fc1_b"].reshape(64, 1))
    fc2wT = jnp.zeros((O_pad, FC1P), F32).at[:O, :64].set(params["fc2_w"].T).astype(BF16)
    fc2bT = jnp.zeros((O_pad, 1), F32).at[:O, :].set(params["fc2_b"].reshape(O, 1))

    inputs = [x_tm, w1f, params["b1"].astype(F32), w2f, params["b2"].astype(F32)]
    for (wih, whh, bl) in params["lstm"]:
        inputs += list(fuse_lstm_T(wih, whh, bl))
    inputs += [fc1wT, fc1bT, fc2wT, fc2bT]

    def full_spec(a):
        nd = a.ndim
        return pl.BlockSpec(a.shape, lambda g, _nd=nd: (0,) * _nd)

    in_specs = [pl.BlockSpec((T, B_tile, Cin), lambda g: (0, g, 0))]
    in_specs += [full_spec(a) for a in inputs[1:]]

    kernel = make_kernel(T, Cin, H, num_layers, B_tile)

    out = pl.pallas_call(
        kernel,
        out_shape=jax.ShapeDtypeStruct((grid, O_pad, B_tile), F32),
        grid_spec=pltpu.PrefetchScalarGridSpec(
            num_scalar_prefetch=0,
            grid=(grid,),
            in_specs=in_specs,
            out_specs=pl.BlockSpec((1, O_pad, B_tile), lambda g: (g, 0, 0)),
            scratch_shapes=[
                pltpu.VMEM((T4, G4, B_tile), F32),              # transposed x-projection
                pltpu.VMEM((T4, H, B_tile), BF16),              # transposed hidden seq
            ],
        ),
        compiler_params=pltpu.CompilerParams(
            dimension_semantics=("parallel",),
            vmem_limit_bytes=48 * 1024 * 1024),
    )(*inputs)

    # (grid, O_pad, Bt) -> (B, O)
    out = jnp.transpose(out, (0, 2, 1)).reshape(B_pad, O_pad)
    return out[:B, :O]


# ----------------------------------------------------------------------------
# Pure-JAX reference (independent f32 code path, for verification)
# ----------------------------------------------------------------------------
def reference_forward(x, params):
    B, T, _ = x.shape

    def conv1d(x_btc, w_kio, b):
        xn = jnp.transpose(x_btc, (0, 2, 1))                    # (B, Cin, T)
        w_oih = jnp.transpose(w_kio, (2, 1, 0))                 # (Cout, Cin, 3)
        y = jax.lax.conv_general_dilated(
            xn, w_oih, window_strides=(1,), padding=((1, 1),),
            dimension_numbers=("NCH", "OIH", "NCH"))
        y = y + b.reshape(1, -1, 1)
        return jnp.transpose(y, (0, 2, 1))

    h = jax.nn.relu(conv1d(x, params["w1"], params["b1"]))
    h = h.reshape(B, T // 2, 2, -1).max(axis=2)
    h = jax.nn.relu(conv1d(h, params["w2"], params["b2"]))
    h = h.reshape(B, T // 4, 2, -1).max(axis=2)

    seq = h
    for (wih, whh, bl) in params["lstm"]:
        H = whh.shape[-1]
        hc = jnp.zeros((B, H)); cc = jnp.zeros((B, H))
        outs = []
        for t in range(seq.shape[1]):
            xt = seq[:, t, :]
            ig = jax.nn.sigmoid(xt @ wih[0] + hc @ whh[0] + bl[0])
            fg = jax.nn.sigmoid(xt @ wih[1] + hc @ whh[1] + bl[1])
            gg = jnp.tanh(xt @ wih[2] + hc @ whh[2] + bl[2])
            og = jax.nn.sigmoid(xt @ wih[3] + hc @ whh[3] + bl[3])
            cc = fg * cc + ig * gg
            hc = og * jnp.tanh(cc)
            outs.append(hc)
        seq = jnp.stack(outs, axis=1)

    last = seq[:, -1, :]
    z = jax.nn.relu(last @ params["fc1_w"] + params["fc1_b"])
    return z @ params["fc2_w"] + params["fc2_b"]


# ----------------------------------------------------------------------------
# Deterministic synthetic parameters + demo
# ----------------------------------------------------------------------------
def init_params(key, input_size, hidden_size, num_layers, output_size):
    ks = iter(jax.random.split(key, 32))
    s = 0.1
    p = {
        "w1": s * jax.random.normal(next(ks), (3, input_size, 64), F32),
        "b1": s * jax.random.normal(next(ks), (1, 64), F32),
        "w2": s * jax.random.normal(next(ks), (3, 64, 128), F32),
        "b2": s * jax.random.normal(next(ks), (1, 128), F32),
        "fc1_w": s * jax.random.normal(next(ks), (hidden_size, 64), F32),
        "fc1_b": s * jax.random.normal(next(ks), (1, 64), F32),
        "fc2_w": s * jax.random.normal(next(ks), (64, output_size), F32),
        "fc2_b": s * jax.random.normal(next(ks), (1, output_size), F32),
        "lstm": [],
    }
    for layer in range(num_layers):
        in_l = 128 if layer == 0 else hidden_size
        wih = s * jax.random.normal(next(ks), (4, in_l, hidden_size), F32)
        whh = s * jax.random.normal(next(ks), (4, hidden_size, hidden_size), F32)
        bl = s * jax.random.normal(next(ks), (4, 1, hidden_size), F32)
        p["lstm"].append((wih, whh, bl))
    return p


if __name__ == "__main__":
    B, T = 2, 16
    input_size, hidden_size, num_layers, output_size = 8, 32, 2, 1

    key = jax.random.PRNGKey(0)
    k_x, k_p = jax.random.split(key)
    x = jax.random.normal(k_x, (B, T, input_size), F32)
    params = init_params(k_p, input_size, hidden_size, num_layers, output_size)

    out = pm10_cnn_lstm_forward(x, params)
    out = jax.block_until_ready(out)

    ref = jax.block_until_ready(reference_forward(x, params))
    assert out.shape == (B, output_size)
    assert np.allclose(np.asarray(out), np.asarray(ref), rtol=2e-2, atol=2e-2), (
        np.asarray(out), np.asarray(ref))

    print("KERNEL_OK")
</pallas_src>

<mosaic_0001>
module attributes {stable_mosaic.version = 11 : i64} {
  func.func @kernel(%arg0: i32, %arg1: memref<16x16x8xf32, #tpu.memory_space<vmem>>, %arg2: memref<24x64xbf16, #tpu.memory_space<vmem>>, %arg3: memref<1x64xf32, #tpu.memory_space<vmem>>, %arg4: memref<192x128xbf16, #tpu.memory_space<vmem>>, %arg5: memref<1x128xf32, #tpu.memory_space<vmem>>, %arg6: memref<128x128xbf16, #tpu.memory_space<vmem>>, %arg7: memref<128x32xbf16, #tpu.memory_space<vmem>>, %arg8: memref<128x1xf32, #tpu.memory_space<vmem>>, %arg9: memref<128x32xbf16, #tpu.memory_space<vmem>>, %arg10: memref<128x32xbf16, #tpu.memory_space<vmem>>, %arg11: memref<128x1xf32, #tpu.memory_space<vmem>>, %arg12: memref<128x32xbf16, #tpu.memory_space<vmem>>, %arg13: memref<128x1xf32, #tpu.memory_space<vmem>>, %arg14: memref<16x128xbf16, #tpu.memory_space<vmem>>, %arg15: memref<16x1xf32, #tpu.memory_space<vmem>>, %arg16: memref<1x16x16xf32, #tpu.memory_space<vmem>>, %arg17: memref<4x128x16xf32, #tpu.memory_space<vmem>>, %arg18: memref<4x32x16xbf16, #tpu.memory_space<vmem>>) attributes {dimension_semantics = [#tpu.dimension_semantics<parallel>], iteration_bounds = array<i64: 1>, scalar_prefetch = 0 : i64, scratch_operands = 2 : i64, tpu.core_type = #tpu.core_type<tc>, window_params = [{transform_indices = @transform_0, window_bounds = array<i64: 16, 16, 8>}, {pipeline_mode = #tpu.pipeline_mode<synchronous>, transform_indices = @transform_1, window_bounds = array<i64: 24, 64>}, {pipeline_mode = #tpu.pipeline_mode<synchronous>, transform_indices = @transform_2, window_bounds = array<i64: 1, 64>}, {pipeline_mode = #tpu.pipeline_mode<synchronous>, transform_indices = @transform_3, window_bounds = array<i64: 192, 128>}, {pipeline_mode = #tpu.pipeline_mode<synchronous>, transform_indices = @transform_4, window_bounds = array<i64: 1, 128>}, {pipeline_mode = #tpu.pipeline_mode<synchronous>, transform_indices = @transform_5, window_bounds = array<i64: 128, 128>}, {pipeline_mode = #tpu.pipeline_mode<synchronous>, transform_indices = @transform_6, window_bounds = array<i64: 128, 32>}, {pipeline_mode = #tpu.pipeline_mode<synchronous>, transform_indices = @transform_7, window_bounds = array<i64: 128, 1>}, {pipeline_mode = #tpu.pipeline_mode<synchronous>, transform_indices = @transform_8, window_bounds = array<i64: 128, 32>}, {pipeline_mode = #tpu.pipeline_mode<synchronous>, transform_indices = @transform_9, window_bounds = array<i64: 128, 32>}, {pipeline_mode = #tpu.pipeline_mode<synchronous>, transform_indices = @transform_10, window_bounds = array<i64: 128, 1>}, {pipeline_mode = #tpu.pipeline_mode<synchronous>, transform_indices = @transform_11, window_bounds = array<i64: 128, 32>}, {pipeline_mode = #tpu.pipeline_mode<synchronous>, transform_indices = @transform_12, window_bounds = array<i64: 128, 1>}, {pipeline_mode = #tpu.pipeline_mode<synchronous>, transform_indices = @transform_13, window_bounds = array<i64: 16, 128>}, {pipeline_mode = #tpu.pipeline_mode<synchronous>, transform_indices = @transform_14, window_bounds = array<i64: 16, 1>}, {transform_indices = @transform_15, window_bounds = array<i64: 1, 16, 16>}]} {
    %c0 = arith.constant 0 : index
    %c0_0 = arith.constant 0 : index
    %c0_1 = arith.constant 0 : index
    %0 = vector.load %arg1[%c0, %c0_0, %c0_1] : memref<16x16x8xf32, #tpu.memory_space<vmem>>, vector<16x16x8xf32>
    %1 = arith.truncf %0 : vector<16x16x8xf32> to vector<16x16x8xbf16>
    %2 = vector.shape_cast %1 : vector<16x16x8xbf16> to vector<256x8xbf16>
    %cst = arith.constant 0.000000e+00 : bf16
    %3 = vector.broadcast %cst : bf16 to vector<16x8xbf16>
    %4 = tpu.concatenate %3, %2, %3 in 0 : vector<16x8xbf16>, vector<256x8xbf16>, vector<16x8xbf16> -> vector<288x8xbf16>
    %5 = vector.extract_strided_slice %4 {offsets = [0, 0], sizes = [256, 8], strides = [1, 1]} : vector<288x8xbf16> to vector<256x8xbf16>
    %6 = vector.extract_strided_slice %4 {offsets = [16, 0], sizes = [256, 8], strides = [1, 1]} : vector<288x8xbf16> to vector<256x8xbf16>
    %7 = vector.extract_strided_slice %4 {offsets = [32, 0], sizes = [256, 8], strides = [1, 1]} : vector<288x8xbf16> to vector<256x8xbf16>
    %8 = tpu.concatenate %5, %6, %7 in 1 : vector<256x8xbf16>, vector<256x8xbf16>, vector<256x8xbf16> -> vector<256x24xbf16>
    %c0_2 = arith.constant 0 : index
    %c0_3 = arith.constant 0 : index
    %9 = vector.load %arg2[%c0_2, %c0_3] : memref<24x64xbf16, #tpu.memory_space<vmem>>, vector<24x64xbf16>
    %cst_4 = arith.constant dense<0.000000e+00> : vector<256x64xf32>
    %10 = tpu.matmul %8, %9, %cst_4 {dimension_numbers = #tpu.dot_dimension_numbers<[1], [0], [0], [1], [0, 0, 1, 1], [], []>} : vector<256x24xbf16>, vector<24x64xbf16>, vector<256x64xf32> -> vector<256x64xf32>
    %c0_5 = arith.constant 0 : index
    %c0_6 = arith.constant 0 : index
    %11 = vector.load %arg3[%c0_5, %c0_6] : memref<1x64xf32, #tpu.memory_space<vmem>>, vector<1x64xf32>
    %12 = vector.broadcast %11 : vector<1x64xf32> to vector<256x64xf32>
    %13 = arith.addf %10, %12 : vector<256x64xf32>
    %cst_7 = arith.constant 0.000000e+00 : f32
    %14 = vector.broadcast %cst_7 : f32 to vector<256x64xf32>
    %15 = arith.maximumf %13, %14 : vector<256x64xf32>
    %16 = vector.shape_cast %15 : vector<256x64xf32> to vector<8x32x64xf32>
    %17 = vector.extract_strided_slice %16 {offsets = [0, 0, 0], sizes = [8, 16, 64], strides = [1, 1, 1]} : vector<8x32x64xf32> to vector<8x16x64xf32>
    %18 = vector.extract_strided_slice %16 {offsets = [0, 16, 0], sizes = [8, 16, 64], strides = [1, 1, 1]} : vector<8x32x64xf32> to vector<8x16x64xf32>
    %19 = arith.maximumf %17, %18 : vector<8x16x64xf32>
    %20 = vector.shape_cast %19 : vector<8x16x64xf32> to vector<128x64xf32>
    %21 = arith.truncf %20 : vector<128x64xf32> to vector<128x64xbf16>
    %cst_8 = arith.constant 0.000000e+00 : bf16
    %22 = vector.broadcast %cst_8 : bf16 to vector<16x64xbf16>
    %23 = tpu.concatenate %22, %21, %22 in 0 : vector<16x64xbf16>, vector<128x64xbf16>, vector<16x64xbf16> -> vector<160x64xbf16>
    %24 = vector.extract_strided_slice %23 {offsets = [0, 0], sizes = [128, 64], strides = [1, 1]} : vector<160x64xbf16> to vector<128x64xbf16>
    %25 = vector.extract_strided_slice %23 {offsets = [16, 0], sizes = [128, 64], strides = [1, 1]} : vector<160x64xbf16> to vector<128x64xbf16>
    %26 = vector.extract_strided_slice %23 {offsets = [32, 0], sizes = [128, 64], strides = [1, 1]} : vector<160x64xbf16> to vector<128x64xbf16>
    %27 = tpu.concatenate %24, %25, %26 in 1 : vector<128x64xbf16>, vector<128x64xbf16>, vector<128x64xbf16> -> vector<128x192xbf16>
    %c0_9 = arith.constant 0 : index
    %c0_10 = arith.constant 0 : index
    %28 = vector.load %arg4[%c0_9, %c0_10] : memref<192x128xbf16, #tpu.memory_space<vmem>>, vector<192x128xbf16>
    %cst_11 = arith.constant dense<0.000000e+00> : vector<128x128xf32>
    %29 = tpu.matmul %27, %28, %cst_11 {dimension_numbers = #tpu.dot_dimension_numbers<[1], [0], [0], [1], [0, 0, 1, 1], [], []>} : vector<128x192xbf16>, vector<192x128xbf16>, vector<128x128xf32> -> vector<128x128xf32>
    %c0_12 = arith.constant 0 : index
    %c0_13 = arith.constant 0 : index
    %30 = vector.load %arg5[%c0_12, %c0_13] : memref<1x128xf32, #tpu.memory_space<vmem>>, vector<1x128xf32>
    %31 = vector.broadcast %30 : vector<1x128xf32> to vector<128x128xf32>
    %32 = arith.addf %29, %31 : vector<128x128xf32>
    %cst_14 = arith.constant 0.000000e+00 : f32
    %33 = vector.broadcast %cst_14 : f32 to vector<128x128xf32>
    %34 = arith.maximumf %32, %33 : vector<128x128xf32>
    %35 = vector.shape_cast %34 : vector<128x128xf32> to vector<4x32x128xf32>
    %36 = vector.extract_strided_slice %35 {offsets = [0, 0, 0], sizes = [4, 16, 128], strides = [1, 1, 1]} : vector<4x32x128xf32> to vector<4x16x128xf32>
    %37 = vector.extract_strided_slice %35 {offsets = [0, 16, 0], sizes = [4, 16, 128], strides = [1, 1, 1]} : vector<4x32x128xf32> to vector<4x16x128xf32>
    %38 = arith.maximumf %36, %37 : vector<4x16x128xf32>
    %39 = vector.shape_cast %38 : vector<4x16x128xf32> to vector<64x128xf32>
    %40 = vector.shape_cast %39 : vector<64x128xf32> to vector<4x16x128xf32>
    %c0_15 = arith.constant 0 : index
    %c0_16 = arith.constant 0 : index
    %41 = vector.load %arg6[%c0_15, %c0_16] : memref<128x128xbf16, #tpu.memory_space<vmem>>, vector<128x128xbf16>
    %c0_17 = arith.constant 0 : index
    %c0_18 = arith.constant 0 : index
    %42 = vector.load %arg7[%c0_17, %c0_18] : memref<128x32xbf16, #tpu.memory_space<vmem>>, vector<128x32xbf16>
    %c0_19 = arith.constant 0 : index
    %c0_20 = arith.constant 0 : index
    %43 = vector.load %arg8[%c0_19, %c0_20] : memref<128x1xf32, #tpu.memory_space<vmem>>, vector<128x1xf32>
    %44 = vector.extract_strided_slice %40 {offsets = [0, 0, 0], sizes = [1, 16, 128], strides = [1, 1, 1]} : vector<4x16x128xf32> to vector<1x16x128xf32>
    %45 = vector.shape_cast %44 : vector<1x16x128xf32> to vector<16x128xf32>
    %46 = tpu.transpose %45, [1, 0] : vector<16x128xf32> -> vector<128x16xf32>
    %47 = arith.truncf %46 : vector<128x16xf32> to vector<128x16xbf16>
    %cst_21 = arith.constant dense<0.000000e+00> : vector<128x16xf32>
    %48 = tpu.matmul %41, %47, %cst_21 {dimension_numbers = #tpu.dot_dimension_numbers<[1], [0], [0], [1], [0, 0, 1, 1], [], []>} : vector<128x128xbf16>, vector<128x16xbf16>, vector<128x16xf32> -> vector<128x16xf32>
    %49 = vector.broadcast %43 : vector<128x1xf32> to vector<128x16xf32>
    %50 = arith.addf %48, %49 : vector<128x16xf32>
    %c0_22 = arith.constant 0 : index
    %c0_23 = arith.constant 0 : index
    %c0_24 = arith.constant 0 : index
    %51 = vector.load %arg17[%c0_22, %c0_23, %c0_24] : memref<4x128x16xf32, #tpu.memory_space<vmem>>, vector<1x128x16xf32>
    %52 = vector.shape_cast %51 : vector<1x128x16xf32> to vector<128x16xf32>
    %53 = vector.shape_cast %50 : vector<128x16xf32> to vector<1x128x16xf32>
    tpu.vector_store %arg17[%c0_22, %c0_23, %c0_24], %53 {strides = array<i32>} : memref<4x128x16xf32, #tpu.memory_space<vmem>>, vector<1x128x16xf32>,
    %54 = vector.extract_strided_slice %40 {offsets = [1, 0, 0], sizes = [1, 16, 128], strides = [1, 1, 1]} : vector<4x16x128xf32> to vector<1x16x128xf32>
    %55 = vector.shape_cast %54 : vector<1x16x128xf32> to vector<16x128xf32>
    %56 = tpu.transpose %55, [1, 0] : vector<16x128xf32> -> vector<128x16xf32>
    %57 = arith.truncf %56 : vector<128x16xf32> to vector<128x16xbf16>
    %cst_25 = arith.constant dense<0.000000e+00> : vector<128x16xf32>
    %58 = tpu.matmul %41, %57, %cst_25 {dimension_numbers = #tpu.dot_dimension_numbers<[1], [0], [0], [1], [0, 0, 1, 1], [], []>} : vector<128x128xbf16>, vector<128x16xbf16>, vector<128x16xf32> -> vector<128x16xf32>
    %59 = vector.broadcast %43 : vector<128x1xf32> to vector<128x16xf32>
    %60 = arith.addf %58, %59 : vector<128x16xf32>
    %c1 = arith.constant 1 : index
    %c0_26 = arith.constant 0 : index
    %c0_27 = arith.constant 0 : index
    %61 = vector.load %arg17[%c1, %c0_26, %c0_27] : memref<4x128x16xf32, #tpu.memory_space<vmem>>, vector<1x128x16xf32>
    %62 = vector.shape_cast %61 : vector<1x128x16xf32> to vector<128x16xf32>
    %63 = vector.shape_cast %60 : vector<128x16xf32> to vector<1x128x16xf32>
    tpu.vector_store %arg17[%c1, %c0_26, %c0_27], %63 {strides = array<i32>} : memref<4x128x16xf32, #tpu.memory_space<vmem>>, vector<1x128x16xf32>,
    %64 = vector.extract_strided_slice %40 {offsets = [2, 0, 0], sizes = [1, 16, 128], strides = [1, 1, 1]} : vector<4x16x128xf32> to vector<1x16x128xf32>
    %65 = vector.shape_cast %64 : vector<1x16x128xf32> to vector<16x128xf32>
    %66 = tpu.transpose %65, [1, 0] : vector<16x128xf32> -> vector<128x16xf32>
    %67 = arith.truncf %66 : vector<128x16xf32> to vector<128x16xbf16>
    %cst_28 = arith.constant dense<0.000000e+00> : vector<128x16xf32>
    %68 = tpu.matmul %41, %67, %cst_28 {dimension_numbers = #tpu.dot_dimension_numbers<[1], [0], [0], [1], [0, 0, 1, 1], [], []>} : vector<128x128xbf16>, vector<128x16xbf16>, vector<128x16xf32> -> vector<128x16xf32>
    %69 = vector.broadcast %43 : vector<128x1xf32> to vector<128x16xf32>
    %70 = arith.addf %68, %69 : vector<128x16xf32>
    %c2 = arith.constant 2 : index
    %c0_29 = arith.constant 0 : index
    %c0_30 = arith.constant 0 : index
    %71 = vector.load %arg17[%c2, %c0_29, %c0_30] : memref<4x128x16xf32, #tpu.memory_space<vmem>>, vector<1x128x16xf32>
    %72 = vector.shape_cast %71 : vector<1x128x16xf32> to vector<128x16xf32>
    %73 = vector.shape_cast %70 : vector<128x16xf32> to vector<1x128x16xf32>
    tpu.vector_store %arg17[%c2, %c0_29, %c0_30], %73 {strides = array<i32>} : memref<4x128x16xf32, #tpu.memory_space<vmem>>, vector<1x128x16xf32>,
    %74 = vector.extract_strided_slice %40 {offsets = [3, 0, 0], sizes = [1, 16, 128], strides = [1, 1, 1]} : vector<4x16x128xf32> to vector<1x16x128xf32>
    %75 = vector.shape_cast %74 : vector<1x16x128xf32> to vector<16x128xf32>
    %76 = tpu.transpose %75, [1, 0] : vector<16x128xf32> -> vector<128x16xf32>
    %77 = arith.truncf %76 : vector<128x16xf32> to vector<128x16xbf16>
    %cst_31 = arith.constant dense<0.000000e+00> : vector<128x16xf32>
    %78 = tpu.matmul %41, %77, %cst_31 {dimension_numbers = #tpu.dot_dimension_numbers<[1], [0], [0], [1], [0, 0, 1, 1], [], []>} : vector<128x128xbf16>, vector<128x16xbf16>, vector<128x16xf32> -> vector<128x16xf32>
    %79 = vector.broadcast %43 : vector<128x1xf32> to vector<128x16xf32>
    %80 = arith.addf %78, %79 : vector<128x16xf32>
    %c3 = arith.constant 3 : index
    %c0_32 = arith.constant 0 : index
    %c0_33 = arith.constant 0 : index
    %81 = vector.load %arg17[%c3, %c0_32, %c0_33] : memref<4x128x16xf32, #tpu.memory_space<vmem>>, vector<1x128x16xf32>
    %82 = vector.shape_cast %81 : vector<1x128x16xf32> to vector<128x16xf32>
    %83 = vector.shape_cast %80 : vector<128x16xf32> to vector<1x128x16xf32>
    tpu.vector_store %arg17[%c3, %c0_32, %c0_33], %83 {strides = array<i32>} : memref<4x128x16xf32, #tpu.memory_space<vmem>>, vector<1x128x16xf32>,
    %cst_34 = arith.constant 0.000000e+00 : f32
    %84 = vector.broadcast %cst_34 : f32 to vector<32x16xf32>
    %cst_35 = arith.constant 0.000000e+00 : f32
    %85 = vector.broadcast %cst_35 : f32 to vector<32x16xf32>
    %c0_i32 = arith.constant 0 : i32
    %86 = arith.index_cast %c0_i32 : i32 to index
    %c0_36 = arith.constant 0 : index
    %c0_37 = arith.constant 0 : index
    %87 = vector.load %arg17[%86, %c0_36, %c0_37] : memref<4x128x16xf32, #tpu.memory_space<vmem>>, vector<1x128x16xf32>
    %88 = vector.shape_cast %87 : vector<1x128x16xf32> to vector<128x16xf32>
    %89 = arith.truncf %84 : vector<32x16xf32> to vector<32x16xbf16>
    %cst_38 = arith.constant dense<0.000000e+00> : vector<128x16xf32>
    %90 = tpu.matmul %42, %89, %cst_38 {dimension_numbers = #tpu.dot_dimension_numbers<[1], [0], [0], [1], [0, 0, 1, 1], [], []>} : vector<128x32xbf16>, vector<32x16xbf16>, vector<128x16xf32> -> vector<128x16xf32>
    %91 = arith.addf %88, %90 : vector<128x16xf32>
    %92 = vector.extract_strided_slice %91 {offsets = [0, 0], sizes = [32, 16], strides = [1, 1]} : vector<128x16xf32> to vector<32x16xf32>
    %93 = arith.negf %92 : vector<32x16xf32>
    %94 = math.exp %93 : vector<32x16xf32>
    %cst_39 = arith.constant 1.000000e+00 : f32
    %95 = vector.broadcast %cst_39 : f32 to vector<32x16xf32>
    %96 = arith.addf %95, %94 : vector<32x16xf32>
    %97 = arith.divf %95, %96 : vector<32x16xf32>
    %98 = vector.extract_strided_slice %91 {offsets = [32, 0], sizes = [32, 16], strides = [1, 1]} : vector<128x16xf32> to vector<32x16xf32>
    %99 = arith.negf %98 : vector<32x16xf32>
    %100 = math.exp %99 : vector<32x16xf32>
    %cst_40 = arith.constant 1.000000e+00 : f32
    %101 = vector.broadcast %cst_40 : f32 to vector<32x16xf32>
    %102 = arith.addf %101, %100 : vector<32x16xf32>
    %103 = arith.divf %101, %102 : vector<32x16xf32>
    %104 = vector.extract_strided_slice %91 {offsets = [64, 0], sizes = [32, 16], strides = [1, 1]} : vector<128x16xf32> to vector<32x16xf32>
    %105 = math.tanh %104 : vector<32x16xf32>
    %106 = vector.extract_strided_slice %91 {offsets = [96, 0], sizes = [32, 16], strides = [1, 1]} : vector<128x16xf32> to vector<32x16xf32>
    %107 = arith.negf %106 : vector<32x16xf32>
    %108 = math.exp %107 : vector<32x16xf32>
    %cst_41 = arith.constant 1.000000e+00 : f32
    %109 = vector.broadcast %cst_41 : f32 to vector<32x16xf32>
    %110 = arith.addf %109, %108 : vector<32x16xf32>
    %111 = arith.divf %109, %110 : vector<32x16xf32>
    %112 = arith.mulf %103, %85 : vector<32x16xf32>
    %113 = arith.mulf %97, %105 : vector<32x16xf32>
    %114 = arith.addf %112, %113 : vector<32x16xf32>
    %115 = math.tanh %114 : vector<32x16xf32>
    %116 = arith.mulf %111, %115 : vector<32x16xf32>
    %117 = arith.truncf %116 : vector<32x16xf32> to vector<32x16xbf16>
    %118 = arith.index_cast %c0_i32 : i32 to index
    %c0_42 = arith.constant 0 : index
    %c0_43 = arith.constant 0 : index
    %119 = vector.load %arg18[%118, %c0_42, %c0_43] : memref<4x32x16xbf16, #tpu.memory_space<vmem>>, vector<1x32x16xbf16>
    %120 = vector.shape_cast %119 : vector<1x32x16xbf16> to vector<32x16xbf16>
    %121 = vector.shape_cast %117 : vector<32x16xbf16> to vector<1x32x16xbf16>
    tpu.vector_store %arg18[%118, %c0_42, %c0_43], %121 {strides = array<i32>} : memref<4x32x16xbf16, #tpu.memory_space<vmem>>, vector<1x32x16xbf16>,
    %c1_i32 = arith.constant 1 : i32
    %122 = arith.index_cast %c1_i32 : i32 to index
    %c0_44 = arith.constant 0 : index
    %c0_45 = arith.constant 0 : index
    %123 = vector.load %arg17[%122, %c0_44, %c0_45] : memref<4x128x16xf32, #tpu.memory_space<vmem>>, vector<1x128x16xf32>
    %124 = vector.shape_cast %123 : vector<1x128x16xf32> to vector<128x16xf32>
    %125 = arith.truncf %116 : vector<32x16xf32> to vector<32x16xbf16>
    %cst_46 = arith.constant dense<0.000000e+00> : vector<128x16xf32>
    %126 = tpu.matmul %42, %125, %cst_46 {dimension_numbers = #tpu.dot_dimension_numbers<[1], [0], [0], [1], [0, 0, 1, 1], [], []>} : vector<128x32xbf16>, vector<32x16xbf16>, vector<128x16xf32> -> vector<128x16xf32>
    %127 = arith.addf %124, %126 : vector<128x16xf32>
    %128 = vector.extract_strided_slice %127 {offsets = [0, 0], sizes = [32, 16], strides = [1, 1]} : vector<128x16xf32> to vector<32x16xf32>
    %129 = arith.negf %128 : vector<32x16xf32>
    %130 = math.exp %129 : vector<32x16xf32>
    %cst_47 = arith.constant 1.000000e+00 : f32
    %131 = vector.broadcast %cst_47 : f32 to vector<32x16xf32>
    %132 = arith.addf %131, %130 : vector<32x16xf32>
    %133 = arith.divf %131, %132 : vector<32x16xf32>
    %134 = vector.extract_strided_slice %127 {offsets = [32, 0], sizes = [32, 16], strides = [1, 1]} : vector<128x16xf32> to vector<32x16xf32>
    %135 = arith.negf %134 : vector<32x16xf32>
    %136 = math.exp %135 : vector<32x16xf32>
    %cst_48 = arith.constant 1.000000e+00 : f32
    %137 = vector.broadcast %cst_48 : f32 to vector<32x16xf32>
    %138 = arith.addf %137, %136 : vector<32x16xf32>
    %139 = arith.divf %137, %138 : vector<32x16xf32>
    %140 = vector.extract_strided_slice %127 {offsets = [64, 0], sizes = [32, 16], strides = [1, 1]} : vector<128x16xf32> to vector<32x16xf32>
    %141 = math.tanh %140 : vector<32x16xf32>
    %142 = vector.extract_strided_slice %127 {offsets = [96, 0], sizes = [32, 16], strides = [1, 1]} : vector<128x16xf32> to vector<32x16xf32>
    %143 = arith.negf %142 : vector<32x16xf32>
    %144 = math.exp %143 : vector<32x16xf32>
    %cst_49 = arith.constant 1.000000e+00 : f32
    %145 = vector.broadcast %cst_49 : f32 to vector<32x16xf32>
    %146 = arith.addf %145, %144 : vector<32x16xf32>
    %147 = arith.divf %145, %146 : vector<32x16xf32>
    %148 = arith.mulf %139, %114 : vector<32x16xf32>
    %149 = arith.mulf %133, %141 : vector<32x16xf32>
    %150 = arith.addf %148, %149 : vector<32x16xf32>
    %151 = math.tanh %150 : vector<32x16xf32>
    %152 = arith.mulf %147, %151 : vector<32x16xf32>
    %153 = arith.truncf %152 : vector<32x16xf32> to vector<32x16xbf16>
    %154 = arith.index_cast %c1_i32 : i32 to index
    %c0_50 = arith.constant 0 : index
    %c0_51 = arith.constant 0 : index
    %155 = vector.load %arg18[%154, %c0_50, %c0_51] : memref<4x32x16xbf16, #tpu.memory_space<vmem>>, vector<1x32x16xbf16>
    %156 = vector.shape_cast %155 : vector<1x32x16xbf16> to vector<32x16xbf16>
    %157 = vector.shape_cast %153 : vector<32x16xbf16> to vector<1x32x16xbf16>
    tpu.vector_store %arg18[%154, %c0_50, %c0_51], %157 {strides = array<i32>} : memref<4x32x16xbf16, #tpu.memory_space<vmem>>, vector<1x32x16xbf16>,
    %c2_i32 = arith.constant 2 : i32
    %158 = arith.index_cast %c2_i32 : i32 to index
    %c0_52 = arith.constant 0 : index
    %c0_53 = arith.constant 0 : index
    %159 = vector.load %arg17[%158, %c0_52, %c0_53] : memref<4x128x16xf32, #tpu.memory_space<vmem>>, vector<1x128x16xf32>
    %160 = vector.shape_cast %159 : vector<1x128x16xf32> to vector<128x16xf32>
    %161 = arith.truncf %152 : vector<32x16xf32> to vector<32x16xbf16>
    %cst_54 = arith.constant dense<0.000000e+00> : vector<128x16xf32>
    %162 = tpu.matmul %42, %161, %cst_54 {dimension_numbers = #tpu.dot_dimension_numbers<[1], [0], [0], [1], [0, 0, 1, 1], [], []>} : vector<128x32xbf16>, vector<32x16xbf16>, vector<128x16xf32> -> vector<128x16xf32>
    %163 = arith.addf %160, %162 : vector<128x16xf32>
    %164 = vector.extract_strided_slice %163 {offsets = [0, 0], sizes = [32, 16], strides = [1, 1]} : vector<128x16xf32> to vector<32x16xf32>
    %165 = arith.negf %164 : vector<32x16xf32>
    %166 = math.exp %165 : vector<32x16xf32>
    %cst_55 = arith.constant 1.000000e+00 : f32
    %167 = vector.broadcast %cst_55 : f32 to vector<32x16xf32>
    %168 = arith.addf %167, %166 : vector<32x16xf32>
    %169 = arith.divf %167, %168 : vector<32x16xf32>
    %170 = vector.extract_strided_slice %163 {offsets = [32, 0], sizes = [32, 16], strides = [1, 1]} : vector<128x16xf32> to vector<32x16xf32>
    %171 = arith.negf %170 : vector<32x16xf32>
    %172 = math.exp %171 : vector<32x16xf32>
    %cst_56 = arith.constant 1.000000e+00 : f32
    %173 = vector.broadcast %cst_56 : f32 to vector<32x16xf32>
    %174 = arith.addf %173, %172 : vector<32x16xf32>
    %175 = arith.divf %173, %174 : vector<32x16xf32>
    %176 = vector.extract_strided_slice %163 {offsets = [64, 0], sizes = [32, 16], strides = [1, 1]} : vector<128x16xf32> to vector<32x16xf32>
    %177 = math.tanh %176 : vector<32x16xf32>
    %178 = vector.extract_strided_slice %163 {offsets = [96, 0], sizes = [32, 16], strides = [1, 1]} : vector<128x16xf32> to vector<32x16xf32>
    %179 = arith.negf %178 : vector<32x16xf32>
    %180 = math.exp %179 : vector<32x16xf32>
    %cst_57 = arith.constant 1.000000e+00 : f32
    %181 = vector.broadcast %cst_57 : f32 to vector<32x16xf32>
    %182 = arith.addf %181, %180 : vector<32x16xf32>
    %183 = arith.divf %181, %182 : vector<32x16xf32>
    %184 = arith.mulf %175, %150 : vector<32x16xf32>
    %185 = arith.mulf %169, %177 : vector<32x16xf32>
    %186 = arith.addf %184, %185 : vector<32x16xf32>
    %187 = math.tanh %186 : vector<32x16xf32>
    %188 = arith.mulf %183, %187 : vector<32x16xf32>
    %189 = arith.truncf %188 : vector<32x16xf32> to vector<32x16xbf16>
    %190 = arith.index_cast %c2_i32 : i32 to index
    %c0_58 = arith.constant 0 : index
    %c0_59 = arith.constant 0 : index
    %191 = vector.load %arg18[%190, %c0_58, %c0_59] : memref<4x32x16xbf16, #tpu.memory_space<vmem>>, vector<1x32x16xbf16>
    %192 = vector.shape_cast %191 : vector<1x32x16xbf16> to vector<32x16xbf16>
    %193 = vector.shape_cast %189 : vector<32x16xbf16> to vector<1x32x16xbf16>
    tpu.vector_store %arg18[%190, %c0_58, %c0_59], %193 {strides = array<i32>} : memref<4x32x16xbf16, #tpu.memory_space<vmem>>, vector<1x32x16xbf16>,
    %c3_i32 = arith.constant 3 : i32
    %194 = arith.index_cast %c3_i32 : i32 to index
    %c0_60 = arith.constant 0 : index
    %c0_61 = arith.constant 0 : index
    %195 = vector.load %arg17[%194, %c0_60, %c0_61] : memref<4x128x16xf32, #tpu.memory_space<vmem>>, vector<1x128x16xf32>
    %196 = vector.shape_cast %195 : vector<1x128x16xf32> to vector<128x16xf32>
    %197 = arith.truncf %188 : vector<32x16xf32> to vector<32x16xbf16>
    %cst_62 = arith.constant dense<0.000000e+00> : vector<128x16xf32>
    %198 = tpu.matmul %42, %197, %cst_62 {dimension_numbers = #tpu.dot_dimension_numbers<[1], [0], [0], [1], [0, 0, 1, 1], [], []>} : vector<128x32xbf16>, vector<32x16xbf16>, vector<128x16xf32> -> vector<128x16xf32>
    %199 = arith.addf %196, %198 : vector<128x16xf32>
    %200 = vector.extract_strided_slice %199 {offsets = [0, 0], sizes = [32, 16], strides = [1, 1]} : vector<128x16xf32> to vector<32x16xf32>
    %201 = arith.negf %200 : vector<32x16xf32>
    %202 = math.exp %201 : vector<32x16xf32>
    %cst_63 = arith.constant 1.000000e+00 : f32
    %203 = vector.broadcast %cst_63 : f32 to vector<32x16xf32>
    %204 = arith.addf %203, %202 : vector<32x16xf32>
    %205 = arith.divf %203, %204 : vector<32x16xf32>
    %206 = vector.extract_strided_slice %199 {offsets = [32, 0], sizes = [32, 16], strides = [1, 1]} : vector<128x16xf32> to vector<32x16xf32>
    %207 = arith.negf %206 : vector<32x16xf32>
    %208 = math.exp %207 : vector<32x16xf32>
    %cst_64 = arith.constant 1.000000e+00 : f32
    %209 = vector.broadcast %cst_64 : f32 to vector<32x16xf32>
    %210 = arith.addf %209, %208 : vector<32x16xf32>
    %211 = arith.divf %209, %210 : vector<32x16xf32>
    %212 = vector.extract_strided_slice %199 {offsets = [64, 0], sizes = [32, 16], strides = [1, 1]} : vector<128x16xf32> to vector<32x16xf32>
    %213 = math.tanh %212 : vector<32x16xf32>
    %214 = vector.extract_strided_slice %199 {offsets = [96, 0], sizes = [32, 16], strides = [1, 1]} : vector<128x16xf32> to vector<32x16xf32>
    %215 = arith.negf %214 : vector<32x16xf32>
    %216 = math.exp %215 : vector<32x16xf32>
    %cst_65 = arith.constant 1.000000e+00 : f32
    %217 = vector.broadcast %cst_65 : f32 to vector<32x16xf32>
    %218 = arith.addf %217, %216 : vector<32x16xf32>
    %219 = arith.divf %217, %218 : vector<32x16xf32>
    %220 = arith.mulf %211, %186 : vector<32x16xf32>
    %221 = arith.mulf %205, %213 : vector<32x16xf32>
    %222 = arith.addf %220, %221 : vector<32x16xf32>
    %223 = math.tanh %222 : vector<32x16xf32>
    %224 = arith.mulf %219, %223 : vector<32x16xf32>
    %225 = arith.truncf %224 : vector<32x16xf32> to vector<32x16xbf16>
    %226 = arith.index_cast %c3_i32 : i32 to index
    %c0_66 = arith.constant 0 : index
    %c0_67 = arith.constant 0 : index
    %227 = vector.load %arg18[%226, %c0_66, %c0_67] : memref<4x32x16xbf16, #tpu.memory_space<vmem>>, vector<1x32x16xbf16>
    %228 = vector.shape_cast %227 : vector<1x32x16xbf16> to vector<32x16xbf16>
    %229 = vector.shape_cast %225 : vector<32x16xbf16> to vector<1x32x16xbf16>
    tpu.vector_store %arg18[%226, %c0_66, %c0_67], %229 {strides = array<i32>} : memref<4x32x16xbf16, #tpu.memory_space<vmem>>, vector<1x32x16xbf16>,
    %c4_i32 = arith.constant 4 : i32
    %c0_68 = arith.constant 0 : index
    %c0_69 = arith.constant 0 : index
    %230 = vector.load %arg9[%c0_68, %c0_69] : memref<128x32xbf16, #tpu.memory_space<vmem>>, vector<128x32xbf16>
    %c0_70 = arith.constant 0 : index
    %c0_71 = arith.constant 0 : index
    %231 = vector.load %arg10[%c0_70, %c0_71] : memref<128x32xbf16, #tpu.memory_space<vmem>>, vector<128x32xbf16>
    %c0_72 = arith.constant 0 : index
    %c0_73 = arith.constant 0 : index
    %232 = vector.load %arg11[%c0_72, %c0_73] : memref<128x1xf32, #tpu.memory_space<vmem>>, vector<128x1xf32>
    %c0_i32_74 = arith.constant 0 : i32
    %233 = arith.index_cast %c0_i32_74 : i32 to index
    %c0_75 = arith.constant 0 : index
    %c0_76 = arith.constant 0 : index
    %234 = vector.load %arg18[%233, %c0_75, %c0_76] : memref<4x32x16xbf16, #tpu.memory_space<vmem>>, vector<1x32x16xbf16>
    %235 = vector.shape_cast %234 : vector<1x32x16xbf16> to vector<32x16xbf16>
    %cst_77 = arith.constant dense<0.000000e+00> : vector<128x16xf32>
    %236 = tpu.matmul %230, %235, %cst_77 {dimension_numbers = #tpu.dot_dimension_numbers<[1], [0], [0], [1], [0, 0, 1, 1], [], []>} : vector<128x32xbf16>, vector<32x16xbf16>, vector<128x16xf32> -> vector<128x16xf32>
    %237 = vector.broadcast %232 : vector<128x1xf32> to vector<128x16xf32>
    %238 = arith.addf %236, %237 : vector<128x16xf32>
    %239 = arith.index_cast %c0_i32_74 : i32 to index
    %c0_78 = arith.constant 0 : index
    %c0_79 = arith.constant 0 : index
    %240 = vector.load %arg17[%239, %c0_78, %c0_79] : memref<4x128x16xf32, #tpu.memory_space<vmem>>, vector<1x128x16xf32>
    %241 = vector.shape_cast %240 : vector<1x128x16xf32> to vector<128x16xf32>
    %242 = vector.shape_cast %238 : vector<128x16xf32> to vector<1x128x16xf32>
    tpu.vector_store %arg17[%239, %c0_78, %c0_79], %242 {strides = array<i32>} : memref<4x128x16xf32, #tpu.memory_space<vmem>>, vector<1x128x16xf32>,
    %c1_i32_80 = arith.constant 1 : i32
    %243 = arith.index_cast %c1_i32_80 : i32 to index
    %c0_81 = arith.constant 0 : index
    %c0_82 = arith.constant 0 : index
    %244 = vector.load %arg18[%243, %c0_81, %c0_82] : memref<4x32x16xbf16, #tpu.memory_space<vmem>>, vector<1x32x16xbf16>
    %245 = vector.shape_cast %244 : vector<1x32x16xbf16> to vector<32x16xbf16>
    %cst_83 = arith.constant dense<0.000000e+00> : vector<128x16xf32>
    %246 = tpu.matmul %230, %245, %cst_83 {dimension_numbers = #tpu.dot_dimension_numbers<[1], [0], [0], [1], [0, 0, 1, 1], [], []>} : vector<128x32xbf16>, vector<32x16xbf16>, vector<128x16xf32> -> vector<128x16xf32>
    %247 = vector.broadcast %232 : vector<128x1xf32> to vector<128x16xf32>
    %248 = arith.addf %246, %247 : vector<128x16xf32>
    %249 = arith.index_cast %c1_i32_80 : i32 to index
    %c0_84 = arith.constant 0 : index
    %c0_85 = arith.constant 0 : index
    %250 = vector.load %arg17[%249, %c0_84, %c0_85] : memref<4x128x16xf32, #tpu.memory_space<vmem>>, vector<1x128x16xf32>
    %251 = vector.shape_cast %250 : vector<1x128x16xf32> to vector<128x16xf32>
    %252 = vector.shape_cast %248 : vector<128x16xf32> to vector<1x128x16xf32>
    tpu.vector_store %arg17[%249, %c0_84, %c0_85], %252 {strides = array<i32>} : memref<4x128x16xf32, #tpu.memory_space<vmem>>, vector<1x128x16xf32>,
    %c2_i32_86 = arith.constant 2 : i32
    %253 = arith.index_cast %c2_i32_86 : i32 to index
    %c0_87 = arith.constant 0 : index
    %c0_88 = arith.constant 0 : index
    %254 = vector.load %arg18[%253, %c0_87, %c0_88] : memref<4x32x16xbf16, #tpu.memory_space<vmem>>, vector<1x32x16xbf16>
    %255 = vector.shape_cast %254 : vector<1x32x16xbf16> to vector<32x16xbf16>
    %cst_89 = arith.constant dense<0.000000e+00> : vector<128x16xf32>
    %256 = tpu.matmul %230, %255, %cst_89 {dimension_numbers = #tpu.dot_dimension_numbers<[1], [0], [0], [1], [0, 0, 1, 1], [], []>} : vector<128x32xbf16>, vector<32x16xbf16>, vector<128x16xf32> -> vector<128x16xf32>
    %257 = vector.broadcast %232 : vector<128x1xf32> to vector<128x16xf32>
    %258 = arith.addf %256, %257 : vector<128x16xf32>
    %259 = arith.index_cast %c2_i32_86 : i32 to index
    %c0_90 = arith.constant 0 : index
    %c0_91 = arith.constant 0 : index
    %260 = vector.load %arg17[%259, %c0_90, %c0_91] : memref<4x128x16xf32, #tpu.memory_space<vmem>>, vector<1x128x16xf32>
    %261 = vector.shape_cast %260 : vector<1x128x16xf32> to vector<128x16xf32>
    %262 = vector.shape_cast %258 : vector<128x16xf32> to vector<1x128x16xf32>
    tpu.vector_store %arg17[%259, %c0_90, %c0_91], %262 {strides = array<i32>} : memref<4x128x16xf32, #tpu.memory_space<vmem>>, vector<1x128x16xf32>,
    %c3_i32_92 = arith.constant 3 : i32
    %263 = arith.index_cast %c3_i32_92 : i32 to index
    %c0_93 = arith.constant 0 : index
    %c0_94 = arith.constant 0 : index
    %264 = vector.load %arg18[%263, %c0_93, %c0_94] : memref<4x32x16xbf16, #tpu.memory_space<vmem>>, vector<1x32x16xbf16>
    %265 = vector.shape_cast %264 : vector<1x32x16xbf16> to vector<32x16xbf16>
    %cst_95 = arith.constant dense<0.000000e+00> : vector<128x16xf32>
    %266 = tpu.matmul %230, %265, %cst_95 {dimension_numbers = #tpu.dot_dimension_numbers<[1], [0], [0], [1], [0, 0, 1, 1], [], []>} : vector<128x32xbf16>, vector<32x16xbf16>, vector<128x16xf32> -> vector<128x16xf32>
    %267 = vector.broadcast %232 : vector<128x1xf32> to vector<128x16xf32>
    %268 = arith.addf %266, %267 : vector<128x16xf32>
    %269 = arith.index_cast %c3_i32_92 : i32 to index
    %c0_96 = arith.constant 0 : index
    %c0_97 = arith.constant 0 : index
    %270 = vector.load %arg17[%269, %c0_96, %c0_97] : memref<4x128x16xf32, #tpu.memory_space<vmem>>, vector<1x128x16xf32>
    %271 = vector.shape_cast %270 : vector<1x128x16xf32> to vector<128x16xf32>
    %272 = vector.shape_cast %268 : vector<128x16xf32> to vector<1x128x16xf32>
    tpu.vector_store %arg17[%269, %c0_96, %c0_97], %272 {strides = array<i32>} : memref<4x128x16xf32, #tpu.memory_space<vmem>>, vector<1x128x16xf32>,
    %c4_i32_98 = arith.constant 4 : i32
    %cst_99 = arith.constant 0.000000e+00 : f32
    %273 = vector.broadcast %cst_99 : f32 to vector<32x16xf32>
    %cst_100 = arith.constant 0.000000e+00 : f32
    %274 = vector.broadcast %cst_100 : f32 to vector<32x16xf32>
    %c0_i32_101 = arith.constant 0 : i32
    %275 = arith.index_cast %c0_i32_101 : i32 to index
    %c0_102 = arith.constant 0 : index
    %c0_103 = arith.constant 0 : index
    %276 = vector.load %arg17[%275, %c0_102, %c0_103] : memref<4x128x16xf32, #tpu.memory_space<vmem>>, vector<1x128x16xf32>
    %277 = vector.shape_cast %276 : vector<1x128x16xf32> to vector<128x16xf32>
    %278 = arith.truncf %273 : vector<32x16xf32> to vector<32x16xbf16>
    %cst_104 = arith.constant dense<0.000000e+00> : vector<128x16xf32>
    %279 = tpu.matmul %231, %278, %cst_104 {dimension_numbers = #tpu.dot_dimension_numbers<[1], [0], [0], [1], [0, 0, 1, 1], [], []>} : vector<128x32xbf16>, vector<32x16xbf16>, vector<128x16xf32> -> vector<128x16xf32>
    %280 = arith.addf %277, %279 : vector<128x16xf32>
    %281 = vector.extract_strided_slice %280 {offsets = [0, 0], sizes = [32, 16], strides = [1, 1]} : vector<128x16xf32> to vector<32x16xf32>
    %282 = arith.negf %281 : vector<32x16xf32>
    %283 = math.exp %282 : vector<32x16xf32>
    %cst_105 = arith.constant 1.000000e+00 : f32
    %284 = vector.broadcast %cst_105 : f32 to vector<32x16xf32>
    %285 = arith.addf %284, %283 : vector<32x16xf32>
    %286 = arith.divf %284, %285 : vector<32x16xf32>
    %287 = vector.extract_strided_slice %280 {offsets = [32, 0], sizes = [32, 16], strides = [1, 1]} : vector<128x16xf32> to vector<32x16xf32>
    %288 = arith.negf %287 : vector<32x16xf32>
    %289 = math.exp %288 : vector<32x16xf32>
    %cst_106 = arith.constant 1.000000e+00 : f32
    %290 = vector.broadcast %cst_106 : f32 to vector<32x16xf32>
    %291 = arith.addf %290, %289 : vector<32x16xf32>
    %292 = arith.divf %290, %291 : vector<32x16xf32>
    %293 = vector.extract_strided_slice %280 {offsets = [64, 0], sizes = [32, 16], strides = [1, 1]} : vector<128x16xf32> to vector<32x16xf32>
    %294 = math.tanh %293 : vector<32x16xf32>
    %295 = vector.extract_strided_slice %280 {offsets = [96, 0], sizes = [32, 16], strides = [1, 1]} : vector<128x16xf32> to vector<32x16xf32>
    %296 = arith.negf %295 : vector<32x16xf32>
    %297 = math.exp %296 : vector<32x16xf32>
    %cst_107 = arith.constant 1.000000e+00 : f32
    %298 = vector.broadcast %cst_107 : f32 to vector<32x16xf32>
    %299 = arith.addf %298, %297 : vector<32x16xf32>
    %300 = arith.divf %298, %299 : vector<32x16xf32>
    %301 = arith.mulf %292, %274 : vector<32x16xf32>
    %302 = arith.mulf %286, %294 : vector<32x16xf32>
    %303 = arith.addf %301, %302 : vector<32x16xf32>
    %304 = math.tanh %303 : vector<32x16xf32>
    %305 = arith.mulf %300, %304 : vector<32x16xf32>
    %306 = arith.truncf %305 : vector<32x16xf32> to vector<32x16xbf16>
    %307 = arith.index_cast %c0_i32_101 : i32 to index
    %c0_108 = arith.constant 0 : index
    %c0_109 = arith.constant 0 : index
    %308 = vector.load %arg18[%307, %c0_108, %c0_109] : memref<4x32x16xbf16, #tpu.memory_space<vmem>>, vector<1x32x16xbf16>
    %309 = vector.shape_cast %308 : vector<1x32x16xbf16> to vector<32x16xbf16>
    %310 = vector.shape_cast %306 : vector<32x16xbf16> to vector<1x32x16xbf16>
    tpu.vector_store %arg18[%307, %c0_108, %c0_109], %310 {strides = array<i32>} : memref<4x32x16xbf16, #tpu.memory_space<vmem>>, vector<1x32x16xbf16>,
    %c1_i32_110 = arith.constant 1 : i32
    %311 = arith.index_cast %c1_i32_110 : i32 to index
    %c0_111 = arith.constant 0 : index
    %c0_112 = arith.constant 0 : index
    %312 = vector.load %arg17[%311, %c0_111, %c0_112] : memref<4x128x16xf32, #tpu.memory_space<vmem>>, vector<1x128x16xf32>
    %313 = vector.shape_cast %312 : vector<1x128x16xf32> to vector<128x16xf32>
    %314 = arith.truncf %305 : vector<32x16xf32> to vector<32x16xbf16>
    %cst_113 = arith.constant dense<0.000000e+00> : vector<128x16xf32>
    %315 = tpu.matmul %231, %314, %cst_113 {dimension_numbers = #tpu.dot_dimension_numbers<[1], [0], [0], [1], [0, 0, 1, 1], [], []>} : vector<128x32xbf16>, vector<32x16xbf16>, vector<128x16xf32> -> vector<128x16xf32>
    %316 = arith.addf %313, %315 : vector<128x16xf32>
    %317 = vector.extract_strided_slice %316 {offsets = [0, 0], sizes = [32, 16], strides = [1, 1]} : vector<128x16xf32> to vector<32x16xf32>
    %318 = arith.negf %317 : vector<32x16xf32>
    %319 = math.exp %318 : vector<32x16xf32>
    %cst_114 = arith.constant 1.000000e+00 : f32
    %320 = vector.broadcast %cst_114 : f32 to vector<32x16xf32>
    %321 = arith.addf %320, %319 : vector<32x16xf32>
    %322 = arith.divf %320, %321 : vector<32x16xf32>
    %323 = vector.extract_strided_slice %316 {offsets = [32, 0], sizes = [32, 16], strides = [1, 1]} : vector<128x16xf32> to vector<32x16xf32>
    %324 = arith.negf %323 : vector<32x16xf32>
    %325 = math.exp %324 : vector<32x16xf32>
    %cst_115 = arith.constant 1.000000e+00 : f32
    %326 = vector.broadcast %cst_115 : f32 to vector<32x16xf32>
    %327 = arith.addf %326, %325 : vector<32x16xf32>
    %328 = arith.divf %326, %327 : vector<32x16xf32>
    %329 = vector.extract_strided_slice %316 {offsets = [64, 0], sizes = [32, 16], strides = [1, 1]} : vector<128x16xf32> to vector<32x16xf32>
    %330 = math.tanh %329 : vector<32x16xf32>
    %331 = vector.extract_strided_slice %316 {offsets = [96, 0], sizes = [32, 16], strides = [1, 1]} : vector<128x16xf32> to vector<32x16xf32>
    %332 = arith.negf %331 : vector<32x16xf32>
    %333 = math.exp %332 : vector<32x16xf32>
    %cst_116 = arith.constant 1.000000e+00 : f32
    %334 = vector.broadcast %cst_116 : f32 to vector<32x16xf32>
    %335 = arith.addf %334, %333 : vector<32x16xf32>
    %336 = arith.divf %334, %335 : vector<32x16xf32>
    %337 = arith.mulf %328, %303 : vector<32x16xf32>
    %338 = arith.mulf %322, %330 : vector<32x16xf32>
    %339 = arith.addf %337, %338 : vector<32x16xf32>
    %340 = math.tanh %339 : vector<32x16xf32>
    %341 = arith.mulf %336, %340 : vector<32x16xf32>
    %342 = arith.truncf %341 : vector<32x16xf32> to vector<32x16xbf16>
    %343 = arith.index_cast %c1_i32_110 : i32 to index
    %c0_117 = arith.constant 0 : index
    %c0_118 = arith.constant 0 : index
    %344 = vector.load %arg18[%343, %c0_117, %c0_118] : memref<4x32x16xbf16, #tpu.memory_space<vmem>>, vector<1x32x16xbf16>
    %345 = vector.shape_cast %344 : vector<1x32x16xbf16> to vector<32x16xbf16>
    %346 = vector.shape_cast %342 : vector<32x16xbf16> to vector<1x32x16xbf16>
    tpu.vector_store %arg18[%343, %c0_117, %c0_118], %346 {strides = array<i32>} : memref<4x32x16xbf16, #tpu.memory_space<vmem>>, vector<1x32x16xbf16>,
    %c2_i32_119 = arith.constant 2 : i32
    %347 = arith.index_cast %c2_i32_119 : i32 to index
    %c0_120 = arith.constant 0 : index
    %c0_121 = arith.constant 0 : index
    %348 = vector.load %arg17[%347, %c0_120, %c0_121] : memref<4x128x16xf32, #tpu.memory_space<vmem>>, vector<1x128x16xf32>
    %349 = vector.shape_cast %348 : vector<1x128x16xf32> to vector<128x16xf32>
    %350 = arith.truncf %341 : vector<32x16xf32> to vector<32x16xbf16>
    %cst_122 = arith.constant dense<0.000000e+00> : vector<128x16xf32>
    %351 = tpu.matmul %231, %350, %cst_122 {dimension_numbers = #tpu.dot_dimension_numbers<[1], [0], [0], [1], [0, 0, 1, 1], [], []>} : vector<128x32xbf16>, vector<32x16xbf16>, vector<128x16xf32> -> vector<128x16xf32>
    %352 = arith.addf %349, %351 : vector<128x16xf32>
    %353 = vector.extract_strided_slice %352 {offsets = [0, 0], sizes = [32, 16], strides = [1, 1]} : vector<128x16xf32> to vector<32x16xf32>
    %354 = arith.negf %353 : vector<32x16xf32>
    %355 = math.exp %354 : vector<32x16xf32>
    %cst_123 = arith.constant 1.000000e+00 : f32
    %356 = vector.broadcast %cst_123 : f32 to vector<32x16xf32>
    %357 = arith.addf %356, %355 : vector<32x16xf32>
    %358 = arith.divf %356, %357 : vector<32x16xf32>
    %359 = vector.extract_strided_slice %352 {offsets = [32, 0], sizes = [32, 16], strides = [1, 1]} : vector<128x16xf32> to vector<32x16xf32>
    %360 = arith.negf %359 : vector<32x16xf32>
    %361 = math.exp %360 : vector<32x16xf32>
    %cst_124 = arith.constant 1.000000e+00 : f32
    %362 = vector.broadcast %cst_124 : f32 to vector<32x16xf32>
    %363 = arith.addf %362, %361 : vector<32x16xf32>
    %364 = arith.divf %362, %363 : vector<32x16xf32>
    %365 = vector.extract_strided_slice %352 {offsets = [64, 0], sizes = [32, 16], strides = [1, 1]} : vector<128x16xf32> to vector<32x16xf32>
    %366 = math.tanh %365 : vector<32x16xf32>
    %367 = vector.extract_strided_slice %352 {offsets = [96, 0], sizes = [32, 16], strides = [1, 1]} : vector<128x16xf32> to vector<32x16xf32>
    %368 = arith.negf %367 : vector<32x16xf32>
    %369 = math.exp %368 : vector<32x16xf32>
    %cst_125 = arith.constant 1.000000e+00 : f32
    %370 = vector.broadcast %cst_125 : f32 to vector<32x16xf32>
    %371 = arith.addf %370, %369 : vector<32x16xf32>
    %372 = arith.divf %370, %371 : vector<32x16xf32>
    %373 = arith.mulf %364, %339 : vector<32x16xf32>
    %374 = arith.mulf %358, %366 : vector<32x16xf32>
    %375 = arith.addf %373, %374 : vector<32x16xf32>
    %376 = math.tanh %375 : vector<32x16xf32>
    %377 = arith.mulf %372, %376 : vector<32x16xf32>
    %378 = arith.truncf %377 : vector<32x16xf32> to vector<32x16xbf16>
    %379 = arith.index_cast %c2_i32_119 : i32 to index
    %c0_126 = arith.constant 0 : index
    %c0_127 = arith.constant 0 : index
    %380 = vector.load %arg18[%379, %c0_126, %c0_127] : memref<4x32x16xbf16, #tpu.memory_space<vmem>>, vector<1x32x16xbf16>
    %381 = vector.shape_cast %380 : vector<1x32x16xbf16> to vector<32x16xbf16>
    %382 = vector.shape_cast %378 : vector<32x16xbf16> to vector<1x32x16xbf16>
    tpu.vector_store %arg18[%379, %c0_126, %c0_127], %382 {strides = array<i32>} : memref<4x32x16xbf16, #tpu.memory_space<vmem>>, vector<1x32x16xbf16>,
    %c3_i32_128 = arith.constant 3 : i32
    %383 = arith.index_cast %c3_i32_128 : i32 to index
    %c0_129 = arith.constant 0 : index
    %c0_130 = arith.constant 0 : index
    %384 = vector.load %arg17[%383, %c0_129, %c0_130] : memref<4x128x16xf32, #tpu.memory_space<vmem>>, vector<1x128x16xf32>
    %385 = vector.shape_cast %384 : vector<1x128x16xf32> to vector<128x16xf32>
    %386 = arith.truncf %377 : vector<32x16xf32> to vector<32x16xbf16>
    %cst_131 = arith.constant dense<0.000000e+00> : vector<128x16xf32>
    %387 = tpu.matmul %231, %386, %cst_131 {dimension_numbers = #tpu.dot_dimension_numbers<[1], [0], [0], [1], [0, 0, 1, 1], [], []>} : vector<128x32xbf16>, vector<32x16xbf16>, vector<128x16xf32> -> vector<128x16xf32>
    %388 = arith.addf %385, %387 : vector<128x16xf32>
    %389 = vector.extract_strided_slice %388 {offsets = [0, 0], sizes = [32, 16], strides = [1, 1]} : vector<128x16xf32> to vector<32x16xf32>
    %390 = arith.negf %389 : vector<32x16xf32>
    %391 = math.exp %390 : vector<32x16xf32>
    %cst_132 = arith.constant 1.000000e+00 : f32
    %392 = vector.broadcast %cst_132 : f32 to vector<32x16xf32>
    %393 = arith.addf %392, %391 : vector<32x16xf32>
    %394 = arith.divf %392, %393 : vector<32x16xf32>
    %395 = vector.extract_strided_slice %388 {offsets = [32, 0], sizes = [32, 16], strides = [1, 1]} : vector<128x16xf32> to vector<32x16xf32>
    %396 = arith.negf %395 : vector<32x16xf32>
    %397 = math.exp %396 : vector<32x16xf32>
    %cst_133 = arith.constant 1.000000e+00 : f32
    %398 = vector.broadcast %cst_133 : f32 to vector<32x16xf32>
    %399 = arith.addf %398, %397 : vector<32x16xf32>
    %400 = arith.divf %398, %399 : vector<32x16xf32>
    %401 = vector.extract_strided_slice %388 {offsets = [64, 0], sizes = [32, 16], strides = [1, 1]} : vector<128x16xf32> to vector<32x16xf32>
    %402 = math.tanh %401 : vector<32x16xf32>
    %403 = vector.extract_strided_slice %388 {offsets = [96, 0], sizes = [32, 16], strides = [1, 1]} : vector<128x16xf32> to vector<32x16xf32>
    %404 = arith.negf %403 : vector<32x16xf32>
    %405 = math.exp %404 : vector<32x16xf32>
    %cst_134 = arith.constant 1.000000e+00 : f32
    %406 = vector.broadcast %cst_134 : f32 to vector<32x16xf32>
    %407 = arith.addf %406, %405 : vector<32x16xf32>
    %408 = arith.divf %406, %407 : vector<32x16xf32>
    %409 = arith.mulf %400, %375 : vector<32x16xf32>
    %410 = arith.mulf %394, %402 : vector<32x16xf32>
    %411 = arith.addf %409, %410 : vector<32x16xf32>
    %412 = math.tanh %411 : vector<32x16xf32>
    %413 = arith.mulf %408, %412 : vector<32x16xf32>
    %414 = arith.truncf %413 : vector<32x16xf32> to vector<32x16xbf16>
    %415 = arith.index_cast %c3_i32_128 : i32 to index
    %c0_135 = arith.constant 0 : index
    %c0_136 = arith.constant 0 : index
    %416 = vector.load %arg18[%415, %c0_135, %c0_136] : memref<4x32x16xbf16, #tpu.memory_space<vmem>>, vector<1x32x16xbf16>
    %417 = vector.shape_cast %416 : vector<1x32x16xbf16> to vector<32x16xbf16>
    %418 = vector.shape_cast %414 : vector<32x16xbf16> to vector<1x32x16xbf16>
    tpu.vector_store %arg18[%415, %c0_135, %c0_136], %418 {strides = array<i32>} : memref<4x32x16xbf16, #tpu.memory_space<vmem>>, vector<1x32x16xbf16>,
    %c4_i32_137 = arith.constant 4 : i32
    %c0_138 = arith.constant 0 : index
    %c0_139 = arith.constant 0 : index
    %419 = vector.load %arg12[%c0_138, %c0_139] : memref<128x32xbf16, #tpu.memory_space<vmem>>, vector<128x32xbf16>
    %420 = arith.truncf %413 : vector<32x16xf32> to vector<32x16xbf16>
    %cst_140 = arith.constant dense<0.000000e+00> : vector<128x16xf32>
    %421 = tpu.matmul %419, %420, %cst_140 {dimension_numbers = #tpu.dot_dimension_numbers<[1], [0], [0], [1], [0, 0, 1, 1], [], []>} : vector<128x32xbf16>, vector<32x16xbf16>, vector<128x16xf32> -> vector<128x16xf32>
    %c0_141 = arith.constant 0 : index
    %c0_142 = arith.constant 0 : index
    %422 = vector.load %arg13[%c0_141, %c0_142] : memref<128x1xf32, #tpu.memory_space<vmem>>, vector<128x1xf32>
    %423 = vector.broadcast %422 : vector<128x1xf32> to vector<128x16xf32>
    %424 = arith.addf %421, %423 : vector<128x16xf32>
    %cst_143 = arith.constant 0.000000e+00 : f32
    %425 = vector.broadcast %cst_143 : f32 to vector<128x16xf32>
    %426 = arith.maximumf %424, %425 : vector<128x16xf32>
    %c0_144 = arith.constant 0 : index
    %c0_145 = arith.constant 0 : index
    %427 = vector.load %arg14[%c0_144, %c0_145] : memref<16x128xbf16, #tpu.memory_space<vmem>>, vector<16x128xbf16>
    %428 = arith.truncf %426 : vector<128x16xf32> to vector<128x16xbf16>
    %cst_146 = arith.constant dense<0.000000e+00> : vector<16x16xf32>
    %429 = tpu.matmul %427, %428, %cst_146 {dimension_numbers = #tpu.dot_dimension_numbers<[1], [0], [0], [1], [0, 0, 1, 1], [], []>} : vector<16x128xbf16>, vector<128x16xbf16>, vector<16x16xf32> -> vector<16x16xf32>
    %c0_147 = arith.constant 0 : index
    %c0_148 = arith.constant 0 : index
    %430 = vector.load %arg15[%c0_147, %c0_148] : memref<16x1xf32, #tpu.memory_space<vmem>>, vector<16x1xf32>
    %431 = vector.broadcast %430 : vector<16x1xf32> to vector<16x16xf32>
    %432 = arith.addf %429, %431 : vector<16x16xf32>
    %c0_149 = arith.constant 0 : index
    %c0_150 = arith.constant 0 : index
    %c0_151 = arith.constant 0 : index
    %433 = vector.load %arg16[%c0_149, %c0_150, %c0_151] : memref<1x16x16xf32, #tpu.memory_space<vmem>>, vector<1x16x16xf32>
    %434 = vector.shape_cast %433 : vector<1x16x16xf32> to vector<16x16xf32>
    %435 = vector.shape_cast %432 : vector<16x16xf32> to vector<1x16x16xf32>
    tpu.vector_store %arg16[%c0_149, %c0_150, %c0_151], %435 {strides = array<i32>} : memref<1x16x16xf32, #tpu.memory_space<vmem>>, vector<1x16x16xf32>,
    return
  }
  func.func @transform_0(%arg0: i32) -> (i32, i32, i32) {
    %c0_i32 = arith.constant 0 : i32
    %c0_i32_0 = arith.constant 0 : i32
    %c0_i32_1 = arith.constant 0 : i32
    return %c0_i32, %arg0, %c0_i32_0 : i32, i32, i32
  }
  func.func @transform_1(%arg0: i32) -> (i32, i32) {
    %c0_i32 = arith.constant 0 : i32
    %c0_i32_0 = arith.constant 0 : i32
    %c0_i32_1 = arith.constant 0 : i32
    return %c0_i32, %c0_i32_0 : i32, i32
  }
  func.func @transform_2(%arg0: i32) -> (i32, i32) {
    %c0_i32 = arith.constant 0 : i32
    %c0_i32_0 = arith.constant 0 : i32
    %c0_i32_1 = arith.constant 0 : i32
    return %c0_i32, %c0_i32_0 : i32, i32
  }
  func.func @transform_3(%arg0: i32) -> (i32, i32) {
    %c0_i32 = arith.constant 0 : i32
    %c0_i32_0 = arith.constant 0 : i32
    %c0_i32_1 = arith.constant 0 : i32
    return %c0_i32, %c0_i32_0 : i32, i32
  }
  func.func @transform_4(%arg0: i32) -> (i32, i32) {
    %c0_i32 = arith.constant 0 : i32
    %c0_i32_0 = arith.constant 0 : i32
    %c0_i32_1 = arith.constant 0 : i32
    return %c0_i32, %c0_i32_0 : i32, i32
  }
  func.func @transform_5(%arg0: i32) -> (i32, i32) {
    %c0_i32 = arith.constant 0 : i32
    %c0_i32_0 = arith.constant 0 : i32
    %c0_i32_1 = arith.constant 0 : i32
    return %c0_i32, %c0_i32_0 : i32, i32
  }
  func.func @transform_6(%arg0: i32) -> (i32, i32) {
    %c0_i32 = arith.constant 0 : i32
    %c0_i32_0 = arith.constant 0 : i32
    %c0_i32_1 = arith.constant 0 : i32
    return %c0_i32, %c0_i32_0 : i32, i32
  }
  func.func @transform_7(%arg0: i32) -> (i32, i32) {
    %c0_i32 = arith.constant 0 : i32
    %c0_i32_0 = arith.constant 0 : i32
    %c0_i32_1 = arith.constant 0 : i32
    return %c0_i32, %c0_i32_0 : i32, i32
  }
  func.func @transform_8(%arg0: i32) -> (i32, i32) {
    %c0_i32 = arith.constant 0 : i32
    %c0_i32_0 = arith.constant 0 : i32
    %c0_i32_1 = arith.constant 0 : i32
    return %c0_i32, %c0_i32_0 : i32, i32
  }
  func.func @transform_9(%arg0: i32) -> (i32, i32) {
    %c0_i32 = arith.constant 0 : i32
    %c0_i32_0 = arith.constant 0 : i32
    %c0_i32_1 = arith.constant 0 : i32
    return %c0_i32, %c0_i32_0 : i32, i32
  }
  func.func @transform_10(%arg0: i32) -> (i32, i32) {
    %c0_i32 = arith.constant 0 : i32
    %c0_i32_0 = arith.constant 0 : i32
    %c0_i32_1 = arith.constant 0 : i32
    return %c0_i32, %c0_i32_0 : i32, i32
  }
  func.func @transform_11(%arg0: i32) -> (i32, i32) {
    %c0_i32 = arith.constant 0 : i32
    %c0_i32_0 = arith.constant 0 : i32
    %c0_i32_1 = arith.constant 0 : i32
    return %c0_i32, %c0_i32_0 : i32, i32
  }
  func.func @transform_12(%arg0: i32) -> (i32, i32) {
    %c0_i32 = arith.constant 0 : i32
    %c0_i32_0 = arith.constant 0 : i32
    %c0_i32_1 = arith.constant 0 : i32
    return %c0_i32, %c0_i32_0 : i32, i32
  }
  func.func @transform_13(%arg0: i32) -> (i32, i32) {
    %c0_i32 = arith.constant 0 : i32
    %c0_i32_0 = arith.constant 0 : i32
    %c0_i32_1 = arith.constant 0 : i32
    return %c0_i32, %c0_i32_0 : i32, i32
  }
  func.func @transform_14(%arg0: i32) -> (i32, i32) {
    %c0_i32 = arith.constant 0 : i32
    %c0_i32_0 = arith.constant 0 : i32
    %c0_i32_1 = arith.constant 0 : i32
    return %c0_i32, %c0_i32_0 : i32, i32
  }
  func.func @transform_15(%arg0: i32) -> (i32, i32, i32) {
    %c0_i32 = arith.constant 0 : i32
    %c0_i32_0 = arith.constant 0 : i32
    %c0_i32_1 = arith.constant 0 : i32
    return %arg0, %c0_i32, %c0_i32_0 : i32, i32, i32
  }
}

</mosaic_0001>

<bundles_post_ra>
// kernel: tpu_custom_call.1
= control target key start
LH: loop header
LB: loop body
LE: loop exit
PB: predicated region body
PF: predicated region fallthrough
CT: control target
= control target key end

     0   :  { %s6266_s30 = smov 16   ;;  %s6267_s16 = smov 8   ;;  %vm315_vm0 = vcmask 1043456   ;;  %s7900_s0 = inlined_call_operand.vmem [shape: f32[16,16,8], index: 0, kind: input, shape index: {}]   ;;  %s7901_s1 = inlined_call_operand.vmem [shape: bf16[24,64], index: 1, kind: input, shape index: {}]   ;;  %s7902_s2 = inlined_call_operand.vmem [shape: f32[1,64], index: 2, kind: input, shape index: {}]   ;;  %s7903_s3 = inlined_call_operand.vmem [shape: bf16[192,128], index: 3, kind: input, shape index: {}]   ;;  %s7904_s4 = inlined_call_operand.vmem [shape: f32[1,128], index: 4, kind: input, shape index: {}]   ;;  %s7905_s5 = inlined_call_operand.vmem [shape: bf16[128,128], index: 5, kind: input, shape index: {}]   ;;  %s7906_s6 = inlined_call_operand.vmem [shape: bf16[128,32], index: 6, kind: input, shape index: {}]   ;;  %s7907_s7 = inlined_call_operand.vmem [shape: f32[128,1], index: 7, kind: input, shape index: {}]   ;;  %s7908_s8 = inlined_call_operand.vmem [shape: bf16[128,32], index: 8, kind: input, shape index: {}]   ;;  %s7909_s9 = inlined_call_operand.vmem [shape: bf16[128,32], index: 9, kind: input, shape index: {}]   ;;  %s7910_s10 = inlined_call_operand.vmem [shape: f32[128,1], index: 10, kind: input, shape index: {}]   ;;  %s7911_s11 = inlined_call_operand.vmem [shape: bf16[128,32], index: 11, kind: input, shape index: {}]   ;;  %s7912_s12 = inlined_call_operand.vmem [shape: f32[128,1], index: 12, kind: input, shape index: {}]   ;;  %s7913_s13 = inlined_call_operand.vmem [shape: bf16[16,128], index: 13, kind: input, shape index: {}]   ;;  %s7914_s14 = inlined_call_operand.vmem [shape: f32[16,1], index: 14, kind: input, shape index: {}]   ;;  %s7915_s15 = inlined_call_operand.hbm [shape: f32[1,16,16], index: 15, kind: output, shape index: {}]  }
   0x1   :  { %v54_v0 = vld [vmem:[%s7900_s0 + $0x10] sm:$0xff]  ;;  %v55_v1 = vld [vmem:[%s7900_s0 + $0x18] sm:$0xff]  ;;  %v52_v2 = vld [vmem:[%s7900_s0] sm:$0xff] }
   0x2   :  { %v6363_v3 = vpack.c.bf16 %v55_v1, %v54_v0  ;;  %v53_v4 = vld [vmem:[%s7900_s0 + $0x8] sm:$0xff]  ;;  %v56_v5 = vld [vmem:[%s7900_s0 + $0x20] sm:$0xff]  ;;  %v58_v9 = vld [vmem:[%s7900_s0 + $0x30] sm:$0xff] }
   0x3   :  { %v57_v6 = vld [vmem:[%s7900_s0 + $0x28] sm:$0xff]  ;;  %v6374_v7 = vpack.c.bf16 %v53_v4, %v52_v2  ;;  %v59_v10 = vld [vmem:[%s7900_s0 + $0x38] sm:$0xff]  ;;  %v60_v12 = vld [vmem:[%s7900_s0 + $0x40] sm:$0xff] }
   0x4   :  { %149 = vrot.lane.b32.xlu1 %v6363_v3, %s6266_s30  ;;  %v6378_v8 = vpack.c.bf16 %v57_v6, %v56_v5  ;;  %v6390_v11 = vpack.c.bf16 %v59_v10, %v58_v9  ;;  %v61_v13 = vld [vmem:[%s7900_s0 + $0x48] sm:$0xff]  ;;  %v62_v14 = vld [vmem:[%s7900_s0 + $0x50] sm:$0xff]  ;;  %v63_v15 = vld [vmem:[%s7900_s0 + $0x58] sm:$0xff] }
   0x5   :  { %116 = vrot.lane.b32.xlu0 %v6374_v7, %s6267_s16  ;;  %v5652_v16 = vld [vmem:[%s7901_s1] sm:$0xff]   ;;  %v6411_v17 = vpack.c.bf16 %v61_v13, %v60_v12  ;;  %v5653_v18 = vld [vmem:[%s7901_s1 + $0x8] ss:$0 sps:$4 sm:$0xff]   ;;  %v6426_v22 = vpack.c.bf16 %v63_v15, %v62_v14  ;;  %v66_v23 = vld [vmem:[%s7900_s0 + $0x70] sm:$0xff] }
   0x6   :  { %5117 = vmatprep.subr.bf16.mxu0 %v5652_v16  ;;  %v317_v19 = vsel %vm315_vm0, %v5653_v18, 0  ;;  %v64_v20 = vld [vmem:[%s7900_s0 + $0x60] sm:$0xff]  ;;  %v65_v21 = vld [vmem:[%s7900_s0 + $0x68] sm:$0xff]  ;;  %v67_v24 = vld [vmem:[%s7900_s0 + $0x78] sm:$0xff] }
   0x7   :  { %5118 = vmatpush3.bf16.msra.mxu0 %v5652_v16  ;;  %v6438_v25 = vpack.c.bf16 %v65_v21, %v64_v20  ;;  %v68_v26 = vld [vmem:[%s7900_s0 + $0x80] sm:$0xff]  ;;  %v69_v27 = vld [vmem:[%s7900_s0 + $0x88] sm:$0xff]  ;;  %v6450_v28 = vpack.c.bf16 %v67_v24, %v66_v23  ;;  %v70_v29 = vld [vmem:[%s7900_s0 + $0x90] sm:$0xff] }
   0x8   :  { %151 = vrot.lane.b32.xlu1 %v6378_v8, %s6266_s30  ;;  %5557 = vmatprep.subr.msk.bf16.mxu0 %vm315_vm0, %v5653_v18  ;;  %v71_v30 = vld [vmem:[%s7900_s0 + $0x98] sm:$0xff]  ;;  %v6462_v31 = vpack.c.bf16 %v69_v27, %v68_v26  ;;  %v72_v32 = vld [vmem:[%s7900_s0 + $0xa0] sm:$0xff]  ;;  %v73_v33 = vld [vmem:[%s7900_s0 + $0xa8] sm:$0xff] }
   0x9   :  { %118 = vrot.lane.b32.xlu0 %v6363_v3, %s6267_s16  ;;  %v6474_v34 = vpack.c.bf16 %v71_v30, %v70_v29  ;;  %v74_v35 = vld [vmem:[%s7900_s0 + $0xb0] sm:$0xff]  ;;  %v75_v36 = vld [vmem:[%s7900_s0 + $0xb8] sm:$0xff]  ;;  %v6486_v37 = vpack.c.bf16 %v73_v33, %v72_v32  ;;  %v76_v38 = vld [vmem:[%s7900_s0 + $0xc0] sm:$0xff] }
   0xa   :  { %v77_v39 = vld [vmem:[%s7900_s0 + $0xc8] sm:$0xff]  ;;  %v6498_v40 = vpack.c.bf16 %v75_v36, %v74_v35  ;;  %v78_v41 = vld [vmem:[%s7900_s0 + $0xd0] sm:$0xff]  ;;  %v79_v42 = vld [vmem:[%s7900_s0 + $0xd8] sm:$0xff] }
   0xb   :  { %5120 = vmatpush3.bf16.msra.mxu0 %v317_v19  ;;  %v6510_v43 = vpack.c.bf16 %v77_v39, %v76_v38  ;;  %v6516_v44 = vpack.c.bf16 %v79_v42, %v78_v41 }
   0xc   :  { %122 = vrot.lane.b32.xlu1 %v6390_v11, %s6267_s16 }
   0xd   :  { %120 = vrot.lane.b32.xlu0 %v6378_v8, %s6267_s16 }
  0x10   :  { %155 = vrot.lane.b32.xlu1 %v6411_v17, %s6266_s30 }
  0x11   :  { %153 = vrot.lane.b32.xlu0 %v6390_v11, %s6266_s30 }
  0x14   :  { %126 = vrot.lane.b32.xlu1 %v6426_v22, %s6267_s16 }
  0x15   :  { %124 = vrot.lane.b32.xlu0 %v6411_v17, %s6267_s16 }
  0x18   :  { %159 = vrot.lane.b32.xlu1 %v6438_v25, %s6266_s30 }
  0x19   :  { %157 = vrot.lane.b32.xlu0 %v6426_v22, %s6266_s30 }
  0x1c   :  { %130 = vrot.lane.b32.xlu1 %v6450_v28, %s6267_s16 }
  0x1d   :  { %128 = vrot.lane.b32.xlu0 %v6438_v25, %s6267_s16 }
  0x20   :  { %163 = vrot.lane.b32.xlu1 %v6462_v31, %s6266_s30 }
  0x21   :  { %161 = vrot.lane.b32.xlu0 %v6450_v28, %s6266_s30 }
  0x24   :  { %134 = vrot.lane.b32.xlu1 %v6474_v34, %s6267_s16 }
  0x25   :  { %132 = vrot.lane.b32.xlu0 %v6462_v31, %s6267_s16 }
  0x28   :  { %167 = vrot.lane.b32.xlu1 %v6486_v37, %s6266_s30 }
  0x29   :  { %165 = vrot.lane.b32.xlu0 %v6474_v34, %s6266_s30 }
  0x2c   :  { %138 = vrot.lane.b32.xlu1 %v6498_v40, %s6267_s16 }
  0x2d   :  { %136 = vrot.lane.b32.xlu0 %v6486_v37, %s6267_s16 }
  0x30   :  { %171 = vrot.lane.b32.xlu1 %v6510_v43, %s6266_s30 }
  0x31   :  { %20 = vsyncpa [#allocation5], 0  ;;  %169 = vrot.lane.b32.xlu0 %v6498_v40, %s6266_s30  ;;  %v80_v45 = vld [vmem:[%s7900_s0 + $0xe0] sm:$0xff]  ;;  %v81_v46 = vld [vmem:[%s7900_s0 + $0xe8] sm:$0xff]  ;;  %vm181_vm1 = vcmask 64512   ;;  %vm230_vm2 = vcmask 130048  }
  0x32   :  { %v6528_v47 = vpack.c.bf16 %v81_v46, %v80_v45  ;;  %vm282_vm3 = vcmask 195584   ;;  %v6268_v41 = vmov 0   ;;  %v5654_v42 = vld [vmem:[%s7903_s3] sm:$0xff]   ;;  %v5657_v45 = vld [vmem:[%s7903_s3 + $0x18] sm:$0xff]   ;;  %vm560_vm4 = vcmask 523264   ;;  %s6272_s20 = smov [#allocation4]  }
  0x33   :  { %712 = vmatprep.subr.bf16.mxu1 %v6268_v41  ;;  %v5658_v46 = vld [vmem:[%s7903_s3 + $0x20] sm:$0xff]   ;;  %vm4649_vm5 = vmneg %vm560_vm4  ;;  %vm1680_vm6 = vcmask 261120   ;;  %vm6271_vm7 = vmmov 0   ;;  %s4605_s21 = sshll.u32 %s6272_s20, 4  ;;  %s4606_s21 = int_to_ptr.vmem [resolvable:$true] %s4605_s21 }
  0x34   :  { %142 = vrot.lane.b32.xlu1 %v6516_v44, %s6267_s16  ;;  %713 = vmatpush1.bf16.msra.mxu1 %v5654_v42  ;;  %s6242_s22 = scalar_lea.vmem %s4606_s21, 256  ;;  %p6247_p1 = scmp.lt.s32.totalorder %s4606_s21, %s4606_s21 }
  0x35   :  { %140 = vrot.lane.b32.xlu0 %v6510_v43, %s6267_s16  ;;  %714 = vmatprep.subr.bf16.mxu1 %v6268_v41  ;;  %p6243_p0 = scmp.ne.s32.totalorder %s4606_s21, %s6242_s22  ;;  %p6248_p2 = scmp.lt.s32.totalorder %s6242_s22, %s6242_s22 }
  0x37   :  { %p6249_p3 = por %p6248_p2, %p6247_p1 }
  0x38   :  { %175 = vrot.lane.b32.xlu1 %v6528_v47, %s6266_s30 }
  0x39   :  { %173 = vrot.lane.b32.xlu0 %v6516_v44, %s6266_s30  ;;  %p6250_p4 = pnand %p6249_p3, %p6243_p0 }
  0x76   :  { %v150_v48 = vpop.permute.xlu1 %149 }
  0x77   :  { %v117_v49 = vpop.permute.xlu0 %116 }
  0x78   :  { %v184_v50 = vsel %vm181_vm1, 0, %v117_v49  ;;  %v5660_v49 = vld [vmem:[%s7903_s3 + $0x30] sm:$0xff]  }
  0x79   :  { %v232_v51 = vsel %vm230_vm2, %v184_v50, %v150_v48  ;;  %v5659_v48 = vld [vmem:[%s7903_s3 + $0x28] sm:$0xff]   ;;  %v5661_v50 = vld [vmem:[%s7903_s3 + $0x38] sm:$0xff]  }
  0x7a   :  { %5121 = vmatprep.mubr.msk.bf16.mxu0 %vm282_vm3, %v232_v51  ;;  %v152_v52 = vpop.permute.xlu1 %151  ;;  %v5662_v51 = vld [vmem:[%s7903_s3 + $0x40] sm:$0xff]  }
  0x7b   :  { %v119_v53 = vpop.permute.xlu0 %118 }
  0x7c   :  { %v187_v54 = vsel %vm181_vm1, %v6374_v7, %v119_v53  ;;  %v5664_v53 = vld [vmem:[%s7903_s3 + $0x50] sm:$0xff]  }
  0x7d   :  { %v234_v55 = vsel %vm230_vm2, %v187_v54, %v152_v52  ;;  %v5663_v52 = vld [vmem:[%s7903_s3 + $0x48] sm:$0xff]   ;;  %v5665_v54 = vld [vmem:[%s7903_s3 + $0x58] sm:$0xff]  }
  0x7e   :  { %5122 = vmatmul.mubr.msk.bf16.vlgmr.msra.gmra.mrb[0].mxu0 %vm282_vm3, %v234_v55  ;;  %v123_v56 = vpop.permute.xlu1 %122  ;;  %v6642_v55 = vld [vmem:[%s7902_s2] ss:$0 sm:$0xff]  ;;  %s6269_s2 = smov 64  }
  0x7f   :  { %v121_v57 = vpop.permute.xlu0 %120  ;;  %v193_v58 = vsel %vm181_vm1, %v6378_v8, %v123_v56 }
  0x80   :  { %v190_v60 = vsel %vm181_vm1, %v6363_v3, %v121_v57 }
  0x82   :  { %v156_v59 = vpop.permute.xlu1 %155 }
  0x83   :  { %v238_v61 = vsel %vm230_vm2, %v193_v58, %v156_v59  ;;  %v154_v62 = vpop.permute.xlu0 %153 }
  0x84   :  { %v236_v63 = vsel %vm230_vm2, %v190_v60, %v154_v62 }
  0x85   :  { %5125 = vmatprep.mubr.msk.bf16.mxu0 %vm282_vm3, %v236_v63 }
  0x86   :  { %5126 = vmatmul.mubr.msk.bf16.gmra.mrb[4].mxu0 %vm282_vm3, %v238_v61  ;;  %v127_v0 = vpop.permute.xlu1 %126 }
  0x87   :  { %v125_v1 = vpop.permute.xlu0 %124  ;;  %v199_v2 = vsel %vm181_vm1, %v6411_v17, %v127_v0 }
  0x88   :  { %v196_v5 = vsel %vm181_vm1, %v6390_v11, %v125_v1 }
  0x8a   :  { %v160_v4 = vpop.permute.xlu1 %159 }
  0x8b   :  { %v242_v3 = vsel %vm230_vm2, %v199_v2, %v160_v4  ;;  %v158_v6 = vpop.permute.xlu0 %157 }
  0x8c   :  { %v240_v7 = vsel %vm230_vm2, %v196_v5, %v158_v6 }
  0x8d   :  { %5129 = vmatprep.mubr.msk.bf16.mxu0 %vm282_vm3, %v240_v7 }
  0x8e   :  { %5130 = vmatmul.mubr.msk.bf16.gmra.mrb[8].mxu0 %vm282_vm3, %v242_v3  ;;  %v131_v8 = vpop.permute.xlu1 %130 }
  0x8f   :  { %v129_v9 = vpop.permute.xlu0 %128  ;;  %v205_v10 = vsel %vm181_vm1, %v6438_v25, %v131_v8 }
  0x90   :  { %v202_v13 = vsel %vm181_vm1, %v6426_v22, %v129_v9 }
  0x92   :  { %v164_v12 = vpop.permute.xlu1 %163 }
  0x93   :  { %v246_v11 = vsel %vm230_vm2, %v205_v10, %v164_v12  ;;  %v162_v14 = vpop.permute.xlu0 %161 }
  0x94   :  { %v244_v15 = vsel %vm230_vm2, %v202_v13, %v162_v14 }
  0x95   :  { %5133 = vmatprep.mubr.msk.bf16.mxu0 %vm282_vm3, %v244_v15 }
  0x96   :  { %5134 = vmatmul.mubr.msk.bf16.gmra.mrb[12].mxu0 %vm282_vm3, %v246_v11  ;;  %v135_v16 = vpop.permute.xlu1 %134 }
  0x97   :  { %v133_v17 = vpop.permute.xlu0 %132  ;;  %v211_v18 = vsel %vm181_vm1, %v6462_v31, %v135_v16 }
  0x98   :  { %v208_v20 = vsel %vm181_vm1, %v6450_v28, %v133_v17 }
  0x9a   :  { %v168_v19 = vpop.permute.xlu1 %167 }
  0x9b   :  { %v250_v21 = vsel %vm230_vm2, %v211_v18, %v168_v19  ;;  %v166_v22 = vpop.permute.xlu0 %165 }
  0x9c   :  { %v248_v23 = vsel %vm230_vm2, %v208_v20, %v166_v22 }
  0x9d   :  { %5137 = vmatprep.mubr.msk.bf16.mxu0 %vm282_vm3, %v248_v23 }
  0x9e   :  { %5138 = vmatmul.mubr.msk.bf16.gmra.mrb[16].mxu0 %vm282_vm3, %v250_v21  ;;  %v139_v24 = vpop.permute.xlu1 %138 }
  0x9f   :  { %v137_v25 = vpop.permute.xlu0 %136  ;;  %v217_v26 = vsel %vm181_vm1, %v6486_v37, %v139_v24 }
  0xa0   :  { %v214_v27 = vsel %vm181_vm1, %v6474_v34, %v137_v25 }
  0xa2   :  { %v172_v29 = vpop.permute.xlu1 %171 }
  0xa3   :  { %v170_v30 = vpop.permute.xlu0 %169  ;;  %v254_v28 = vsel %vm230_vm2, %v217_v26, %v172_v29 }
  0xa4   :  { %v252_v31 = vsel %vm230_vm2, %v214_v27, %v170_v30 }
  0xa5   :  { %5141 = vmatprep.mubr.msk.bf16.mxu0 %vm282_vm3, %v252_v31 }
  0xa6   :  { %5142 = vmatmul.mubr.msk.bf16.gmra.mrb[20].mxu0 %vm282_vm3, %v254_v28  ;;  %v143_v32 = vpop.permute.xlu1 %142 }
  0xa7   :  { %v141_v33 = vpop.permute.xlu0 %140  ;;  %v223_v35 = vsel %vm181_vm1, %v6510_v43, %v143_v32  ;;  %v5656_v43 = vld [vmem:[%s7903_s3 + $0x10] sm:$0xff]  }
  0xa8   :  { %v220_v36 = vsel %vm181_vm1, %v6498_v40, %v141_v33  ;;  %v5655_v40 = vld [vmem:[%s7903_s3 + $0x8] sm:$0xff]  }
  0xa9   :  { %715 = vmatpush1.bf16.msra.mxu1 %v5655_v40 }
  0xaa   :  { %v176_v37 = vpop.permute.xlu1 %175  ;;  %716 = vmatprep.subr.bf16.mxu1 %v6268_v41 }
  0xab   :  { %v174_v34 = vpop.permute.xlu0 %173  ;;  %v258_v38 = vsel %vm230_vm2, %v223_v35, %v176_v37 }
  0xac   :  { %v256_v39 = vsel %vm230_vm2, %v220_v36, %v174_v34 }
  0xad   :  { %5145 = vmatprep.mubr.msk.bf16.mxu0 %vm282_vm3, %v256_v39  ;;  %717 = vmatpush1.bf16.msra.mxu1 %v5656_v43 }
  0xae   :  { %5146 = vmatmul.mubr.msk.bf16.gmra.mrb[24].mxu0 %vm282_vm3, %v258_v38  ;;  %718 = vmatprep.subr.bf16.mxu1 %v6268_v41 }
  0xb1   :  { %719 = vmatpush1.bf16.msra.mxu1 %v5657_v45 }
  0xb2   :  { %720 = vmatprep.subr.bf16.mxu1 %v6268_v41 }
  0xb5   :  { %721 = vmatpush1.bf16.msra.mxu1 %v5658_v46 }
  0xb6   :  { %722 = vmatprep.subr.bf16.mxu1 %v6268_v41 }
  0xb9   :  { %723 = vmatpush1.bf16.msra.mxu1 %v5659_v48 }
  0xba   :  { %724 = vmatprep.subr.bf16.mxu1 %v6268_v41 }
  0xbd   :  { %725 = vmatpush1.bf16.msra.mxu1 %v5660_v49 }
  0xbe   :  { %726 = vmatprep.subr.bf16.mxu1 %v6268_v41 }
  0xc1   :  { %727 = vmatpush1.bf16.msra.mxu1 %v5661_v50 }
  0xc2   :  { %728 = vmatprep.subr.bf16.mxu1 %v6268_v41 }
  0xc5   :  { %729 = vmatpush1.bf16.msra.mxu1 %v5662_v51 }
  0xc6   :  { %730 = vmatprep.subr.bf16.mxu1 %v6268_v41 }
  0xc9   :  { %731 = vmatpush1.bf16.msra.mxu1 %v5663_v52 }
  0xca   :  { %732 = vmatprep.subr.bf16.mxu1 %v6268_v41 }
  0xcd   :  { %733 = vmatpush1.bf16.msra.mxu1 %v5664_v53 }
  0xce   :  { %734 = vmatprep.subr.bf16.mxu1 %v6268_v41 }
  0xd1   :  { %735 = vmatpush1.bf16.msra.mxu1 %v5665_v54 }
 0x151   :  { %v5123_v56 = vpop.f32.mrb[0].mxu0 }
 0x152   :  { %v362_v57 = vadd.f32 %v5123_v56, %v6642_v55  ;;  %v353_v58 = vpop.f32.mrb[1].mxu0 }
 0x153   :  { %v354_v59 = vadd.f32 %v6642_v55, %v353_v58  ;;  %v5124_v60 = vpop.f32.mrb[2].mxu0 }
 0x154   :  { %v482_v61 = vmax.f32 %v362_v57, 0.0  ;;  %v365_v62 = vadd.f32 %v5124_v60, %v6642_v55  ;;  %v356_v63 = vpop.f32.mrb[3].mxu0 }
 0x155   :  { %v480_v0 = vmax.f32 %v354_v59, 0.0  ;;  %v357_v1 = vadd.f32 %v6642_v55, %v356_v63 }
 0x156   :  { %v483_v2 = vmax.f32 %v365_v62, 0.0 }
 0x157   :  { %v512_v4 = vmax.f32 %v480_v0, %v482_v61  ;;  %v481_v5 = vmax.f32 %v357_v1, 0.0 }
 0x159   :  { %v513_v3 = vmax.f32 %v481_v5, %v483_v2  ;;  %v5127_v6 = vpop.f32.mrb[4].mxu0  ;;  %v83_v5 = vld [vmem:[%s7900_s0 + $0xf8] sm:$0xff] }
 0x15a   :  { %v378_v7 = vadd.f32 %v5127_v6, %v6642_v55  ;;  %v369_v8 = vpop.f32.mrb[5].mxu0 }
 0x15b   :  { %v370_v9 = vadd.f32 %v6642_v55, %v369_v8  ;;  %v5128_v10 = vpop.f32.mrb[6].mxu0  ;;  %v6650_v12 = vpack.c.bf16 %v513_v3, %v512_v4  ;;  %v82_v4 = vld [vmem:[%s7900_s0 + $0xf0] sm:$0xff] }
 0x15c   :  { %v486_v13 = vmax.f32 %v378_v7, 0.0  ;;  %v381_v11 = vadd.f32 %v5128_v10, %v6642_v55  ;;  %v372_v14 = vpop.f32.mrb[7].mxu0 }
 0x15d   :  { %v484_v15 = vmax.f32 %v370_v9, 0.0  ;;  %v373_v16 = vadd.f32 %v6642_v55, %v372_v14  ;;  %544 = vrot.lane.b32.xlu0 %v6650_v12, %s6269_s2  ;;  %v99_v9 = vpack.c.bf16 %v83_v5, %v82_v4 }
 0x15e   :  { %v487_v17 = vmax.f32 %v381_v11, 0.0 }
 0x15f   :  { %v514_v18 = vmax.f32 %v484_v15, %v486_v13  ;;  %v485_v19 = vmax.f32 %v373_v16, 0.0 }
 0x161   :  { %v515_v20 = vmax.f32 %v485_v19, %v487_v17  ;;  %v5131_v21 = vpop.f32.mrb[8].mxu0 }
 0x162   :  { %v394_v22 = vadd.f32 %v5131_v21, %v6642_v55  ;;  %v385_v23 = vpop.f32.mrb[9].mxu0 }
 0x163   :  { %v386_v24 = vadd.f32 %v6642_v55, %v385_v23  ;;  %v5132_v25 = vpop.f32.mrb[10].mxu0  ;;  %v6658_v26 = vpack.c.bf16 %v515_v20, %v514_v18 }
 0x164   :  { %v490_v27 = vmax.f32 %v394_v22, 0.0  ;;  %v397_v29 = vadd.f32 %v5132_v25, %v6642_v55  ;;  %v388_v30 = vpop.f32.mrb[11].mxu0 }
 0x165   :  { %v488_v28 = vmax.f32 %v386_v24, 0.0  ;;  %v389_v31 = vadd.f32 %v6642_v55, %v388_v30  ;;  %546 = vrot.lane.b32.xlu1 %v6658_v26, %s6269_s2  ;;  %4648 = vmatprep.mubr.msk.bf16.mxu1 %vm560_vm4, %v6658_v26 }
 0x166   :  { %v491_v32 = vmax.f32 %v397_v29, 0.0 }
 0x167   :  { %v516_v33 = vmax.f32 %v488_v28, %v490_v27  ;;  %v489_v35 = vmax.f32 %v389_v31, 0.0 }
 0x169   :  { %v517_v36 = vmax.f32 %v489_v35, %v491_v32  ;;  %v5135_v37 = vpop.f32.mrb[12].mxu0 }
 0x16a   :  { %v410_v34 = vadd.f32 %v5135_v37, %v6642_v55  ;;  %v401_v38 = vpop.f32.mrb[13].mxu0 }
 0x16b   :  { %v402_v39 = vadd.f32 %v6642_v55, %v401_v38  ;;  %v5136_v42 = vpop.f32.mrb[14].mxu0  ;;  %v6668_v40 = vpack.c.bf16 %v517_v36, %v516_v33 }
 0x16c   :  { %v494_v43 = vmax.f32 %v410_v34, 0.0  ;;  %v413_v45 = vadd.f32 %v5136_v42, %v6642_v55  ;;  %v404_v46 = vpop.f32.mrb[15].mxu0 }
 0x16d   :  { %v492_v48 = vmax.f32 %v402_v39, 0.0  ;;  %v405_v49 = vadd.f32 %v6642_v55, %v404_v46  ;;  %548 = vrot.lane.b32.xlu0 %v6668_v40, %s6269_s2 }
 0x16e   :  { %v495_v50 = vmax.f32 %v413_v45, 0.0 }
 0x16f   :  { %v518_v51 = vmax.f32 %v492_v48, %v494_v43  ;;  %v493_v52 = vmax.f32 %v405_v49, 0.0 }
 0x171   :  { %v519_v53 = vmax.f32 %v493_v52, %v495_v50  ;;  %v5139_v54 = vpop.f32.mrb[16].mxu0 }
 0x172   :  { %v426_v56 = vadd.f32 %v5139_v54, %v6642_v55  ;;  %v417_v57 = vpop.f32.mrb[17].mxu0 }
 0x173   :  { %v418_v58 = vadd.f32 %v6642_v55, %v417_v57  ;;  %v5140_v59 = vpop.f32.mrb[18].mxu0  ;;  %v6676_v60 = vpack.c.bf16 %v519_v53, %v518_v51 }
 0x174   :  { %v498_v61 = vmax.f32 %v426_v56, 0.0  ;;  %v429_v62 = vadd.f32 %v5140_v59, %v6642_v55  ;;  %v420_v63 = vpop.f32.mrb[19].mxu0 }
 0x175   :  { %v496_v0 = vmax.f32 %v418_v58, 0.0  ;;  %v421_v1 = vadd.f32 %v6642_v55, %v420_v63  ;;  %550 = vrot.lane.b32.xlu1 %v6676_v60, %s6269_s2 }
 0x176   :  { %v499_v2 = vmax.f32 %v429_v62, 0.0 }
 0x177   :  { %v520_v3 = vmax.f32 %v496_v0, %v498_v61  ;;  %v497_v6 = vmax.f32 %v421_v1, 0.0 }
 0x179   :  { %v521_v7 = vmax.f32 %v497_v6, %v499_v2  ;;  %v5143_v8 = vpop.f32.mrb[20].mxu0  ;;  %144 = vrot.lane.b32.xlu1 %v6528_v47, %s6267_s16  ;;  %v6746_v2 = vld [vmem:[%s7904_s4] ss:$0 sm:$0xff] }
 0x17a   :  { %v442_v10 = vadd.f32 %v5143_v8, %v6642_v55  ;;  %v433_v13 = vpop.f32.mrb[21].mxu0 }
 0x17b   :  { %v434_v11 = vadd.f32 %v6642_v55, %v433_v13  ;;  %v5144_v14 = vpop.f32.mrb[22].mxu0  ;;  %v6692_v15 = vpack.c.bf16 %v521_v7, %v520_v3 }
 0x17c   :  { %v502_v16 = vmax.f32 %v442_v10, 0.0  ;;  %v445_v17 = vadd.f32 %v5144_v14, %v6642_v55  ;;  %v436_v18 = vpop.f32.mrb[23].mxu0 }
 0x17d   :  { %v500_v19 = vmax.f32 %v434_v11, 0.0  ;;  %v437_v20 = vadd.f32 %v6642_v55, %v436_v18  ;;  %552 = vrot.lane.b32.xlu0 %v6692_v15, %s6269_s2  ;;  %177 = vrot.lane.b32.xlu1 %v99_v9, %s6266_s30 }
 0x17e   :  { %v503_v21 = vmax.f32 %v445_v17, 0.0 }
 0x17f   :  { %v522_v22 = vmax.f32 %v500_v19, %v502_v16  ;;  %v501_v23 = vmax.f32 %v437_v20, 0.0 }
 0x181   :  { %v523_v24 = vmax.f32 %v501_v23, %v503_v21  ;;  %146 = vrot.lane.b32.xlu0 %v99_v9, %s6267_s16  ;;  %v5147_v25 = vpop.f32.mrb[24].mxu0 }
 0x182   :  { %v458_v27 = vadd.f32 %v5147_v25, %v6642_v55  ;;  %v449_v29 = vpop.f32.mrb[25].mxu0 }
 0x183   :  { %v450_v30 = vadd.f32 %v6642_v55, %v449_v29  ;;  %v5148_v28 = vpop.f32.mrb[26].mxu0  ;;  %v6702_v31 = vpack.c.bf16 %v523_v24, %v522_v22 }
 0x184   :  { %v506_v32 = vmax.f32 %v458_v27, 0.0  ;;  %v461_v33 = vadd.f32 %v5148_v28, %v6642_v55  ;;  %v452_v35 = vpop.f32.mrb[27].mxu0 }
 0x185   :  { %v504_v36 = vmax.f32 %v450_v30, 0.0  ;;  %v453_v37 = vadd.f32 %v6642_v55, %v452_v35  ;;  %179 = vrot.lane.b32.xlu0 %v6268_v41, %s6266_s30  ;;  %554 = vrot.lane.b32.xlu1 %v6702_v31, %s6269_s2 }
 0x186   :  { %v507_v34 = vmax.f32 %v461_v33, 0.0 }
 0x187   :  { %v524_v38 = vmax.f32 %v504_v36, %v506_v32  ;;  %v505_v39 = vmax.f32 %v453_v37, 0.0 }
 0x189   :  { %v525_v42 = vmax.f32 %v505_v39, %v507_v34 }
 0x18b   :  { %v6710_v43 = vpack.c.bf16 %v525_v42, %v524_v38 }
 0x18d   :  { %556 = vrot.lane.b32.xlu0 %v6710_v43, %s6269_s2 }
 0x1cf   :  { %v545_v45 = vpop.permute.xlu0 %544 }
 0x1d0   :  { %4650 = vmatmul.mubr.msk.bf16.vlgmr.msra.gmra.mrb[0].mxu1 %vm4649_vm5, %v545_v45 }
 0x1d1   :  { %4651 = vmatprep.mubr.msk.bf16.mxu1 %vm560_vm4, %v6668_v40 }
 0x1d7   :  { %v547_v46 = vpop.permute.xlu1 %546 }
 0x1d8   :  { %v566_v48 = vsel %vm560_vm4, %v6650_v12, %v547_v46 }
 0x1d9   :  { %753 = vmatmul.mubr.bf16.gmra.mrb[4].mxu1 %v566_v48 }
 0x1da   :  { %4652 = vmatprep.mubr.msk.bf16.mxu1 %vm560_vm4, %v6676_v60 }
 0x1df   :  { %v549_v49 = vpop.permute.xlu0 %548 }
 0x1e0   :  { %v570_v50 = vsel %vm560_vm4, %v6658_v26, %v549_v49 }
 0x1e1   :  { %761 = vmatmul.mubr.bf16.gmra.mrb[8].mxu1 %v570_v50 }
 0x1e2   :  { %4653 = vmatprep.mubr.msk.bf16.mxu1 %vm560_vm4, %v6692_v15 }
 0x1e7   :  { %v551_v51 = vpop.permute.xlu1 %550 }
 0x1e8   :  { %v574_v52 = vsel %vm560_vm4, %v6668_v40, %v551_v51 }
 0x1e9   :  { %769 = vmatmul.mubr.bf16.gmra.mrb[12].mxu1 %v574_v52 }
 0x1ea   :  { %4654 = vmatprep.mubr.msk.bf16.mxu1 %vm560_vm4, %v6702_v31 }
 0x1eb   :  { %v145_v12 = vpop.permute.xlu1 %144 }
 0x1ec   :  { %v226_v53 = vsel %vm181_vm1, %v6516_v44, %v145_v12 }
 0x1ef   :  { %v553_v54 = vpop.permute.xlu0 %552  ;;  %v178_v56 = vpop.permute.xlu1 %177 }
 0x1f0   :  { %v578_v26 = vsel %vm560_vm4, %v6676_v60, %v553_v54  ;;  %v260_v57 = vsel %vm230_vm2, %v226_v53, %v178_v56 }
 0x1f1   :  { %777 = vmatmul.mubr.bf16.gmra.mrb[16].mxu1 %v578_v26  ;;  %5149 = vmatprep.mubr.msk.bf16.mxu0 %vm282_vm3, %v260_v57 }
 0x1f2   :  { %4655 = vmatprep.mubr.msk.bf16.mxu1 %vm560_vm4, %v6710_v43 }
 0x1f3   :  { %v147_v40 = vpop.permute.xlu0 %146 }
 0x1f4   :  { %v229_v58 = vsel %vm181_vm1, %v6528_v47, %v147_v40 }
 0x1f7   :  { %v555_v59 = vpop.permute.xlu1 %554  ;;  %v180_v61 = vpop.permute.xlu0 %179 }
 0x1f8   :  { %v262_v44 = vsel %vm230_vm2, %v229_v58, %v180_v61  ;;  %v582_v62 = vsel %vm560_vm4, %v6692_v15, %v555_v59 }
 0x1f9   :  { %5150 = vmatmul.mubr.msk.bf16.gmra.mrb[28].mxu0 %vm282_vm3, %v262_v44  ;;  %785 = vmatmul.mubr.bf16.gmra.mrb[20].mxu1 %v582_v62 }
 0x2a3   :  { %v746_v60 = vpop.f32.mrb[0].mxu1 }
 0x2a4   :  { %v748_v63 = vpop.f32.mrb[1].mxu1  ;;  %v747_v47 = vadd.f32 %v6746_v2, %v746_v60 }
 0x2a5   :  { %v749_v0 = vpop.f32.mrb[2].mxu1 }
 0x2a6   :  { %v751_v1 = vpop.f32.mrb[3].mxu1  ;;  %v750_v5 = vadd.f32 %v6746_v2, %v749_v0  ;;  %v809_v8 = vmax.f32 %v747_v47, 0.0 }
 0x2a8   :  { %v810_v11 = vmax.f32 %v750_v5, 0.0 }
 0x2ac   :  { %v754_v4 = vpop.f32.mrb[4].mxu1 }
 0x2ad   :  { %v755_v3 = vadd.f32 %v6746_v2, %v754_v4  ;;  %v756_v6 = vpop.f32.mrb[5].mxu1 }
 0x2ae   :  { %v757_v7 = vpop.f32.mrb[6].mxu1 }
 0x2af   :  { %v811_v9 = vmax.f32 %v755_v3, 0.0  ;;  %v758_v10 = vadd.f32 %v6746_v2, %v757_v7  ;;  %v759_v13 = vpop.f32.mrb[7].mxu1 }
 0x2b0   :  { %v6773_v13 = vld [vmem:[%s7905_s5] sm:$0xff]  }
 0x2b1   :  { %v825_v14 = vmax.f32 %v809_v8, %v811_v9  ;;  %v812_v15 = vmax.f32 %v758_v10, 0.0  ;;  %v557_v8 = vpop.permute.xlu0 %556  ;;  %5169 = vmatprep.mubr.bf16.mxu0 %v6773_v13 }
 0x2b3   :  { %v826_v16 = vmax.f32 %v810_v11, %v812_v15  ;;  %v869_v15 = vld [vmem:[%s7907_s7 + $0x20] sm:$0xff] }
 0x2b4   :  { %v762_v17 = vpop.f32.mrb[8].mxu1 }
 0x2b5   :  { %v764_v18 = vpop.f32.mrb[9].mxu1  ;;  %v763_v21 = vadd.f32 %v6746_v2, %v762_v17 }
 0x2b6   :  { %v765_v19 = vpop.f32.mrb[10].mxu1 }
 0x2b7   :  { %v767_v20 = vpop.f32.mrb[11].mxu1  ;;  %v766_v23 = vadd.f32 %v6746_v2, %v765_v19  ;;  %v813_v29 = vmax.f32 %v763_v21, 0.0  ;;  %v866_v19 = vld [vmem:[%s7907_s7 + $0x8] sm:$0xff] }
 0x2b8   :  { %v871_v20 = vld [vmem:[%s7907_s7 + $0x30] sm:$0xff] }
 0x2b9   :  { %v814_v33 = vmax.f32 %v766_v23, 0.0 }
 0x2bc   :  { %v770_v22 = vpop.f32.mrb[12].mxu1 }
 0x2bd   :  { %v771_v24 = vadd.f32 %v6746_v2, %v770_v22  ;;  %v772_v25 = vpop.f32.mrb[13].mxu1 }
 0x2be   :  { %v773_v27 = vpop.f32.mrb[14].mxu1 }
 0x2bf   :  { %v815_v30 = vmax.f32 %v771_v24, 0.0  ;;  %v774_v28 = vadd.f32 %v6746_v2, %v773_v27  ;;  %v775_v32 = vpop.f32.mrb[15].mxu1 }
 0x2c1   :  { %v816_v35 = vmax.f32 %v774_v28, 0.0  ;;  %v827_v36 = vmax.f32 %v813_v29, %v815_v30  ;;  %v870_v29 = vld [vmem:[%s7907_s7 + $0x28] sm:$0xff]  ;;  %v873_v30 = vld [vmem:[%s7907_s7 + $0x40] sm:$0xff] }
 0x2c3   :  { %v828_v37 = vmax.f32 %v814_v33, %v816_v35  ;;  %v868_v35 = vld [vmem:[%s7907_s7 + $0x18] sm:$0xff] }
 0x2c4   :  { %v778_v34 = vpop.f32.mrb[16].mxu1 }
 0x2c5   :  { %v780_v38 = vpop.f32.mrb[17].mxu1  ;;  %v779_v45 = vadd.f32 %v6746_v2, %v778_v34 }
 0x2c6   :  { %v781_v39 = vpop.f32.mrb[18].mxu1 }
 0x2c7   :  { %v783_v42 = vpop.f32.mrb[19].mxu1  ;;  %v782_v49 = vadd.f32 %v6746_v2, %v781_v39  ;;  %v817_v53 = vmax.f32 %v779_v45, 0.0  ;;  %v872_v45 = vld [vmem:[%s7907_s7 + $0x38] sm:$0xff] }
 0x2c9   :  { %v818_v63 = vmax.f32 %v782_v49, 0.0 }
 0x2cc   :  { %v5151_v46 = vpop.f32.mrb[28].mxu0  ;;  %v786_v48 = vpop.f32.mrb[20].mxu1 }
 0x2cd   :  { %v474_v50 = vadd.f32 %v5151_v46, %v6642_v55  ;;  %v787_v51 = vadd.f32 %v6746_v2, %v786_v48  ;;  %v465_v52 = vpop.f32.mrb[29].mxu0  ;;  %v788_v12 = vpop.f32.mrb[21].mxu1  ;;  %v875_v46 = vld [vmem:[%s7907_s7 + $0x50] sm:$0xff] }
 0x2ce   :  { %v466_v54 = vadd.f32 %v6642_v55, %v465_v52  ;;  %v5152_v56 = vpop.f32.mrb[30].mxu0  ;;  %v789_v26 = vpop.f32.mrb[22].mxu1  ;;  %v879_v52 = vld [vmem:[%s7907_s7 + $0x70] sm:$0xff] }
 0x2cf   :  { %v510_v57 = vmax.f32 %v474_v50, 0.0  ;;  %v819_v40 = vmax.f32 %v787_v51, 0.0  ;;  %v477_v58 = vadd.f32 %v5152_v56, %v6642_v55  ;;  %v790_v59 = vadd.f32 %v6746_v2, %v789_v26  ;;  %v468_v61 = vpop.f32.mrb[31].mxu0  ;;  %v791_v44 = vpop.f32.mrb[23].mxu1  ;;  %v874_v51 = vld [vmem:[%s7907_s7 + $0x48] sm:$0xff] }
 0x2d0   :  { %v508_v62 = vmax.f32 %v466_v54, 0.0  ;;  %v469_v60 = vadd.f32 %v6642_v55, %v468_v61  ;;  %v586_v55 = vsel %vm560_vm4, %v6702_v31, %v557_v8  ;;  %v876_v61 = vld [vmem:[%s7907_s7 + $0x58] sm:$0xff] }
 0x2d1   :  { %v829_v0 = vmax.f32 %v817_v53, %v819_v40  ;;  %v511_v1 = vmax.f32 %v477_v58, 0.0  ;;  %v820_v47 = vmax.f32 %v790_v59, 0.0 }
 0x2d2   :  { %v526_v4 = vmax.f32 %v508_v62, %v510_v57  ;;  %v509_v5 = vmax.f32 %v469_v60, 0.0  ;;  %v878_v57 = vld [vmem:[%s7907_s7 + $0x68] sm:$0xff] }
 0x2d3   :  { %v830_v3 = vmax.f32 %v818_v63, %v820_v47  ;;  %v5566_v6 = vpack.i.bf16 %v825_v14, %v829_v0  ;;  %v865_v14 = vld [vmem:[%s7907_s7] sm:$0xff] }
 0x2d4   :  { %v527_v7 = vmax.f32 %v509_v5, %v511_v1  ;;  %v880_v1 = vld [vmem:[%s7907_s7 + $0x78] sm:$0xff] }
 0x2d5   :  { %5567 = vxpose.xlu0.b32.start [1/2] (short) %v5566_v6, 128  ;;  %v5568_v9 = vpack.i.bf16 %v826_v16, %v830_v3  ;;  %v867_v16 = vld [vmem:[%s7907_s7 + $0x10] sm:$0xff]  ;;  %v2640_v3 = vld [vmem:[%s7910_s10] sm:$0xff] }
 0x2d6   :  { %v535_v10 = vpack.c.bf16 %v527_v7, %v526_v4 }
 0x2d8   :  { %558 = vrot.lane.b32.xlu1 %v535_v10, %s6269_s2  ;;  %4656 = vmatprep.mubr.msk.bf16.mxu1 %vm560_vm4, %v535_v10 }
 0x2d9   :  { %5569 = vxpose.xlu0.b32.end [2/2] (short) %v5568_v9, 128  ;;  %793 = vmatmul.mubr.bf16.gmra.mrb[24].mxu1 %v586_v55  ;;  %v2641_v55 = vld [vmem:[%s7910_s10 + $0x8] sm:$0xff] }
 0x2da   :  { %800 = vmatprep.mubr.bf16.mxu1 %v6268_v41 }
 0x301   :  { %1162 = vxpose.xlu1.b32.start [1/2] (short) %v827_v36, 128  ;;  %v877_v36 = vld [vmem:[%s7907_s7 + $0x60] sm:$0xff] }
 0x302   :  { %5650 = vset.pattern.permute.xlu0 %v6268_v41 }
 0x305   :  { %1163 = vxpose.xlu1.b32.end [2/2] (short) %v828_v37, 128 }
 0x323   :  { %5651 = vset.pattern.permute.xlu1 %v6268_v41 }
 0x33a   :  { %923 = vperm.xlu0 %5650, %v865_v14  }
 0x33e   :  { %943 = vperm.xlu0 %5650, %v869_v15  }
 0x342   :  { %933 = vperm.xlu0 %5650, %v867_v16   ;;  %v2644_v16 = vld [vmem:[%s7910_s10 + $0x20] sm:$0xff] }
 0x346   :  { %953 = vperm.xlu0 %5650, %v871_v20  }
 0x34a   :  { %v559_v11 = vpop.permute.xlu1 %558  ;;  %963 = vperm.xlu0 %5650, %v873_v30  }
 0x34b   :  { %v590_v31 = vsel %vm560_vm4, %v6710_v43, %v559_v11 }
 0x34c   :  { %801 = vmatmul.mubr.bf16.gmra.mrb[28].mxu1 %v590_v31 }
 0x34d   :  { %5233 = vmatprep.mubr.bf16.mxu1 %v6773_v13 }
 0x34e   :  { %983 = vperm.xlu0 %5650, %v877_v36  }
 0x352   :  { %973 = vperm.xlu0 %5650, %v875_v46  }
 0x355   :  { %v5570_v17 = vpop.trf.xlu0 }
 0x356   :  { %v5574_v43 = vunpack.i.h.bf16 %v5570_v17  ;;  %v5571_v18 = vunpack.i.l.bf16 %v5570_v17  ;;  %993 = vperm.xlu0 %5650, %v879_v52  }
 0x359   :  { %v5575_v21 = vpop.trf.xlu0 }
 0x35a   :  { %v5579_v22 = vunpack.i.h.bf16 %v5575_v21  ;;  %v5576_v23 = vunpack.i.l.bf16 %v5575_v21 }
 0x35b   :  { %928 = vperm.xlu1 %5651, %v866_v19  }
 0x35c   :  { %v913_v24 = vpack.c.bf16 %v5579_v22, %v5574_v43  ;;  %v1348_v25 = vpack.c.bf16 %v5576_v23, %v5571_v18  ;;  %v2645_v22 = vld [vmem:[%s7910_s10 + $0x28] sm:$0xff] }
 0x35d   :  { %v5580_v27 = vpop.trf.xlu0 }
 0x35e   :  { %5153 = vmatprep.subr.bf16.mxu0 %v913_v24  ;;  %5217 = vmatprep.subr.bf16.mxu1 %v1348_v25  ;;  %v5584_v28 = vunpack.i.h.bf16 %v5580_v27  ;;  %v5581_v32 = vunpack.i.l.bf16 %v5580_v27 }
 0x35f   :  { %5154 = vmatpush3.bf16.msra.mxu0 %v913_v24  ;;  %5218 = vmatpush3.bf16.msra.mxu1 %v1348_v25 }
 0x360   :  { %948 = vperm.xlu1 %5651, %v870_v29   ;;  %v2642_v29 = vld [vmem:[%s7910_s10 + $0x10] sm:$0xff] }
 0x361   :  { %v5585_v33 = vpop.trf.xlu0 }
 0x362   :  { %v5589_v37 = vunpack.i.h.bf16 %v5585_v33  ;;  %v5586_v34 = vunpack.i.l.bf16 %v5585_v33 }
 0x364   :  { %v914_v38 = vpack.c.bf16 %v5589_v37, %v5584_v28  ;;  %v1349_v39 = vpack.c.bf16 %v5586_v34, %v5581_v32  ;;  %938 = vperm.xlu1 %5651, %v868_v35   ;;  %v2643_v37 = vld [vmem:[%s7910_s10 + $0x18] sm:$0xff] }
 0x365   :  { %v5590_v42 = vpop.trf.xlu0 }
 0x366   :  { %5155 = vmatprep.subr.bf16.mxu0 %v914_v38  ;;  %5219 = vmatprep.subr.bf16.mxu1 %v1349_v39  ;;  %v5594_v48 = vunpack.i.h.bf16 %v5590_v42  ;;  %v5591_v49 = vunpack.i.l.bf16 %v5590_v42 }
 0x367   :  { %5156 = vmatpush3.bf16.msra.mxu0 %v914_v38  ;;  %5220 = vmatpush3.bf16.msra.mxu1 %v1349_v39 }
 0x368   :  { %958 = vperm.xlu1 %5651, %v872_v45   ;;  %v2646_v45 = vld [vmem:[%s7910_s10 + $0x30] sm:$0xff] }
 0x369   :  { %v5595_v50 = vpop.trf.xlu0 }
 0x36a   :  { %v5599_v12 = vunpack.i.h.bf16 %v5595_v50  ;;  %v5596_v53 = vunpack.i.l.bf16 %v5595_v50 }
 0x36c   :  { %v915_v54 = vpack.c.bf16 %v5599_v12, %v5594_v48  ;;  %v1350_v56 = vpack.c.bf16 %v5596_v53, %v5591_v49  ;;  %968 = vperm.xlu1 %5651, %v874_v51   ;;  %v6852_v12 = vld [vmem:[%s7905_s5 + $0x8] sm:$0xff]   ;;  %v2647_v53 = vld [vmem:[%s7910_s10 + $0x38] sm:$0xff] }
 0x36d   :  { %v5600_v26 = vpop.trf.xlu0 }
 0x36e   :  { %5157 = vmatprep.subr.bf16.mxu0 %v915_v54  ;;  %5221 = vmatprep.subr.bf16.mxu1 %v1350_v56  ;;  %v5604_v40 = vunpack.i.h.bf16 %v5600_v26  ;;  %v5601_v58 = vunpack.i.l.bf16 %v5600_v26 }
 0x36f   :  { %5158 = vmatpush3.bf16.msra.mxu0 %v915_v54  ;;  %5222 = vmatpush3.bf16.msra.mxu1 %v1350_v56  ;;  %v6860_v54 = vld [vmem:[%s7905_s5 + $0x10] sm:$0xff]  }
 0x370   :  { %988 = vperm.xlu1 %5651, %v878_v57   ;;  %v2648_v57 = vld [vmem:[%s7910_s10 + $0x40] sm:$0xff] }
 0x371   :  { %v5605_v59 = vpop.trf.xlu0 }
 0x372   :  { %v5609_v44 = vunpack.i.h.bf16 %v5605_v59  ;;  %v5606_v62 = vunpack.i.l.bf16 %v5605_v59  ;;  %v6874_v59 = vld [vmem:[%s7905_s5 + $0x18] sm:$0xff]  }
 0x374   :  { %v916_v60 = vpack.c.bf16 %v5609_v44, %v5604_v40  ;;  %v1351_v63 = vpack.c.bf16 %v5606_v62, %v5601_v58  ;;  %978 = vperm.xlu1 %5651, %v876_v61   ;;  %v2652_v61 = vld [vmem:[%s7910_s10 + $0x60] sm:$0xff] }
 0x375   :  { %v5610_v0 = vpop.trf.xlu0  ;;  %v6882_v44 = vld [vmem:[%s7905_s5 + $0x20] sm:$0xff]  }
 0x376   :  { %5159 = vmatprep.subr.bf16.mxu0 %v916_v60  ;;  %5223 = vmatprep.subr.bf16.mxu1 %v1351_v63  ;;  %v5614_v47 = vunpack.i.h.bf16 %v5610_v0  ;;  %v5611_v4 = vunpack.i.l.bf16 %v5610_v0 }
 0x377   :  { %5160 = vmatpush3.bf16.msra.mxu0 %v916_v60  ;;  %5224 = vmatpush3.bf16.msra.mxu1 %v1351_v63  ;;  %v2653_v63 = vld [vmem:[%s7910_s10 + $0x68] sm:$0xff] }
 0x378   :  { %998 = vperm.xlu1 %5651, %v880_v1  }
 0x379   :  { %v5615_v5 = vpop.trf.xlu0 }
 0x37a   :  { %v5619_v6 = vunpack.i.h.bf16 %v5615_v5  ;;  %v5616_v7 = vunpack.i.l.bf16 %v5615_v5  ;;  %v6902_v5 = vld [vmem:[%s7905_s5 + $0x30] sm:$0xff]  }
 0x37c   :  { %v917_v8 = vpack.c.bf16 %v5619_v6, %v5614_v47  ;;  %v1352_v9 = vpack.c.bf16 %v5616_v7, %v5611_v4  ;;  %2660 = vperm.xlu1 %5651, %v2640_v3   ;;  %v6894_v47 = vld [vmem:[%s7905_s5 + $0x28] sm:$0xff]   ;;  %v2650_v4 = vld [vmem:[%s7910_s10 + $0x50] sm:$0xff]  ;;  %v2651_v6 = vld [vmem:[%s7910_s10 + $0x58] sm:$0xff] }
 0x37d   :  { %v5620_v10 = vpop.trf.xlu0 }
 0x37e   :  { %5161 = vmatprep.subr.bf16.mxu0 %v917_v8  ;;  %5225 = vmatprep.subr.bf16.mxu1 %v1352_v9  ;;  %v5624_v11 = vunpack.i.h.bf16 %v5620_v10  ;;  %v5621_v31 = vunpack.i.l.bf16 %v5620_v10 }
 0x37f   :  { %5162 = vmatpush3.bf16.msra.mxu0 %v917_v8  ;;  %5226 = vmatpush3.bf16.msra.mxu1 %v1352_v9 }
 0x380   :  { %2665 = vperm.xlu1 %5651, %v2641_v55  }
 0x381   :  { %v1178_v14 = vpop.trf.xlu1  ;;  %v5625_v15 = vpop.trf.xlu0 }
 0x382   :  { %v5629_v17 = vunpack.i.h.bf16 %v5625_v15  ;;  %v5626_v43 = vunpack.i.l.bf16 %v5625_v15  ;;  %v6926_v15 = vld [vmem:[%s7906_s6] sm:$0xff]  }
 0x384   :  { %v918_v18 = vpack.c.bf16 %v5629_v17, %v5624_v11  ;;  %v1353_v19 = vpack.c.bf16 %v5626_v43, %v5621_v31  ;;  %2680 = vperm.xlu1 %5651, %v2644_v16   ;;  %v6918_v11 = vld [vmem:[%s7905_s5 + $0x38] sm:$0xff]   ;;  %v2654_v31 = vld [vmem:[%s7910_s10 + $0x70] sm:$0xff] }
 0x385   :  { %v1179_v20 = vpop.trf.xlu1  ;;  %v5630_v21 = vpop.trf.xlu0  ;;  %v2655_v17 = vld [vmem:[%s7910_s10 + $0x78] sm:$0xff] }
 0x386   :  { %5163 = vmatprep.subr.bf16.mxu0 %v918_v18  ;;  %5227 = vmatprep.subr.bf16.mxu1 %v1353_v19  ;;  %v5634_v23 = vunpack.i.h.bf16 %v5630_v21  ;;  %v5631_v24 = vunpack.i.l.bf16 %v5630_v21  ;;  %v1194_v49 = vpack.c.bf16 %v1179_v20, %v1178_v14  ;;  %v4256_v20 = vld [vmem:[%s7912_s12] sm:$0xff]  ;;  %v6947_v21 = vld [vmem:[%s7906_s6 + $0x10] sm:$0xff]  }
 0x387   :  { %5164 = vmatpush3.bf16.msra.mxu0 %v918_v18  ;;  %5228 = vmatpush3.bf16.msra.mxu1 %v1353_v19  ;;  %v6939_v19 = vld [vmem:[%s7906_s6 + $0x8] sm:$0xff]  }
 0x388   :  { %2685 = vperm.xlu1 %5651, %v2645_v22  }
 0x389   :  { %v1180_v25 = vpop.trf.xlu1  ;;  %v5635_v27 = vpop.trf.xlu0 }
 0x38a   :  { %v5639_v30 = vunpack.i.h.bf16 %v5635_v27  ;;  %v5636_v28 = vunpack.i.l.bf16 %v5635_v27  ;;  %v6959_v27 = vld [vmem:[%s7906_s6 + $0x18] sm:$0xff]  }
 0x38c   :  { %v919_v32 = vpack.c.bf16 %v5639_v30, %v5634_v23  ;;  %v1354_v33 = vpack.c.bf16 %v5636_v28, %v5631_v24  ;;  %2670 = vperm.xlu1 %5651, %v2642_v29   ;;  %v4257_v23 = vld [vmem:[%s7912_s12 + $0x8] sm:$0xff]  ;;  %v4258_v29 = vld [vmem:[%s7912_s12 + $0x10] sm:$0xff]  ;;  %v6967_v30 = vld [vmem:[%s7906_s6 + $0x20] sm:$0xff]  }
 0x38d   :  { %v1181_v35 = vpop.trf.xlu1  ;;  %v5640_v36 = vpop.trf.xlu0  ;;  %v4259_v28 = vld [vmem:[%s7912_s12 + $0x18] sm:$0xff] }
 0x38e   :  { %5165 = vmatprep.subr.bf16.mxu0 %v919_v32  ;;  %5229 = vmatprep.subr.bf16.mxu1 %v1354_v33  ;;  %v5644_v34 = vunpack.i.h.bf16 %v5640_v36  ;;  %v5641_v38 = vunpack.i.l.bf16 %v5640_v36  ;;  %v1195_v56 = vpack.c.bf16 %v1181_v35, %v1180_v25  ;;  %v6989_v35 = vld [vmem:[%s7906_s6 + $0x30] sm:$0xff]   ;;  %v4261_v36 = vld [vmem:[%s7912_s12 + $0x28] sm:$0xff] }
 0x38f   :  { %5166 = vmatpush3.bf16.msra.mxu0 %v919_v32  ;;  %5230 = vmatpush3.bf16.msra.mxu1 %v1354_v33  ;;  %v6981_v32 = vld [vmem:[%s7906_s6 + $0x28] sm:$0xff]   ;;  %v4260_v33 = vld [vmem:[%s7912_s12 + $0x20] sm:$0xff] }
 0x390   :  { %2675 = vperm.xlu1 %5651, %v2643_v37   ;;  %v7003_v37 = vld [vmem:[%s7906_s6 + $0x38] sm:$0xff]  }
 0x391   :  { %v1182_v39 = vpop.trf.xlu1  ;;  %v5645_v42 = vpop.trf.xlu0 }
 0x392   :  { %v5649_v46 = vunpack.i.h.bf16 %v5645_v42  ;;  %v5646_v48 = vunpack.i.l.bf16 %v5645_v42  ;;  %v4265_v42 = vld [vmem:[%s7912_s12 + $0x48] sm:$0xff] }
 0x394   :  { %v920_v50 = vpack.c.bf16 %v5649_v46, %v5644_v34  ;;  %v1355_v51 = vpack.c.bf16 %v5646_v48, %v5641_v38  ;;  %2690 = vperm.xlu1 %5651, %v2646_v45   ;;  %v4262_v34 = vld [vmem:[%s7912_s12 + $0x30] sm:$0xff]  ;;  %v4263_v38 = vld [vmem:[%s7912_s12 + $0x38] sm:$0xff]  ;;  %v4268_v48 = vld [vmem:[%s7912_s12 + $0x60] sm:$0xff] }
 0x395   :  { %v1183_v52 = vpop.trf.xlu1  ;;  %v4266_v45 = vld [vmem:[%s7912_s12 + $0x50] sm:$0xff]  ;;  %v4267_v46 = vld [vmem:[%s7912_s12 + $0x58] sm:$0xff] }
 0x396   :  { %5167 = vmatprep.subr.bf16.mxu0 %v920_v50  ;;  %5231 = vmatprep.subr.bf16.mxu1 %v1355_v51  ;;  %v1196_v40 = vpack.c.bf16 %v1183_v52, %v1182_v39  ;;  %v4264_v39 = vld [vmem:[%s7912_s12 + $0x40] sm:$0xff]  ;;  %v4540_v52 = vld [vmem:[%s7914_s14 + $0x8] sm:$0xff] }
 0x397   :  { %5168 = vmatpush3.bf16.msra.mxu0 %v920_v50  ;;  %5232 = vmatpush3.bf16.msra.mxu1 %v1355_v51  ;;  %v4271_v50 = vld [vmem:[%s7912_s12 + $0x78] sm:$0xff]  ;;  %v4539_v51 = vld [vmem:[%s7914_s14] sm:$0xff] }
 0x398   :  { %5185 = vmatprep.subr.bf16.mxu0 %v1194_v49  ;;  %5281 = vmatprep.subr.bf16.mxu1 %v6268_v41 }
 0x399   :  { %v1184_v26 = vpop.trf.xlu1  ;;  %2695 = vperm.xlu1 %5651, %v2647_v53  }
 0x39a   :  { %5170 = vmatmul.mubr.bf16.vlgmr.msra.gmra.mrb[32].mxu0 %v6852_v12  ;;  %5234 = vmatmul.mubr.bf16.vlgmr.msra.gmra.mrb[32].mxu1 %v6852_v12 }
 0x39b   :  { %5173 = vmatprep.mubr.bf16.mxu0 %v6860_v54  ;;  %5237 = vmatprep.mubr.bf16.mxu1 %v6860_v54 }
 0x39c   :  { %5186 = vmatpush3.bf16.msra.mxu0 %v1194_v49  ;;  %5282 = vmatpush3.bf16.msra.mxu1 %v6268_v41  ;;  %v4269_v49 = vld [vmem:[%s7912_s12 + $0x68] sm:$0xff] }
 0x39d   :  { %v1185_v58 = vpop.trf.xlu1  ;;  %5187 = vmatprep.subr.bf16.mxu0 %v1195_v56  ;;  %2700 = vperm.xlu1 %5651, %v2648_v57  }
 0x39e   :  { %v1197_v62 = vpack.c.bf16 %v1185_v58, %v1184_v26 }
 0x3a0   :  { %5188 = vmatpush3.bf16.msra.mxu0 %v1195_v56 }
 0x3a1   :  { %v1186_v60 = vpop.trf.xlu1  ;;  %5189 = vmatprep.subr.bf16.mxu0 %v1196_v40  ;;  %2720 = vperm.xlu1 %5651, %v2652_v61  }
 0x3a2   :  { %5174 = vmatmul.mubr.bf16.gmra.mrb[36].mxu0 %v6874_v59  ;;  %5238 = vmatmul.mubr.bf16.gmra.mrb[36].mxu1 %v6874_v59 }
 0x3a3   :  { %5177 = vmatprep.mubr.bf16.mxu0 %v6882_v44  ;;  %5241 = vmatprep.mubr.bf16.mxu1 %v6882_v44 }
 0x3a4   :  { %5190 = vmatpush3.bf16.msra.mxu0 %v1196_v40 }
 0x3a5   :  { %v1187_v0 = vpop.trf.xlu1  ;;  %5191 = vmatprep.subr.bf16.mxu0 %v1197_v62  ;;  %2725 = vperm.xlu1 %5651, %v2653_v63  }
 0x3a6   :  { %v1198_v1 = vpack.c.bf16 %v1187_v0, %v1186_v60 }
 0x3a8   :  { %5192 = vmatpush3.bf16.msra.mxu0 %v1197_v62 }
 0x3a9   :  { %v1188_v3 = vpop.trf.xlu1  ;;  %5193 = vmatprep.subr.bf16.mxu0 %v1198_v1  ;;  %2710 = vperm.xlu1 %5651, %v2650_v4  }
 0x3aa   :  { %5178 = vmatmul.mubr.bf16.gmra.mrb[40].mxu0 %v6894_v47  ;;  %5242 = vmatmul.mubr.bf16.gmra.mrb[40].mxu1 %v6894_v47 }
 0x3ab   :  { %5181 = vmatprep.mubr.bf16.mxu0 %v6902_v5  ;;  %5245 = vmatprep.mubr.bf16.mxu1 %v6902_v5 }
 0x3ac   :  { %v6911_v7 = vpop.f32.mrb[24].mxu1  ;;  %5194 = vmatpush3.bf16.msra.mxu0 %v1198_v1 }
 0x3ad   :  { %v1189_v8 = vpop.trf.xlu1  ;;  %v796_v9 = vpop.f32.mrb[25].mxu1  ;;  %2715 = vperm.xlu1 %5651, %v2651_v6  }
 0x3ae   :  { %v1199_v10 = vpack.c.bf16 %v1189_v8, %v1188_v3  ;;  %v6913_v55 = vpop.f32.mrb[26].mxu1 }
 0x3af   :  { %v799_v14 = vpop.f32.mrb[27].mxu1 }
 0x3b0   :  { %5195 = vmatprep.subr.bf16.mxu0 %v1199_v10 }
 0x3b1   :  { %v1190_v16 = vpop.trf.xlu1  ;;  %5196 = vmatpush3.bf16.msra.mxu0 %v1199_v10  ;;  %2730 = vperm.xlu1 %5651, %v2654_v31  }
 0x3b2   :  { %5182 = vmatmul.mubr.bf16.gmra.mrb[44].mxu0 %v6918_v11  ;;  %5246 = vmatmul.mubr.bf16.gmra.mrb[44].mxu1 %v6918_v11 }
 0x3b3   :  { %5283 = vmatprep.mubr.msk.bf16.mxu1 %vm1680_vm6, %v6926_v15  ;;  %5201 = vmatprep.mubr.bf16.mxu0 %v6773_v13 }
 0x3b5   :  { %v1191_v43 = vpop.trf.xlu1  ;;  %2735 = vperm.xlu1 %5651, %v2655_v17  }
 0x3b6   :  { %v1200_v18 = vpack.c.bf16 %v1191_v43, %v1190_v16 }
 0x3b8   :  { %5197 = vmatprep.subr.bf16.mxu0 %v1200_v18 }
 0x3b9   :  { %v1192_v22 = vpop.trf.xlu1  ;;  %5198 = vmatpush3.bf16.msra.mxu0 %v1200_v18  ;;  %4274 = vperm.xlu1 %5651, %v4256_v20   ;;  %v7057_v3 = vpop.permute.xlu0 %923 }
 0x3ba   :  { %5284 = vmatmul.mubr.msk.bf16.vlgmr.msra.gmra.mrb[48].mxu1 %vm1680_vm6, %v6939_v19 }
 0x3bb   :  { %5287 = vmatprep.mubr.msk.bf16.mxu1 %vm1680_vm6, %v6947_v21 }
 0x3bd   :  { %v1193_v24 = vpop.trf.xlu1  ;;  %4279 = vperm.xlu1 %5651, %v4257_v23  }
 0x3be   :  { %v1201_v25 = vpack.c.bf16 %v1193_v24, %v1192_v22 }
 0x3c0   :  { %5199 = vmatprep.subr.bf16.mxu0 %v1201_v25 }
 0x3c1   :  { %5200 = vmatpush3.bf16.msra.mxu0 %v1201_v25  ;;  %4284 = vperm.xlu1 %5651, %v4258_v29  }
 0x3c2   :  { %5288 = vmatmul.mubr.msk.bf16.gmra.mrb[52].mxu1 %vm1680_vm6, %v6959_v27 }
 0x3c3   :  { %5291 = vmatprep.mubr.msk.bf16.mxu1 %vm1680_vm6, %v6967_v30 }
 0x3c4   :  { %5202 = vmatmul.mubr.bf16.vlgmr.msra.gmra.mrb[48].mxu0 %v6852_v12  ;;  %v795_v12 = vadd.f32 %v6746_v2, %v6911_v7  ;;  %v7061_v7 = vpop.permute.xlu0 %943 }
 0x3c5   :  { %5205 = vmatprep.mubr.bf16.mxu0 %v6860_v54  ;;  %4289 = vperm.xlu1 %5651, %v4259_v28   ;;  %v798_v54 = vadd.f32 %v6746_v2, %v6913_v55 }
 0x3c6   :  { %v821_v40 = vmax.f32 %v795_v12, 0.0 }
 0x3c7   :  { %v822_v60 = vmax.f32 %v798_v54, 0.0 }
 0x3c8   :  { %v7065_v9 = vpop.permute.xlu0 %933 }
 0x3c9   :  { %4294 = vperm.xlu1 %5651, %v4260_v33  }
 0x3ca   :  { %5292 = vmatmul.mubr.msk.bf16.gmra.mrb[56].mxu1 %vm1680_vm6, %v6981_v32 }
 0x3cb   :  { %5295 = vmatprep.mubr.msk.bf16.mxu1 %vm1680_vm6, %v6989_v35 }
 0x3cc   :  { %5206 = vmatmul.mubr.bf16.gmra.mrb[52].mxu0 %v6874_v59  ;;  %v7069_v10 = vpop.permute.xlu0 %953 }
 0x3cd   :  { %5209 = vmatprep.mubr.bf16.mxu0 %v6882_v44  ;;  %4299 = vperm.xlu1 %5651, %v4261_v36  }
 0x3d0   :  { %v7073_v31 = vpop.permute.xlu0 %963 }
 0x3d1   :  { %4304 = vperm.xlu1 %5651, %v4262_v34  }
 0x3d2   :  { %5296 = vmatmul.mubr.msk.bf16.gmra.mrb[60].mxu1 %vm1680_vm6, %v7003_v37 }
 0x3d3   :  { %5323 = vmatprep.mubr.msk.bf16.mxu1 %vm1680_vm6, %v6926_v15 }
 0x3d4   :  { %5210 = vmatmul.mubr.bf16.gmra.mrb[56].mxu0 %v6894_v47 }
 0x3d5   :  { %5213 = vmatprep.mubr.bf16.mxu0 %v6902_v5  ;;  %4309 = vperm.xlu1 %5651, %v4263_v38  }
 0x3d9   :  { %4314 = vperm.xlu1 %5651, %v4264_v39  }
 0x3da   :  { %v7055_v4 = vpop.permute.xlu1 %928 }
 0x3dc   :  { %5214 = vmatmul.mubr.bf16.gmra.mrb[60].mxu0 %v6918_v11 }
 0x3dd   :  { %4319 = vperm.xlu1 %5651, %v4265_v42   ;;  %5265 = vmatprep.mubr.bf16.mxu0 %v6773_v13  ;;  %v4270_v13 = vld [vmem:[%s7912_s12 + $0x70] sm:$0xff]  ;;  %v7093_v42 = vpop.permute.xlu0 %983 }
 0x3df   :  { %v7059_v6 = vpop.permute.xlu1 %948 }
 0x3e1   :  { %4324 = vperm.xlu1 %5651, %v4266_v45  }
 0x3e3   :  { %v7063_v8 = vpop.permute.xlu1 %938 }
 0x3e5   :  { %4329 = vperm.xlu1 %5651, %v4267_v46  }
 0x3e9   :  { %4334 = vperm.xlu1 %5651, %v4268_v48  }
 0x3ed   :  { %4339 = vperm.xlu1 %5651, %v4269_v49  }
 0x3f1   :  { %4344 = vperm.xlu1 %5651, %v4270_v13  }
 0x3f5   :  { %4349 = vperm.xlu1 %5651, %v4271_v50  }
 0x3f9   :  { %4543 = vperm.xlu1 %5651, %v4539_v51  }
 0x3fd   :  { %4548 = vperm.xlu1 %5651, %v4540_v52  }
 0x41f   :  { %v802_v53 = vpop.f32.mrb[28].mxu1 }
 0x420   :  { %v803_v56 = vadd.f32 %v6746_v2, %v802_v53  ;;  %v804_v26 = vpop.f32.mrb[29].mxu1 }
 0x421   :  { %v805_v57 = vpop.f32.mrb[30].mxu1 }
 0x422   :  { %v823_v58 = vmax.f32 %v803_v56, 0.0  ;;  %v806_v61 = vadd.f32 %v6746_v2, %v805_v57  ;;  %v807_v62 = vpop.f32.mrb[31].mxu1  ;;  %v7067_v2 = vpop.permute.xlu1 %958 }
 0x423   :  { %v7113_v62 = vpop.permute.xlu0 %973 }
 0x424   :  { %v831_v63 = vmax.f32 %v821_v40, %v823_v58  ;;  %v824_v0 = vmax.f32 %v806_v61, 0.0 }
 0x426   :  { %v832_v1 = vmax.f32 %v822_v60, %v824_v0  ;;  %1470 = vxpose.xlu0.b32.start [1/2] (short) %v831_v63, 128  ;;  %v7071_v55 = vpop.permute.xlu1 %968 }
 0x42a   :  { %1471 = vxpose.xlu0.b32.end [2/2] (short) %v832_v1, 128  ;;  %v7091_v39 = vpop.permute.xlu1 %988 }
 0x42e   :  { %v7111_v61 = vpop.permute.xlu1 %978 }
 0x46d   :  { %v5171_v14 = vpop.f32.mrb[32].mxu0  ;;  %v5235_v16 = vpop.f32.mrb[32].mxu1 }
 0x46e   :  { %v1092_v17 = vadd.f32 %v5171_v14, %v7065_v9  ;;  %v1399_v43 = vadd.f32 %v5235_v16, %v7065_v9  ;;  %v1083_v18 = vpop.f32.mrb[33].mxu0  ;;  %v1390_v20 = vpop.f32.mrb[33].mxu1 }
 0x46f   :  { %v1084_v22 = vadd.f32 %v1083_v18, %v7057_v3  ;;  %v1391_v23 = vadd.f32 %v1390_v20, %v7057_v3  ;;  %v5172_v24 = vpop.f32.mrb[34].mxu0  ;;  %v5236_v25 = vpop.f32.mrb[34].mxu1 }
 0x470   :  { %1148 = vst.msk [vmem:[#allocation2 + $0x10] sm:$0xff] %vm230_vm2, %v1092_v17  ;;  %1456 = vst.msk [vmem:[#allocation2 + $0x110] sm:$0xff] %vm230_vm2, %v1399_v43  ;;  %v1095_v29 = vadd.f32 %v5172_v24, %v7063_v8  ;;  %v1402_v28 = vadd.f32 %v5236_v25, %v7063_v8  ;;  %v1086_v33 = vpop.f32.mrb[35].mxu0  ;;  %v1393_v36 = vpop.f32.mrb[35].mxu1 }
 0x471   :  { %1146 = vst.msk [vmem:[#allocation2] sm:$0xff] %vm230_vm2, %v1084_v22  ;;  %1454 = vst.msk [vmem:[#allocation2 + $0x100] sm:$0xff] %vm230_vm2, %v1391_v23  ;;  %v1087_v34 = vadd.f32 %v1086_v33, %v7055_v4  ;;  %v1394_v38 = vadd.f32 %v1393_v36, %v7055_v4  ;;  %v7131_v33 = vpop.permute.xlu1 %998  ;;  %v7133_v36 = vpop.permute.xlu0 %993 }
 0x472   :  { %1149 = vst.msk [vmem:[#allocation2 + $0x18] sm:$0xff] %vm230_vm2, %v1095_v29  ;;  %1457 = vst.msk [vmem:[#allocation2 + $0x118] sm:$0xff] %vm230_vm2, %v1402_v28 }
 0x473   :  { %1147 = vst.msk [vmem:[#allocation2 + $0x8] sm:$0xff] %vm230_vm2, %v1087_v34  ;;  %1455 = vst.msk [vmem:[#allocation2 + $0x108] sm:$0xff] %vm230_vm2, %v1394_v38 }
 0x475   :  { %v5175_v45 = vpop.f32.mrb[36].mxu0  ;;  %v5239_v46 = vpop.f32.mrb[36].mxu1 }
 0x476   :  { %v1108_v48 = vadd.f32 %v5175_v45, %v7069_v10  ;;  %v1415_v49 = vadd.f32 %v5239_v46, %v7069_v10  ;;  %v1099_v13 = vpop.f32.mrb[37].mxu0  ;;  %v1406_v50 = vpop.f32.mrb[37].mxu1 }
 0x477   :  { %v1100_v51 = vadd.f32 %v1099_v13, %v7061_v7  ;;  %v1407_v52 = vadd.f32 %v1406_v50, %v7061_v7  ;;  %v5176_v12 = vpop.f32.mrb[38].mxu0  ;;  %v5240_v53 = vpop.f32.mrb[38].mxu1 }
 0x478   :  { %1152 = vst.msk [vmem:[#allocation2 + $0x30] sm:$0xff] %vm230_vm2, %v1108_v48  ;;  %1460 = vst.msk [vmem:[#allocation2 + $0x130] sm:$0xff] %vm230_vm2, %v1415_v49  ;;  %v1111_v54 = vadd.f32 %v5176_v12, %v7067_v2  ;;  %v1418_v56 = vadd.f32 %v5240_v53, %v7067_v2  ;;  %v1102_v26 = vpop.f32.mrb[39].mxu0  ;;  %v1409_v57 = vpop.f32.mrb[39].mxu1  ;;  %v2649_v12 = vld [vmem:[%s7910_s10 + $0x48] sm:$0xff] }
 0x479   :  { %1150 = vst.msk [vmem:[#allocation2 + $0x20] sm:$0xff] %vm230_vm2, %v1100_v51  ;;  %1458 = vst.msk [vmem:[#allocation2 + $0x120] sm:$0xff] %vm230_vm2, %v1407_v52  ;;  %v1103_v40 = vadd.f32 %v1102_v26, %v7059_v6  ;;  %v1410_v58 = vadd.f32 %v1409_v57, %v7059_v6 }
 0x47a   :  { %1153 = vst.msk [vmem:[#allocation2 + $0x38] sm:$0xff] %vm230_vm2, %v1111_v54  ;;  %1461 = vst.msk [vmem:[#allocation2 + $0x138] sm:$0xff] %vm230_vm2, %v1418_v56 }
 0x47b   :  { %1151 = vst.msk [vmem:[#allocation2 + $0x28] sm:$0xff] %vm230_vm2, %v1103_v40  ;;  %1459 = vst.msk [vmem:[#allocation2 + $0x128] sm:$0xff] %vm230_vm2, %v1410_v58  ;;  %v1626_v58 = vld [vmem:[#allocation2 + $0x10] sm:$0xff] }
 0x47d   :  { %v5179_v60 = vpop.f32.mrb[40].mxu0  ;;  %v5243_v63 = vpop.f32.mrb[40].mxu1 }
 0x47e   :  { %v1124_v0 = vadd.f32 %v5179_v60, %v7113_v62  ;;  %v1431_v1 = vadd.f32 %v5243_v63, %v7113_v62  ;;  %v1115_v14 = vpop.f32.mrb[41].mxu0  ;;  %v1422_v16 = vpop.f32.mrb[41].mxu1  ;;  %v1627_v63 = vld [vmem:[#allocation2 + $0x18] sm:$0xff] }
 0x47f   :  { %v1116_v17 = vadd.f32 %v1115_v14, %v7073_v31  ;;  %v1423_v43 = vadd.f32 %v1422_v16, %v7073_v31  ;;  %v5180_v18 = vpop.f32.mrb[42].mxu0  ;;  %v5244_v20 = vpop.f32.mrb[42].mxu1  ;;  %v1625_v16 = vld [vmem:[#allocation2 + $0x8] sm:$0xff] }
 0x480   :  { %1156 = vst.msk [vmem:[#allocation2 + $0x50] sm:$0xff] %vm230_vm2, %v1124_v0  ;;  %1464 = vst.msk [vmem:[#allocation2 + $0x150] sm:$0xff] %vm230_vm2, %v1431_v1  ;;  %v1127_v22 = vadd.f32 %v5180_v18, %v7111_v61  ;;  %v1434_v23 = vadd.f32 %v5244_v20, %v7111_v61  ;;  %v1118_v24 = vpop.f32.mrb[43].mxu0  ;;  %v1425_v25 = vpop.f32.mrb[43].mxu1  ;;  %v1624_v1 = vld [vmem:[#allocation2] sm:$0xff] }
 0x481   :  { %1154 = vst.msk [vmem:[#allocation2 + $0x40] sm:$0xff] %vm230_vm2, %v1116_v17  ;;  %1462 = vst.msk [vmem:[#allocation2 + $0x140] sm:$0xff] %vm230_vm2, %v1423_v43  ;;  %v1119_v29 = vadd.f32 %v1118_v24, %v7071_v55  ;;  %v1426_v28 = vadd.f32 %v1425_v25, %v7071_v55 }
 0x482   :  { %1157 = vst.msk [vmem:[#allocation2 + $0x58] sm:$0xff] %vm230_vm2, %v1127_v22  ;;  %1465 = vst.msk [vmem:[#allocation2 + $0x158] sm:$0xff] %vm230_vm2, %v1434_v23 }
 0x483   :  { %1155 = vst.msk [vmem:[#allocation2 + $0x48] sm:$0xff] %vm230_vm2, %v1119_v29  ;;  %1463 = vst.msk [vmem:[#allocation2 + $0x148] sm:$0xff] %vm230_vm2, %v1426_v28  ;;  %v1630_v28 = vld [vmem:[#allocation2 + $0x30] sm:$0xff] }
 0x485   :  { %v5183_v34 = vpop.f32.mrb[44].mxu0  ;;  %v5247_v38 = vpop.f32.mrb[44].mxu1 }
 0x486   :  { %v1140_v45 = vadd.f32 %v5183_v34, %v7133_v36  ;;  %v1447_v46 = vadd.f32 %v5247_v38, %v7133_v36  ;;  %v1131_v48 = vpop.f32.mrb[45].mxu0  ;;  %v1438_v49 = vpop.f32.mrb[45].mxu1  ;;  %v1631_v38 = vld [vmem:[#allocation2 + $0x38] sm:$0xff] }
 0x487   :  { %v1132_v13 = vadd.f32 %v1131_v48, %v7093_v42  ;;  %v1439_v50 = vadd.f32 %v1438_v49, %v7093_v42  ;;  %v5248_v51 = vpop.f32.mrb[46].mxu1  ;;  %v5184_v52 = vpop.f32.mrb[46].mxu0  ;;  %v1629_v49 = vld [vmem:[#allocation2 + $0x28] sm:$0xff] }
 0x488   :  { %1160 = vst.msk [vmem:[#allocation2 + $0x70] sm:$0xff] %vm230_vm2, %v1140_v45  ;;  %1468 = vst.msk [vmem:[#allocation2 + $0x170] sm:$0xff] %vm230_vm2, %v1447_v46  ;;  %v1450_v53 = vadd.f32 %v5248_v51, %v7131_v33  ;;  %v1441_v54 = vpop.f32.mrb[47].mxu1  ;;  %v1143_v56 = vadd.f32 %v5184_v52, %v7131_v33  ;;  %v1134_v26 = vpop.f32.mrb[47].mxu0  ;;  %v1628_v46 = vld [vmem:[#allocation2 + $0x20] sm:$0xff] }
 0x489   :  { %1158 = vst.msk [vmem:[#allocation2 + $0x60] sm:$0xff] %vm230_vm2, %v1132_v13  ;;  %1466 = vst.msk [vmem:[#allocation2 + $0x160] sm:$0xff] %vm230_vm2, %v1439_v50  ;;  %v1442_v57 = vadd.f32 %v1441_v54, %v7091_v39  ;;  %v1135_v40 = vadd.f32 %v1134_v26, %v7091_v39 }
 0x48a   :  { %1469 = vst.msk [vmem:[#allocation2 + $0x178] sm:$0xff] %vm230_vm2, %v1450_v53  ;;  %1161 = vst.msk [vmem:[#allocation2 + $0x78] sm:$0xff] %vm230_vm2, %v1143_v56 }
 0x48b   :  { %2705 = vperm.xlu0 %5650, %v2649_v12   ;;  %1467 = vst.msk [vmem:[#allocation2 + $0x168] sm:$0xff] %vm230_vm2, %v1442_v57  ;;  %1159 = vst.msk [vmem:[#allocation2 + $0x68] sm:$0xff] %vm230_vm2, %v1135_v40 }
 0x48d   :  { %v5285_v60 = vpop.f32.mrb[48].mxu1 }
 0x48e   :  { %v1804_v0 = vadd.f32 %v5285_v60, %v1626_v58  ;;  %v1739_v14 = vpop.f32.mrb[49].mxu1 }
 0x48f   :  { %v1802_v17 = vadd.f32 %v1739_v14, %v1624_v1  ;;  %v5286_v43 = vpop.f32.mrb[50].mxu1 }
 0x490   :  { %v4683_v18 = vmul.f32 -1.442695, %v1804_v0  ;;  %v1805_v20 = vadd.f32 %v5286_v43, %v1627_v63  ;;  %v1742_v22 = vpop.f32.mrb[51].mxu1 }
 0x491   :  { %v4681_v23 = vmul.f32 -1.442695, %v1802_v17  ;;  %v1803_v24 = vadd.f32 %v1742_v22, %v1625_v16 }
 0x492   :  { %5707 = vpow2.f32 %v4683_v18  ;;  %v4684_v25 = vmul.f32 -1.442695, %v1805_v20 }
 0x493   :  { %5709 = vpow2.f32 %v4681_v23  ;;  %v4682_v29 = vmul.f32 -1.442695, %v1803_v24  ;;  %v1634_v23 = vld [vmem:[#allocation2 + $0x50] sm:$0xff] }
 0x494   :  { %5711 = vpow2.f32 %v4684_v25  ;;  %v1635_v25 = vld [vmem:[#allocation2 + $0x58] sm:$0xff] }
 0x495   :  { %5713 = vpow2.f32 %v4682_v29  ;;  %v5289_v34 = vpop.f32.mrb[52].mxu1 }
 0x496   :  { %v1808_v45 = vadd.f32 %v5289_v34, %v1630_v28  ;;  %v1755_v48 = vpop.f32.mrb[53].mxu1 }
 0x497   :  { %v1806_v13 = vadd.f32 %v1755_v48, %v1628_v46  ;;  %v5203_v50 = vpop.f32.mrb[48].mxu0  ;;  %v5290_v51 = vpop.f32.mrb[54].mxu1  ;;  %v1633_v48 = vld [vmem:[#allocation2 + $0x48] sm:$0xff] }
 0x498   :  { %v4687_v52 = vmul.f32 -1.442695, %v1808_v45  ;;  %v1245_v12 = vadd.f32 %v5203_v50, %v7065_v9  ;;  %v1236_v53 = vpop.f32.mrb[49].mxu0  ;;  %v1809_v54 = vadd.f32 %v5290_v51, %v1631_v38  ;;  %v1758_v56 = vpop.f32.mrb[55].mxu1  ;;  %v1632_v38 = vld [vmem:[#allocation2 + $0x40] sm:$0xff] }
 0x499   :  { %v4685_v26 = vmul.f32 -1.442695, %v1806_v13  ;;  %v1237_v57 = vadd.f32 %v1236_v53, %v7057_v3  ;;  %v1807_v40 = vadd.f32 %v1758_v56, %v1629_v49  ;;  %v5204_v58 = vpop.f32.mrb[50].mxu0 }
 0x49a   :  { %5715 = vpow2.f32 %v4687_v52  ;;  %1302 = vst.msk [vmem:[#allocation2 + $0x90] sm:$0xff] %vm230_vm2, %v1245_v12  ;;  %v4688_v60 = vmul.f32 -1.442695, %v1809_v54  ;;  %v1248_v63 = vadd.f32 %v5204_v58, %v7063_v8  ;;  %v1239_v0 = vpop.f32.mrb[51].mxu0 }
 0x49b   :  { %5717 = vpow2.f32 %v4685_v26  ;;  %1300 = vst.msk [vmem:[#allocation2 + $0x80] sm:$0xff] %vm230_vm2, %v1237_v57  ;;  %v4686_v1 = vmul.f32 -1.442695, %v1807_v40  ;;  %v1240_v14 = vadd.f32 %v1239_v0, %v7055_v4  ;;  %v1638_v0 = vld [vmem:[#allocation2 + $0x70] sm:$0xff] }
 0x49c   :  { %v5708_v16 = vpop.eup %5707  ;;  %5719 = vpow2.f32 %v4688_v60  ;;  %1303 = vst.msk [vmem:[#allocation2 + $0x98] sm:$0xff] %vm230_vm2, %v1248_v63 }
 0x49d   :  { %v5710_v17 = vpop.eup %5709  ;;  %v1832_v43 = vadd.f32 1.0, %v5708_v16  ;;  %5721 = vpow2.f32 %v4686_v1  ;;  %v5293_v18 = vpop.f32.mrb[56].mxu1  ;;  %1301 = vst.msk [vmem:[#allocation2 + $0x88] sm:$0xff] %vm230_vm2, %v1240_v14 }
 0x49e   :  { %v5712_v20 = vpop.eup %5711  ;;  %v1830_v22 = vadd.f32 1.0, %v5710_v17  ;;  %v1771_v24 = vpop.f32.mrb[57].mxu1  ;;  %v1812_v34 = vadd.f32 %v5293_v18, %v1634_v23  ;;  %v1636_v18 = vld [vmem:[#allocation2 + $0x60] sm:$0xff] }
 0x49f   :  { %v5714_v29 = vpop.eup %5713  ;;  %5723 = vrcp.f32 %v1832_v43  ;;  %v1833_v28 = vadd.f32 1.0, %v5712_v20  ;;  %v5207_v45 = vpop.f32.mrb[52].mxu0  ;;  %v1810_v13 = vadd.f32 %v1771_v24, %v1632_v38 }
 0x4a0   :  { %v5294_v46 = vpop.f32.mrb[58].mxu1  ;;  %5725 = vrcp.f32 %v1830_v22  ;;  %v1831_v49 = vadd.f32 1.0, %v5714_v29  ;;  %v1261_v50 = vadd.f32 %v5207_v45, %v7069_v10  ;;  %v1252_v51 = vpop.f32.mrb[53].mxu0  ;;  %v1639_v22 = vld [vmem:[#allocation2 + $0x78] sm:$0xff] }
 0x4a1   :  { %v1774_v52 = vpop.f32.mrb[59].mxu1  ;;  %5727 = vrcp.f32 %v1833_v28  ;;  %v1253_v12 = vadd.f32 %v1252_v51, %v7061_v7  ;;  %v1813_v53 = vadd.f32 %v5294_v46, %v1635_v25  ;;  %v5208_v54 = vpop.f32.mrb[54].mxu0 }
 0x4a2   :  { %5729 = vrcp.f32 %v1831_v49  ;;  %1306 = vst.msk [vmem:[#allocation2 + $0xb0] sm:$0xff] %vm230_vm2, %v1261_v50  ;;  %v1811_v56 = vadd.f32 %v1774_v52, %v1633_v48  ;;  %v1264_v26 = vadd.f32 %v5208_v54, %v7067_v2  ;;  %v1255_v57 = vpop.f32.mrb[55].mxu0 }
 0x4a3   :  { %5731 = vtanh.f32 %v1812_v34  ;;  %1304 = vst.msk [vmem:[#allocation2 + $0xa0] sm:$0xff] %vm230_vm2, %v1253_v12  ;;  %v1256_v40 = vadd.f32 %v1255_v57, %v7059_v6  ;;  %v1637_v34 = vld [vmem:[#allocation2 + $0x68] sm:$0xff] }
 0x4a4   :  { %v5716_v58 = vpop.eup %5715  ;;  %5733 = vtanh.f32 %v1810_v13  ;;  %1307 = vst.msk [vmem:[#allocation2 + $0xb8] sm:$0xff] %vm230_vm2, %v1264_v26 }
 0x4a5   :  { %v5718_v60 = vpop.eup %5717  ;;  %v1856_v63 = vadd.f32 1.0, %v5716_v58  ;;  %5735 = vtanh.f32 %v1813_v53  ;;  %v5297_v1 = vpop.f32.mrb[60].mxu1  ;;  %1305 = vst.msk [vmem:[#allocation2 + $0xa8] sm:$0xff] %vm230_vm2, %v1256_v40 }
 0x4a6   :  { %v5720_v14 = vpop.eup %5719  ;;  %v1854_v16 = vadd.f32 1.0, %v5718_v60  ;;  %5737 = vtanh.f32 %v1811_v56  ;;  %v1816_v17 = vadd.f32 %v5297_v1, %v1638_v0  ;;  %v1486_v43 = vpop.trf.xlu0 }
 0x4a7   :  { %v1787_v20 = vpop.f32.mrb[61].mxu1  ;;  %v5722_v23 = vpop.eup %5721  ;;  %5739 = vrcp.f32 %v1856_v63  ;;  %v1857_v24 = vadd.f32 1.0, %v5720_v14 }
 0x4a8   :  { %v1814_v25 = vadd.f32 %v1787_v20, %v1636_v18  ;;  %v5211_v29 = vpop.f32.mrb[56].mxu0  ;;  %v5298_v28 = vpop.f32.mrb[62].mxu1  ;;  %5741 = vrcp.f32 %v1854_v16  ;;  %v1855_v38 = vadd.f32 1.0, %v5722_v23  ;;  %v4691_v45 = vmul.f32 -1.442695, %v1816_v17 }
 0x4a9   :  { %v1277_v46 = vadd.f32 %v5211_v29, %v7113_v62  ;;  %v1268_v48 = vpop.f32.mrb[57].mxu0  ;;  %v1790_v49 = vpop.f32.mrb[63].mxu1  ;;  %5743 = vrcp.f32 %v1857_v24  ;;  %v1817_v51 = vadd.f32 %v5298_v28, %v1639_v22 }
 0x4aa   :  { %v5724_v13 = vpop.eup %5723  ;;  %v4689_v50 = vmul.f32 -1.442695, %v1814_v25  ;;  %v1269_v52 = vadd.f32 %v1268_v48, %v7073_v31  ;;  %v5212_v12 = vpop.f32.mrb[58].mxu0  ;;  %5745 = vrcp.f32 %v1855_v38  ;;  %v1815_v54 = vadd.f32 %v1790_v49, %v1637_v34 }
 0x4ab   :  { %v5726_v53 = vpop.eup %5725  ;;  %1310 = vst.msk [vmem:[#allocation2 + $0xd0] sm:$0xff] %vm230_vm2, %v1277_v46  ;;  %v1487_v56 = vpop.trf.xlu0  ;;  %v1280_v26 = vadd.f32 %v5212_v12, %v7111_v61  ;;  %5747 = vpow2.f32 %v4691_v45  ;;  %v4692_v58 = vmul.f32 -1.442695, %v1817_v51 }
 0x4ac   :  { %v1271_v57 = vpop.f32.mrb[59].mxu0  ;;  %v5728_v40 = vpop.eup %5727  ;;  %1308 = vst.msk [vmem:[#allocation2 + $0xc0] sm:$0xff] %vm230_vm2, %v1269_v52  ;;  %v1502_v60 = vpack.c.bf16 %v1487_v56, %v1486_v43  ;;  %5749 = vpow2.f32 %v4689_v50  ;;  %v4690_v1 = vmul.f32 -1.442695, %v1815_v54 }
 0x4ad   :  { %v1272_v63 = vadd.f32 %v1271_v57, %v7071_v55  ;;  %v5730_v0 = vpop.eup %5729  ;;  %1311 = vst.msk [vmem:[#allocation2 + $0xd8] sm:$0xff] %vm230_vm2, %v1280_v26  ;;  %5751 = vpow2.f32 %v4692_v58 }
 0x4ae   :  { %v5732_v14 = vpop.eup %5731  ;;  %5249 = vmatprep.subr.bf16.mxu0 %v1502_v60  ;;  %5753 = vpow2.f32 %v4690_v1 }
 0x4af   :  { %1309 = vst.msk [vmem:[#allocation2 + $0xc8] sm:$0xff] %vm230_vm2, %v1272_v63  ;;  %v5734_v16 = vpop.eup %5733  ;;  %v1900_v17 = vmul.f32 %v5732_v14, %v5724_v13  ;;  %v1488_v18 = vpop.trf.xlu0  ;;  %5250 = vmatpush3.bf16.msra.mxu0 %v1502_v60 }
 0x4b0   :  { %v5736_v20 = vpop.eup %5735  ;;  %v1898_v22 = vmul.f32 %v5734_v16, %v5726_v53  ;;  %v5215_v43 = vpop.f32.mrb[60].mxu0 }
 0x4b1   :  { %v5738_v23 = vpop.eup %5737  ;;  %v1901_v24 = vmul.f32 %v5736_v20, %v5728_v40  ;;  %v1293_v25 = vadd.f32 %v5215_v43, %v7133_v36  ;;  %v1284_v29 = vpop.f32.mrb[61].mxu0 }
 0x4b2   :  { %v5740_v28 = vpop.eup %5739  ;;  %v1899_v34 = vmul.f32 %v5738_v23, %v5730_v0  ;;  %v1285_v38 = vadd.f32 %v1284_v29, %v7093_v42  ;;  %v5216_v45 = vpop.f32.mrb[62].mxu0 }
 0x4b3   :  { %v5742_v46 = vpop.eup %5741  ;;  %v1896_v48 = vmul.f32 0.0, %v5740_v28  ;;  %1314 = vst.msk [vmem:[#allocation2 + $0xf0] sm:$0xff] %vm230_vm2, %v1293_v25  ;;  %v1489_v49 = vpop.trf.xlu0  ;;  %v1296_v13 = vadd.f32 %v5216_v45, %v7131_v33 }
 0x4b4   :  { %v1287_v50 = vpop.f32.mrb[63].mxu0  ;;  %v5744_v51 = vpop.eup %5743  ;;  %v1894_v52 = vmul.f32 0.0, %v5742_v46  ;;  %1312 = vst.msk [vmem:[#allocation2 + $0xe0] sm:$0xff] %vm230_vm2, %v1285_v38  ;;  %v1503_v12 = vpack.c.bf16 %v1489_v49, %v1488_v18 }
 0x4b5   :  { %v1288_v53 = vadd.f32 %v1287_v50, %v7091_v39  ;;  %v5746_v54 = vpop.eup %5745  ;;  %v1897_v56 = vmul.f32 0.0, %v5744_v51  ;;  %v7184_v26 = vadd.f32 %v1900_v17, %v1896_v48  ;;  %1315 = vst.msk [vmem:[#allocation2 + $0xf8] sm:$0xff] %vm230_vm2, %v1296_v13 }
 0x4b6   :  { %v5748_v57 = vpop.eup %5747  ;;  %v1895_v40 = vmul.f32 0.0, %v5746_v54  ;;  %v7187_v58 = vadd.f32 %v1898_v22, %v1894_v52  ;;  %5251 = vmatprep.subr.bf16.mxu0 %v1503_v12 }
 0x4b7   :  { %1313 = vst.msk [vmem:[#allocation2 + $0xe8] sm:$0xff] %vm230_vm2, %v1288_v53  ;;  %v5750_v60 = vpop.eup %5749  ;;  %5755 = vtanh.f32 %v7184_v26  ;;  %v7191_v63 = vadd.f32 %v1901_v24, %v1897_v56  ;;  %v1884_v0 = vadd.f32 1.0, %v5748_v57  ;;  %v1490_v1 = vpop.trf.xlu0  ;;  %5252 = vmatpush3.bf16.msra.mxu0 %v1503_v12 }
 0x4b8   :  { %v5752_v14 = vpop.eup %5751  ;;  %5757 = vtanh.f32 %v7187_v58  ;;  %v7194_v16 = vadd.f32 %v1899_v34, %v1895_v40  ;;  %v1882_v17 = vadd.f32 1.0, %v5750_v60 }
 0x4b9   :  { %v5754_v18 = vpop.eup %5753  ;;  %5759 = vtanh.f32 %v7191_v63  ;;  %v1885_v20 = vadd.f32 1.0, %v5752_v14 }
 0x4ba   :  { %5761 = vtanh.f32 %v7194_v16  ;;  %v1883_v22 = vadd.f32 1.0, %v5754_v18 }
 0x4bb   :  { %5763 = vrcp.f32 %v1884_v0  ;;  %v1491_v43 = vpop.trf.xlu0 }
 0x4bc   :  { %5765 = vrcp.f32 %v1882_v17  ;;  %v1504_v23 = vpack.c.bf16 %v1491_v43, %v1490_v1 }
 0x4bd   :  { %5767 = vrcp.f32 %v1885_v20 }
 0x4be   :  { %5769 = vrcp.f32 %v1883_v22  ;;  %5253 = vmatprep.subr.bf16.mxu0 %v1504_v23 }
 0x4bf   :  { %v1492_v24 = vpop.trf.xlu0  ;;  %5254 = vmatpush3.bf16.msra.mxu0 %v1504_v23  ;;  %v6219_v23 = vld [vmem:[%s7905_s5 + $0x8] sm:$0xff]  }
 0x4c1   :  { %v5756_v25 = vpop.eup %5755 }
 0x4c2   :  { %v5758_v29 = vpop.eup %5757 }
 0x4c3   :  { %v5760_v28 = vpop.eup %5759  ;;  %v1493_v34 = vpop.trf.xlu0 }
 0x4c4   :  { %v5762_v38 = vpop.eup %5761  ;;  %v1505_v45 = vpack.c.bf16 %v1493_v34, %v1492_v24  ;;  %v6220_v24 = vld [vmem:[%s7905_s5 + $0x10] sm:$0xff]  }
 0x4c5   :  { %v5764_v46 = vpop.eup %5763 }
 0x4c6   :  { %v5766_v48 = vpop.eup %5765  ;;  %5255 = vmatprep.subr.bf16.mxu0 %v1505_v45  ;;  %v1912_v51 = vmul.f32 %v5764_v46, %v5756_v25 }
 0x4c7   :  { %v5768_v49 = vpop.eup %5767  ;;  %v1494_v13 = vpop.trf.xlu0  ;;  %5256 = vmatpush3.bf16.msra.mxu0 %v1505_v45  ;;  %v1910_v12 = vmul.f32 %v5766_v48, %v5758_v29  ;;  %v1920_v48 = vld [vmem:[#allocation2 + $0x90] sm:$0xff] }
 0x4c8   :  { %v5770_v50 = vpop.eup %5769  ;;  %v1913_v52 = vmul.f32 %v5768_v49, %v5760_v28 }
 0x4c9   :  { %v1911_v53 = vmul.f32 %v5770_v50, %v5762_v38 }
 0x4ca   :  { %v1915_v54 = vpack.c.bf16 %v1913_v52, %v1912_v51  ;;  %v1921_v51 = vld [vmem:[#allocation2 + $0x98] sm:$0xff] }
 0x4cb   :  { %v1495_v56 = vpop.trf.xlu0  ;;  %v1914_v57 = vpack.c.bf16 %v1911_v53, %v1910_v12 }
 0x4cc   :  { %v1506_v40 = vpack.c.bf16 %v1495_v56, %v1494_v13  ;;  %1917 = vst.msk [vmem:[#allocation3 + $0x8] sm:$0xff] %vm230_vm2, %v1915_v54  ;;  %v1918_v13 = vld [vmem:[#allocation2 + $0x80] sm:$0xff] }
 0x4cd   :  { %1916 = vst.msk [vmem:[#allocation3] sm:$0xff] %vm230_vm2, %v1914_v57 }
 0x4ce   :  { %5257 = vmatprep.subr.bf16.mxu0 %v1506_v40 }
 0x4cf   :  { %v1496_v60 = vpop.trf.xlu0  ;;  %5258 = vmatpush3.bf16.msra.mxu0 %v1506_v40 }
 0x4d3   :  { %v1497_v0 = vpop.trf.xlu0 }
 0x4d4   :  { %v1507_v1 = vpack.c.bf16 %v1497_v0, %v1496_v60  ;;  %v1924_v60 = vld [vmem:[#allocation2 + $0xb0] sm:$0xff] }
 0x4d6   :  { %5259 = vmatprep.subr.bf16.mxu0 %v1507_v1 }
 0x4d7   :  { %v1498_v14 = vpop.trf.xlu0  ;;  %5260 = vmatpush3.bf16.msra.mxu0 %v1507_v1 }
 0x4db   :  { %v1499_v17 = vpop.trf.xlu0 }
 0x4dc   :  { %v1508_v18 = vpack.c.bf16 %v1499_v17, %v1498_v14  ;;  %v1922_v14 = vld [vmem:[#allocation2 + $0xa0] sm:$0xff] }
 0x4de   :  { %5261 = vmatprep.subr.bf16.mxu0 %v1508_v18 }
 0x4df   :  { %v1500_v20 = vpop.trf.xlu0  ;;  %5262 = vmatpush3.bf16.msra.mxu0 %v1508_v18 }
 0x4e3   :  { %v1501_v22 = vpop.trf.xlu0 }
 0x4e4   :  { %v1509_v43 = vpack.c.bf16 %v1501_v22, %v1500_v20  ;;  %v1925_v20 = vld [vmem:[#allocation2 + $0xb8] sm:$0xff] }
 0x4e6   :  { %5263 = vmatprep.subr.bf16.mxu0 %v1509_v43 }
 0x4e7   :  { %5264 = vmatpush3.bf16.msra.mxu0 %v1509_v43 }
 0x4e8   :  { %5299 = vmatprep.subr.bf16.mxu0 %v1914_v57 }
 0x4ea   :  { %5266 = vmatmul.mubr.bf16.vlgmr.msra.gmra.mrb[64].mxu0 %v6219_v23 }
 0x4eb   :  { %5300 = vmatpush3.bf16.msra.mxu0 %v1914_v57  ;;  %5269 = vmatprep.mubr.bf16.mxu0 %v6220_v24  ;;  %v1923_v24 = vld [vmem:[#allocation2 + $0xa8] sm:$0xff] }
 0x4ec   :  { %5301 = vmatprep.subr.bf16.mxu0 %v1915_v54 }
 0x4ef   :  { %5302 = vmatpush3.bf16.msra.mxu0 %v1915_v54 }
 0x4f2   :  { %5270 = vmatmul.mubr.bf16.gmra.mrb[68].mxu0 %v6874_v59 }
 0x4f3   :  { %5273 = vmatprep.mubr.bf16.mxu0 %v6882_v44 }
 0x4fa   :  { %5274 = vmatmul.mubr.bf16.gmra.mrb[72].mxu0 %v6894_v47 }
 0x4fb   :  { %5277 = vmatprep.mubr.bf16.mxu0 %v6902_v5 }
 0x502   :  { %5278 = vmatmul.mubr.bf16.gmra.mrb[76].mxu0 %v6918_v11 }
 0x503   :  { %5303 = vmatprep.mubr.msk.bf16.mxu0 %vm1680_vm6, %v6926_v15 }
 0x50a   :  { %5304 = vmatmul.mubr.msk.bf16.vlgmr.msra.gmra.mrb[80].mxu0 %vm1680_vm6, %v6939_v19 }
 0x50b   :  { %5307 = vmatprep.mubr.msk.bf16.mxu0 %vm1680_vm6, %v6947_v21 }
 0x512   :  { %5308 = vmatmul.mubr.msk.bf16.gmra.mrb[84].mxu0 %vm1680_vm6, %v6959_v27 }
 0x513   :  { %5311 = vmatprep.mubr.msk.bf16.mxu0 %vm1680_vm6, %v6967_v30 }
 0x51a   :  { %5312 = vmatmul.mubr.msk.bf16.gmra.mrb[88].mxu0 %vm1680_vm6, %v6981_v32 }
 0x51b   :  { %5315 = vmatprep.mubr.msk.bf16.mxu0 %vm1680_vm6, %v6989_v35 }
 0x522   :  { %5316 = vmatmul.mubr.msk.bf16.gmra.mrb[92].mxu0 %vm1680_vm6, %v7003_v37 }
 0x523   :  { %5343 = vmatprep.mubr.msk.bf16.mxu0 %vm1680_vm6, %v6926_v15 }
 0x5bd   :  { %v5267_v59 = vpop.f32.mrb[64].mxu0 }
 0x5be   :  { %v1553_v44 = vadd.f32 %v5267_v59, %v7065_v9  ;;  %v1544_v47 = vpop.f32.mrb[65].mxu0 }
 0x5bf   :  { %v1545_v5 = vadd.f32 %v1544_v47, %v7057_v3  ;;  %v5268_v11 = vpop.f32.mrb[66].mxu0 }
 0x5c0   :  { %1610 = vst.msk [vmem:[#allocation2 + $0x190] sm:$0xff] %vm230_vm2, %v1553_v44  ;;  %v1556_v19 = vadd.f32 %v5268_v11, %v7063_v8  ;;  %v1547_v21 = vpop.f32.mrb[67].mxu0 }
 0x5c1   :  { %1608 = vst.msk [vmem:[#allocation2 + $0x180] sm:$0xff] %vm230_vm2, %v1545_v5  ;;  %v1548_v27 = vadd.f32 %v1547_v21, %v7055_v4 }
 0x5c2   :  { %1611 = vst.msk [vmem:[#allocation2 + $0x198] sm:$0xff] %vm230_vm2, %v1556_v19 }
 0x5c3   :  { %1609 = vst.msk [vmem:[#allocation2 + $0x188] sm:$0xff] %vm230_vm2, %v1548_v27 }
 0x5c5   :  { %v5271_v15 = vpop.f32.mrb[68].mxu0 }
 0x5c6   :  { %v1569_v30 = vadd.f32 %v5271_v15, %v7069_v10  ;;  %v1560_v32 = vpop.f32.mrb[69].mxu0 }
 0x5c7   :  { %v1561_v35 = vadd.f32 %v1560_v32, %v7061_v7  ;;  %v5272_v37 = vpop.f32.mrb[70].mxu0 }
 0x5c8   :  { %1614 = vst.msk [vmem:[#allocation2 + $0x1b0] sm:$0xff] %vm230_vm2, %v1569_v30  ;;  %v1572_v3 = vadd.f32 %v5272_v37, %v7067_v2  ;;  %v1563_v8 = vpop.f32.mrb[71].mxu0 }
 0x5c9   :  { %1612 = vst.msk [vmem:[#allocation2 + $0x1a0] sm:$0xff] %vm230_vm2, %v1561_v35  ;;  %v1564_v4 = vadd.f32 %v1563_v8, %v7059_v6  ;;  %v1928_v35 = vld [vmem:[#allocation2 + $0xd0] sm:$0xff] }
 0x5ca   :  { %1615 = vst.msk [vmem:[#allocation2 + $0x1b8] sm:$0xff] %vm230_vm2, %v1572_v3 }
 0x5cb   :  { %1613 = vst.msk [vmem:[#allocation2 + $0x1a8] sm:$0xff] %vm230_vm2, %v1564_v4 }
 0x5cd   :  { %v5275_v9 = vpop.f32.mrb[72].mxu0 }
 0x5ce   :  { %v1585_v10 = vadd.f32 %v5275_v9, %v7113_v62  ;;  %v1576_v25 = vpop.f32.mrb[73].mxu0  ;;  %v1926_v9 = vld [vmem:[#allocation2 + $0xc0] sm:$0xff] }
 0x5cf   :  { %v1577_v7 = vadd.f32 %v1576_v25, %v7073_v31  ;;  %v5276_v29 = vpop.f32.mrb[74].mxu0 }
 0x5d0   :  { %1618 = vst.msk [vmem:[#allocation2 + $0x1d0] sm:$0xff] %vm230_vm2, %v1585_v10  ;;  %v1588_v2 = vadd.f32 %v5276_v29, %v7111_v61  ;;  %v1579_v28 = vpop.f32.mrb[75].mxu0  ;;  %v1929_v29 = vld [vmem:[#allocation2 + $0xd8] sm:$0xff] }
 0x5d1   :  { %1616 = vst.msk [vmem:[#allocation2 + $0x1c0] sm:$0xff] %vm230_vm2, %v1577_v7  ;;  %v1580_v6 = vadd.f32 %v1579_v28, %v7071_v55 }
 0x5d2   :  { %1619 = vst.msk [vmem:[#allocation2 + $0x1d8] sm:$0xff] %vm230_vm2, %v1588_v2 }
 0x5d3   :  { %1617 = vst.msk [vmem:[#allocation2 + $0x1c8] sm:$0xff] %vm230_vm2, %v1580_v6  ;;  %v1927_v6 = vld [vmem:[#allocation2 + $0xc8] sm:$0xff] }
 0x5d5   :  { %v5279_v34 = vpop.f32.mrb[76].mxu0 }
 0x5d6   :  { %v1601_v62 = vadd.f32 %v5279_v34, %v7133_v36  ;;  %v1592_v38 = vpop.f32.mrb[77].mxu0 }
 0x5d7   :  { %v1593_v31 = vadd.f32 %v1592_v38, %v7093_v42  ;;  %v5280_v45 = vpop.f32.mrb[78].mxu0 }
 0x5d8   :  { %1622 = vst.msk [vmem:[#allocation2 + $0x1f0] sm:$0xff] %vm230_vm2, %v1601_v62  ;;  %v1604_v61 = vadd.f32 %v5280_v45, %v7131_v33  ;;  %v1595_v46 = vpop.f32.mrb[79].mxu0  ;;  %v1919_v33 = vld [vmem:[#allocation2 + $0x88] sm:$0xff]  ;;  %v1932_v45 = vld [vmem:[#allocation2 + $0xf0] sm:$0xff] }
 0x5d9   :  { %1620 = vst.msk [vmem:[#allocation2 + $0x1e0] sm:$0xff] %vm230_vm2, %v1593_v31  ;;  %v1596_v55 = vadd.f32 %v1595_v46, %v7091_v39 }
 0x5da   :  { %1623 = vst.msk [vmem:[#allocation2 + $0x1f8] sm:$0xff] %vm230_vm2, %v1604_v61 }
 0x5db   :  { %1621 = vst.msk [vmem:[#allocation2 + $0x1e8] sm:$0xff] %vm230_vm2, %v1596_v55 }
 0x5dd   :  { %v5305_v49 = vpop.f32.mrb[80].mxu0 }
 0x5de   :  { %v2033_v36 = vadd.f32 %v5305_v49, %v1920_v48  ;;  %v1968_v50 = vpop.f32.mrb[81].mxu0  ;;  %v1930_v49 = vld [vmem:[#allocation2 + $0xe0] sm:$0xff] }
 0x5df   :  { %v2031_v42 = vadd.f32 %v1968_v50, %v1918_v13  ;;  %v5306_v52 = vpop.f32.mrb[82].mxu0 }
 0x5e0   :  { %v4703_v12 = vmul.f32 -1.442695, %v2033_v36  ;;  %v2034_v53 = vadd.f32 %v5306_v52, %v1921_v51  ;;  %v1971_v54 = vpop.f32.mrb[83].mxu0  ;;  %v1933_v51 = vld [vmem:[#allocation2 + $0xf8] sm:$0xff] }
 0x5e1   :  { %v4701_v56 = vmul.f32 -1.442695, %v2031_v42  ;;  %v2032_v57 = vadd.f32 %v1971_v54, %v1919_v33  ;;  %v1931_v54 = vld [vmem:[#allocation2 + $0xe8] sm:$0xff] }
 0x5e2   :  { %5771 = vpow2.f32 %v4703_v12  ;;  %v4704_v39 = vmul.f32 -1.442695, %v2034_v53 }
 0x5e3   :  { %5773 = vpow2.f32 %v4701_v56  ;;  %v4702_v40 = vmul.f32 -1.442695, %v2032_v57 }
 0x5e4   :  { %5775 = vpow2.f32 %v4704_v39 }
 0x5e5   :  { %5777 = vpow2.f32 %v4702_v40  ;;  %v5309_v0 = vpop.f32.mrb[84].mxu0 }
 0x5e6   :  { %v2037_v1 = vadd.f32 %v5309_v0, %v1924_v60  ;;  %v1984_v17 = vpop.f32.mrb[85].mxu0 }
 0x5e7   :  { %v2035_v18 = vadd.f32 %v1984_v17, %v1922_v14  ;;  %v5310_v22 = vpop.f32.mrb[86].mxu0 }
 0x5e8   :  { %v4707_v43 = vmul.f32 -1.442695, %v2037_v1  ;;  %v2038_v23 = vadd.f32 %v5310_v22, %v1925_v20  ;;  %v1987_v59 = vpop.f32.mrb[87].mxu0 }
 0x5e9   :  { %v4705_v44 = vmul.f32 -1.442695, %v2035_v18  ;;  %v2036_v47 = vadd.f32 %v1987_v59, %v1923_v24 }
 0x5ea   :  { %5779 = vpow2.f32 %v4707_v43  ;;  %v4708_v5 = vmul.f32 -1.442695, %v2038_v23 }
 0x5eb   :  { %5781 = vpow2.f32 %v4705_v44  ;;  %v4706_v11 = vmul.f32 -1.442695, %v2036_v47 }
 0x5ec   :  { %v5772_v19 = vpop.eup %5771  ;;  %5783 = vpow2.f32 %v4708_v5 }
 0x5ed   :  { %v5774_v21 = vpop.eup %5773  ;;  %v2061_v27 = vadd.f32 1.0, %v5772_v19  ;;  %5785 = vpow2.f32 %v4706_v11  ;;  %v5313_v15 = vpop.f32.mrb[88].mxu0 }
 0x5ee   :  { %v5776_v30 = vpop.eup %5775  ;;  %v2059_v32 = vadd.f32 1.0, %v5774_v21  ;;  %v2000_v37 = vpop.f32.mrb[89].mxu0  ;;  %v2041_v4 = vadd.f32 %v5313_v15, %v1928_v35 }
 0x5ef   :  { %v5778_v3 = vpop.eup %5777  ;;  %5787 = vrcp.f32 %v2061_v27  ;;  %v2062_v8 = vadd.f32 1.0, %v5776_v30  ;;  %v5314_v10 = vpop.f32.mrb[90].mxu0  ;;  %v2039_v7 = vadd.f32 %v2000_v37, %v1926_v9 }
 0x5f0   :  { %5789 = vrcp.f32 %v2059_v32  ;;  %v2060_v25 = vadd.f32 1.0, %v5778_v3  ;;  %v2003_v2 = vpop.f32.mrb[91].mxu0  ;;  %v2042_v28 = vadd.f32 %v5314_v10, %v1929_v29 }
 0x5f1   :  { %5791 = vrcp.f32 %v2062_v8  ;;  %v2040_v34 = vadd.f32 %v2003_v2, %v1927_v6 }
 0x5f2   :  { %5793 = vrcp.f32 %v2060_v25 }
 0x5f3   :  { %5795 = vtanh.f32 %v2041_v4 }
 0x5f4   :  { %v5780_v62 = vpop.eup %5779  ;;  %5797 = vtanh.f32 %v2039_v7 }
 0x5f5   :  { %v5782_v38 = vpop.eup %5781  ;;  %v2085_v31 = vadd.f32 1.0, %v5780_v62  ;;  %5799 = vtanh.f32 %v2042_v28  ;;  %v5317_v61 = vpop.f32.mrb[92].mxu0 }
 0x5f6   :  { %v5784_v46 = vpop.eup %5783  ;;  %v2083_v55 = vadd.f32 1.0, %v5782_v38  ;;  %5801 = vtanh.f32 %v2040_v34  ;;  %v2045_v48 = vadd.f32 %v5317_v61, %v1932_v45  ;;  %v2016_v36 = vpop.f32.mrb[93].mxu0 }
 0x5f7   :  { %v5786_v13 = vpop.eup %5785  ;;  %5803 = vrcp.f32 %v2085_v31  ;;  %v2086_v50 = vadd.f32 1.0, %v5784_v46  ;;  %v2043_v42 = vadd.f32 %v2016_v36, %v1930_v49  ;;  %v5318_v52 = vpop.f32.mrb[94].mxu0  ;;  %v7282_v49 = vld [vmem:[%s7906_s6 + $0x8] sm:$0xff]  }
 0x5f8   :  { %5805 = vrcp.f32 %v2083_v55  ;;  %v2084_v12 = vadd.f32 1.0, %v5786_v13  ;;  %v4711_v53 = vmul.f32 -1.442695, %v2045_v48  ;;  %v2046_v33 = vadd.f32 %v5318_v52, %v1933_v51  ;;  %v2019_v56 = vpop.f32.mrb[95].mxu0  ;;  %v2656_v48 = vld [vmem:[#allocation3] sm:$0xff]  ;;  %v2657_v36 = vld [vmem:[#allocation3 + $0x8] sm:$0xff] }
 0x5f9   :  { %v5788_v57 = vpop.eup %5787  ;;  %5807 = vrcp.f32 %v2086_v50  ;;  %v4709_v39 = vmul.f32 -1.442695, %v2043_v42  ;;  %v2044_v40 = vadd.f32 %v2019_v56, %v1931_v54  ;;  %v7289_v13 = vld [vmem:[%s7906_s6 + $0x10] sm:$0xff]   ;;  %v7296_v50 = vld [vmem:[%s7906_s6 + $0x18] sm:$0xff]   ;;  %v7303_v42 = vld [vmem:[%s7906_s6 + $0x20] sm:$0xff]  }
 0x5fa   :  { %v5790_v60 = vpop.eup %5789  ;;  %5809 = vrcp.f32 %v2084_v12  ;;  %v4712_v0 = vmul.f32 -1.442695, %v2046_v33  ;;  %v7310_v51 = vld [vmem:[%s7906_s6 + $0x28] sm:$0xff]   ;;  %v7317_v52 = vld [vmem:[%s7906_s6 + $0x30] sm:$0xff]   ;;  %v7324_v12 = vld [vmem:[%s7908_s8] sm:$0xff]  }
 0x5fb   :  { %v5792_v1 = vpop.eup %5791  ;;  %5811 = vpow2.f32 %v4711_v53  ;;  %v4710_v14 = vmul.f32 -1.442695, %v2044_v40  ;;  %v7329_v53 = vld [vmem:[%s7906_s6 + $0x38] sm:$0xff]   ;;  %v7338_v33 = vld [vmem:[%s7908_s8 + $0x8] sm:$0xff]   ;;  %v7343_v54 = vld [vmem:[%s7908_s8 + $0x10] sm:$0xff]  }
 0x5fc   :  { %v5794_v17 = vpop.eup %5793  ;;  %5813 = vpow2.f32 %v4709_v39  ;;  %v7352_v56 = vld [vmem:[%s7908_s8 + $0x18] sm:$0xff]   ;;  %v7366_v39 = vld [vmem:[%s7908_s8 + $0x28] sm:$0xff]   ;;  %v7371_v40 = vld [vmem:[%s7908_s8 + $0x30] sm:$0xff]  }
 0x5fd   :  { %v5796_v18 = vpop.eup %5795  ;;  %5815 = vpow2.f32 %v4712_v0  ;;  %v7386_v0 = vpop.permute.xlu1 %2660 }
 0x5fe   :  { %v5798_v20 = vpop.eup %5797  ;;  %v2129_v22 = vmul.f32 %v5796_v18, %v5788_v57  ;;  %5817 = vpow2.f32 %v4710_v14  ;;  %v7357_v57 = vld [vmem:[%s7908_s8 + $0x20] sm:$0xff]  }
 0x5ff   :  { %v5800_v43 = vpop.eup %5799  ;;  %v2127_v23 = vmul.f32 %v5798_v20, %v5790_v60  ;;  %v7380_v60 = vld [vmem:[%s7908_s8 + $0x38] sm:$0xff]   ;;  %v2150_v20 = vld [vmem:[#allocation2 + $0x110] sm:$0xff] }
 0x600   :  { %v5802_v24 = vpop.eup %5801  ;;  %v2130_v59 = vmul.f32 %v5800_v43, %v5792_v1 }
 0x601   :  { %v5804_v44 = vpop.eup %5803  ;;  %v2128_v47 = vmul.f32 %v5802_v24, %v5794_v17  ;;  %v7388_v1 = vpop.permute.xlu1 %2665 }
 0x602   :  { %v5806_v5 = vpop.eup %5805  ;;  %v2125_v11 = vmul.f32 %v5804_v44, %v7184_v26  ;;  %v2151_v44 = vld [vmem:[#allocation2 + $0x118] sm:$0xff] }
 0x603   :  { %v5808_v19 = vpop.eup %5807  ;;  %v2123_v21 = vmul.f32 %v5806_v5, %v7187_v58 }
 0x604   :  { %v5810_v27 = vpop.eup %5809  ;;  %v2126_v15 = vmul.f32 %v5808_v19, %v7191_v63  ;;  %v7264_v30 = vadd.f32 %v2129_v22, %v2125_v11  ;;  %v2149_v19 = vld [vmem:[#allocation2 + $0x108] sm:$0xff] }
 0x605   :  { %v5812_v32 = vpop.eup %5811  ;;  %v2124_v35 = vmul.f32 %v5810_v27, %v7194_v16  ;;  %v7267_v37 = vadd.f32 %v2127_v23, %v2123_v21  ;;  %v7390_v14 = vpop.permute.xlu1 %2680  ;;  %v2148_v23 = vld [vmem:[#allocation2 + $0x100] sm:$0xff] }
 0x606   :  { %v5814_v3 = vpop.eup %5813  ;;  %5819 = vtanh.f32 %v7264_v30  ;;  %v7270_v8 = vadd.f32 %v2130_v59, %v2126_v15  ;;  %v2113_v4 = vadd.f32 1.0, %v5812_v32 }
 0x607   :  { %v5816_v26 = vpop.eup %5815  ;;  %5821 = vtanh.f32 %v7267_v37  ;;  %v7273_v58 = vadd.f32 %v2128_v47, %v2124_v35  ;;  %v2111_v9 = vadd.f32 1.0, %v5814_v3 }
 0x608   :  { %v5818_v63 = vpop.eup %5817  ;;  %5823 = vtanh.f32 %v7270_v8  ;;  %v2114_v10 = vadd.f32 1.0, %v5816_v26 }
 0x609   :  { %5825 = vtanh.f32 %v7273_v58  ;;  %v2112_v16 = vadd.f32 1.0, %v5818_v63  ;;  %v7392_v17 = vpop.permute.xlu1 %2685  ;;  %v2152_v63 = vld [vmem:[#allocation2 + $0x120] sm:$0xff] }
 0x60a   :  { %5827 = vrcp.f32 %v2113_v4  ;;  %v2154_v4 = vld [vmem:[#allocation2 + $0x130] sm:$0xff] }
 0x60b   :  { %5829 = vrcp.f32 %v2111_v9 }
 0x60c   :  { %5831 = vrcp.f32 %v2114_v10 }
 0x60d   :  { %5833 = vrcp.f32 %v2112_v16  ;;  %v7394_v18 = vpop.permute.xlu1 %2670 }
 0x610   :  { %v5820_v25 = vpop.eup %5819 }
 0x611   :  { %v5822_v7 = vpop.eup %5821  ;;  %v7396_v27 = vpop.permute.xlu1 %2675 }
 0x612   :  { %v5824_v29 = vpop.eup %5823 }
 0x613   :  { %v5826_v2 = vpop.eup %5825 }
 0x614   :  { %v5828_v28 = vpop.eup %5827 }
 0x615   :  { %v5830_v6 = vpop.eup %5829  ;;  %v2141_v38 = vmul.f32 %v5828_v28, %v5820_v25  ;;  %v7398_v16 = vpop.permute.xlu1 %2690 }
 0x616   :  { %v5832_v34 = vpop.eup %5831  ;;  %v2139_v45 = vmul.f32 %v5830_v6, %v5822_v7  ;;  %v2155_v7 = vld [vmem:[#allocation2 + $0x138] sm:$0xff]  ;;  %v2153_v6 = vld [vmem:[#allocation2 + $0x128] sm:$0xff] }
 0x617   :  { %v5834_v62 = vpop.eup %5833  ;;  %v2142_v31 = vmul.f32 %v5832_v34, %v5824_v29 }
 0x618   :  { %v2140_v61 = vmul.f32 %v5834_v62, %v5826_v2 }
 0x619   :  { %v2144_v46 = vpack.c.bf16 %v2142_v31, %v2141_v38 }
 0x61a   :  { %v2143_v55 = vpack.c.bf16 %v2140_v61, %v2139_v45 }
 0x61b   :  { %2147 = vst.msk [vmem:[#allocation3 + $0x18] sm:$0xff] %vm230_vm2, %v2144_v46 }
 0x61c   :  { %2146 = vst.msk [vmem:[#allocation3 + $0x10] sm:$0xff] %vm230_vm2, %v2143_v55  ;;  %5319 = vmatprep.subr.bf16.mxu1 %v2143_v55 }
 0x61d   :  { %5320 = vmatpush3.bf16.msra.mxu1 %v2143_v55  ;;  %v7400_v55 = vpop.permute.xlu1 %2695 }
 0x61e   :  { %5321 = vmatprep.subr.bf16.mxu1 %v2144_v46 }
 0x621   :  { %5322 = vmatpush3.bf16.msra.mxu1 %v2144_v46 }
 0x622   :  { %5359 = vmatprep.subr.bf16.mxu1 %v2656_v48 }
 0x624   :  { %5324 = vmatmul.mubr.msk.bf16.vlgmr.msra.gmra.mrb[64].mxu1 %vm1680_vm6, %v7282_v49 }
 0x625   :  { %5360 = vmatpush3.bf16.msra.mxu1 %v2656_v48  ;;  %5327 = vmatprep.mubr.msk.bf16.mxu1 %vm1680_vm6, %v7289_v13 }
 0x626   :  { %5361 = vmatprep.subr.bf16.mxu1 %v2657_v36 }
 0x629   :  { %5362 = vmatpush3.bf16.msra.mxu1 %v2657_v36 }
 0x62c   :  { %5328 = vmatmul.mubr.msk.bf16.gmra.mrb[68].mxu1 %vm1680_vm6, %v7296_v50 }
 0x62d   :  { %5331 = vmatprep.mubr.msk.bf16.mxu1 %vm1680_vm6, %v7303_v42 }
 0x634   :  { %5332 = vmatmul.mubr.msk.bf16.gmra.mrb[72].mxu1 %vm1680_vm6, %v7310_v51 }
 0x635   :  { %5335 = vmatprep.mubr.msk.bf16.mxu1 %vm1680_vm6, %v7317_v52 }
 0x63c   :  { %5336 = vmatmul.mubr.msk.bf16.gmra.mrb[76].mxu1 %vm1680_vm6, %v7329_v53 }
 0x63d   :  { %5363 = vmatprep.mubr.msk.bf16.mxu1 %vm1680_vm6, %v7324_v12 }
 0x644   :  { %5364 = vmatmul.mubr.msk.bf16.vlgmr.msra.gmra.mrb[80].mxu1 %vm1680_vm6, %v7338_v33 }
 0x645   :  { %5367 = vmatprep.mubr.msk.bf16.mxu1 %vm1680_vm6, %v7343_v54 }
 0x64c   :  { %5368 = vmatmul.mubr.msk.bf16.gmra.mrb[84].mxu1 %vm1680_vm6, %v7352_v56 }
 0x64d   :  { %5371 = vmatprep.mubr.msk.bf16.mxu1 %vm1680_vm6, %v7357_v57 }
 0x654   :  { %5372 = vmatmul.mubr.msk.bf16.gmra.mrb[88].mxu1 %vm1680_vm6, %v7366_v39 }
 0x655   :  { %5375 = vmatprep.mubr.msk.bf16.mxu1 %vm1680_vm6, %v7371_v40 }
 0x65c   :  { %5376 = vmatmul.mubr.msk.bf16.gmra.mrb[92].mxu1 %vm1680_vm6, %v7380_v60 }
 0x65d   :  { %5403 = vmatprep.mubr.msk.bf16.mxu1 %vm1680_vm6, %v7324_v12 }
 0x6f7   :  { %v5325_v22 = vpop.f32.mrb[64].mxu1 }
 0x6f8   :  { %v2263_v43 = vadd.f32 %v5325_v22, %v2150_v20  ;;  %v2198_v24 = vpop.f32.mrb[65].mxu1 }
 0x6f9   :  { %v2261_v59 = vadd.f32 %v2198_v24, %v2148_v23  ;;  %v5326_v47 = vpop.f32.mrb[66].mxu1 }
 0x6fa   :  { %v4723_v5 = vmul.f32 -1.442695, %v2263_v43  ;;  %v2264_v11 = vadd.f32 %v5326_v47, %v2151_v44  ;;  %v2201_v21 = vpop.f32.mrb[67].mxu1  ;;  %v2158_v43 = vld [vmem:[#allocation2 + $0x150] sm:$0xff]  ;;  %v2156_v47 = vld [vmem:[#allocation2 + $0x140] sm:$0xff] }
 0x6fb   :  { %v4721_v15 = vmul.f32 -1.442695, %v2261_v59  ;;  %v2262_v32 = vadd.f32 %v2201_v21, %v2149_v19  ;;  %v2159_v21 = vld [vmem:[#allocation2 + $0x158] sm:$0xff] }
 0x6fc   :  { %5835 = vpow2.f32 %v4723_v5  ;;  %v4724_v35 = vmul.f32 -1.442695, %v2264_v11 }
 0x6fd   :  { %5837 = vpow2.f32 %v4721_v15  ;;  %v4722_v3 = vmul.f32 -1.442695, %v2262_v32 }
 0x6fe   :  { %5839 = vpow2.f32 %v4724_v35  ;;  %v2157_v35 = vld [vmem:[#allocation2 + $0x148] sm:$0xff] }
 0x6ff   :  { %5841 = vpow2.f32 %v4722_v3  ;;  %v5329_v26 = vpop.f32.mrb[68].mxu1 }
 0x700   :  { %v2267_v9 = vadd.f32 %v5329_v26, %v2154_v4  ;;  %v2214_v10 = vpop.f32.mrb[69].mxu1  ;;  %v7402_v4 = vpop.permute.xlu1 %2700 }
 0x701   :  { %v2265_v25 = vadd.f32 %v2214_v10, %v2152_v63  ;;  %v5330_v29 = vpop.f32.mrb[70].mxu1  ;;  %v2162_v10 = vld [vmem:[#allocation2 + $0x170] sm:$0xff] }
 0x702   :  { %v4727_v2 = vmul.f32 -1.442695, %v2267_v9  ;;  %v2268_v28 = vadd.f32 %v5330_v29, %v2155_v7  ;;  %v2217_v34 = vpop.f32.mrb[71].mxu1 }
 0x703   :  { %v4725_v62 = vmul.f32 -1.442695, %v2265_v25  ;;  %v2266_v38 = vadd.f32 %v2217_v34, %v2153_v6 }
 0x704   :  { %5843 = vpow2.f32 %v4727_v2  ;;  %v4728_v31 = vmul.f32 -1.442695, %v2268_v28  ;;  %v2160_v28 = vld [vmem:[#allocation2 + $0x160] sm:$0xff] }
 0x705   :  { %5845 = vpow2.f32 %v4725_v62  ;;  %v4726_v45 = vmul.f32 -1.442695, %v2266_v38 }
 0x706   :  { %v5836_v61 = vpop.eup %5835  ;;  %5847 = vpow2.f32 %v4728_v31  ;;  %v2163_v31 = vld [vmem:[#allocation2 + $0x178] sm:$0xff] }
 0x707   :  { %v5838_v46 = vpop.eup %5837  ;;  %v2291_v48 = vadd.f32 1.0, %v5836_v61  ;;  %5849 = vpow2.f32 %v4726_v45  ;;  %v5333_v36 = vpop.f32.mrb[72].mxu1 }
 0x708   :  { %v5840_v20 = vpop.eup %5839  ;;  %v2289_v22 = vadd.f32 1.0, %v5838_v46  ;;  %v2230_v23 = vpop.f32.mrb[73].mxu1  ;;  %v2271_v44 = vadd.f32 %v5333_v36, %v2158_v43  ;;  %v2161_v36 = vld [vmem:[#allocation2 + $0x168] sm:$0xff] }
 0x709   :  { %v5842_v24 = vpop.eup %5841  ;;  %5851 = vrcp.f32 %v2291_v48  ;;  %v2292_v59 = vadd.f32 1.0, %v5840_v20  ;;  %v5334_v5 = vpop.f32.mrb[74].mxu1  ;;  %v2269_v19 = vadd.f32 %v2230_v23, %v2156_v47 }
 0x70a   :  { %5853 = vrcp.f32 %v2289_v22  ;;  %v2290_v11 = vadd.f32 1.0, %v5842_v24  ;;  %v2233_v15 = vpop.f32.mrb[75].mxu1  ;;  %v2272_v32 = vadd.f32 %v5334_v5, %v2159_v21  ;;  %v7404_v43 = vpop.permute.xlu1 %2720 }
 0x70b   :  { %5855 = vrcp.f32 %v2292_v59  ;;  %v2270_v3 = vadd.f32 %v2233_v15, %v2157_v35 }
 0x70c   :  { %5857 = vrcp.f32 %v2290_v11 }
 0x70d   :  { %5859 = vtanh.f32 %v2271_v44 }
 0x70e   :  { %v5844_v26 = vpop.eup %5843  ;;  %5861 = vtanh.f32 %v2269_v19 }
 0x70f   :  { %v5846_v9 = vpop.eup %5845  ;;  %v2315_v63 = vadd.f32 1.0, %v5844_v26  ;;  %5863 = vtanh.f32 %v2272_v32  ;;  %v5337_v25 = vpop.f32.mrb[76].mxu1 }
 0x710   :  { %v5848_v7 = vpop.eup %5847  ;;  %v2313_v29 = vadd.f32 1.0, %v5846_v9  ;;  %5865 = vtanh.f32 %v2270_v3  ;;  %v2275_v2 = vadd.f32 %v5337_v25, %v2162_v10  ;;  %v2246_v6 = vpop.f32.mrb[77].mxu1 }
 0x711   :  { %v5850_v34 = vpop.eup %5849  ;;  %5867 = vrcp.f32 %v2315_v63  ;;  %v2316_v62 = vadd.f32 1.0, %v5848_v7  ;;  %v2273_v38 = vadd.f32 %v2246_v6, %v2160_v28  ;;  %v5338_v45 = vpop.f32.mrb[78].mxu1 }
 0x712   :  { %5869 = vrcp.f32 %v2313_v29  ;;  %v2314_v61 = vadd.f32 1.0, %v5850_v34  ;;  %v4731_v46 = vmul.f32 -1.442695, %v2275_v2  ;;  %v2276_v48 = vadd.f32 %v5338_v45, %v2163_v31  ;;  %v2249_v20 = vpop.f32.mrb[79].mxu1  ;;  %v7407_v9 = vpop.permute.xlu1 %2725 }
 0x713   :  { %v5852_v22 = vpop.eup %5851  ;;  %5871 = vrcp.f32 %v2316_v62  ;;  %v4729_v23 = vmul.f32 -1.442695, %v2273_v38  ;;  %v2274_v24 = vadd.f32 %v2249_v20, %v2161_v36 }
 0x714   :  { %v5854_v59 = vpop.eup %5853  ;;  %5873 = vrcp.f32 %v2314_v61  ;;  %v4732_v44 = vmul.f32 -1.442695, %v2276_v48 }
 0x715   :  { %v5856_v47 = vpop.eup %5855  ;;  %5875 = vpow2.f32 %v4731_v46  ;;  %v4730_v5 = vmul.f32 -1.442695, %v2274_v24 }
 0x716   :  { %v5858_v11 = vpop.eup %5857  ;;  %5877 = vpow2.f32 %v4729_v23 }
 0x717   :  { %v5860_v19 = vpop.eup %5859  ;;  %5879 = vpow2.f32 %v4732_v44  ;;  %v5365_v21 = vpop.f32.mrb[80].mxu1 }
 0x718   :  { %v5862_v15 = vpop.eup %5861  ;;  %v2359_v32 = vmul.f32 %v5860_v19, %v5852_v22  ;;  %5881 = vpow2.f32 %v4730_v5  ;;  %v2845_v35 = vadd.f32 %v5365_v21, %v7394_v18  ;;  %v2836_v3 = vpop.f32.mrb[81].mxu1 }
 0x719   :  { %v5864_v26 = vpop.eup %5863  ;;  %v2357_v63 = vmul.f32 %v5862_v15, %v5854_v59  ;;  %v2837_v10 = vadd.f32 %v2836_v3, %v7386_v0  ;;  %v5366_v25 = vpop.f32.mrb[82].mxu1 }
 0x71a   :  { %v5866_v7 = vpop.eup %5865  ;;  %v2360_v29 = vmul.f32 %v5864_v26, %v5856_v47  ;;  %2901 = vst.msk [vmem:[#allocation2 + $0x10] sm:$0xff] %vm230_vm2, %v2845_v35  ;;  %v2848_v2 = vadd.f32 %v5366_v25, %v7396_v27  ;;  %v2839_v28 = vpop.f32.mrb[83].mxu1 }
 0x71b   :  { %v5868_v6 = vpop.eup %5867  ;;  %v2358_v34 = vmul.f32 %v5866_v7, %v5858_v11  ;;  %2899 = vst.msk [vmem:[#allocation2] sm:$0xff] %vm230_vm2, %v2837_v10  ;;  %v2840_v62 = vadd.f32 %v2839_v28, %v7388_v1  ;;  %v7421_v22 = vpop.permute.xlu1 %2710 }
 0x71c   :  { %v5870_v38 = vpop.eup %5869  ;;  %v2355_v31 = vmul.f32 %v5868_v6, %v7264_v30  ;;  %2902 = vst.msk [vmem:[#allocation2 + $0x18] sm:$0xff] %vm230_vm2, %v2848_v2 }
 0x71d   :  { %v5872_v45 = vpop.eup %5871  ;;  %v2353_v61 = vmul.f32 %v5870_v38, %v7267_v37  ;;  %2900 = vst.msk [vmem:[#allocation2 + $0x8] sm:$0xff] %vm230_vm2, %v2840_v62 }
 0x71e   :  { %v5874_v46 = vpop.eup %5873  ;;  %v2356_v48 = vmul.f32 %v5872_v45, %v7270_v8  ;;  %v7419_v36 = vadd.f32 %v2359_v32, %v2355_v31 }
 0x71f   :  { %v5876_v20 = vpop.eup %5875  ;;  %v2354_v23 = vmul.f32 %v5874_v46, %v7273_v58  ;;  %v7424_v24 = vadd.f32 %v2357_v63, %v2353_v61  ;;  %v5369_v30 = vpop.f32.mrb[84].mxu1 }
 0x720   :  { %v5878_v59 = vpop.eup %5877  ;;  %5883 = vtanh.f32 %v7419_v36  ;;  %v7427_v44 = vadd.f32 %v2360_v29, %v2356_v48  ;;  %v2343_v37 = vadd.f32 1.0, %v5876_v20  ;;  %v2861_v47 = vadd.f32 %v5369_v30, %v7398_v16  ;;  %v2852_v5 = vpop.f32.mrb[85].mxu1 }
 0x721   :  { %v5880_v8 = vpop.eup %5879  ;;  %5885 = vtanh.f32 %v7424_v24  ;;  %v7431_v11 = vadd.f32 %v2358_v34, %v2354_v23  ;;  %v2341_v19 = vadd.f32 1.0, %v5878_v59  ;;  %v2853_v58 = vadd.f32 %v2852_v5, %v7390_v14  ;;  %v5370_v21 = vpop.f32.mrb[86].mxu1 }
 0x722   :  { %v5882_v15 = vpop.eup %5881  ;;  %5887 = vtanh.f32 %v7427_v44  ;;  %v2344_v32 = vadd.f32 1.0, %v5880_v8  ;;  %2905 = vst.msk [vmem:[#allocation2 + $0x30] sm:$0xff] %vm230_vm2, %v2861_v47  ;;  %v2864_v35 = vadd.f32 %v5370_v21, %v7400_v55  ;;  %v2855_v3 = vpop.f32.mrb[87].mxu1 }
 0x723   :  { %5889 = vtanh.f32 %v7431_v11  ;;  %v2342_v26 = vadd.f32 1.0, %v5882_v15  ;;  %2903 = vst.msk [vmem:[#allocation2 + $0x20] sm:$0xff] %vm230_vm2, %v2853_v58  ;;  %v2856_v63 = vadd.f32 %v2855_v3, %v7392_v17  ;;  %v7441_v10 = vpop.permute.xlu1 %2715  ;;  %v7446_v34 = vpop.permute.xlu0 %2705 }
 0x724   :  { %5891 = vrcp.f32 %v2343_v37  ;;  %2906 = vst.msk [vmem:[#allocation2 + $0x38] sm:$0xff] %vm230_vm2, %v2864_v35 }
 0x725   :  { %5893 = vrcp.f32 %v2341_v19  ;;  %2904 = vst.msk [vmem:[#allocation2 + $0x28] sm:$0xff] %vm230_vm2, %v2856_v63 }
 0x726   :  { %5895 = vrcp.f32 %v2344_v32 }
 0x727   :  { %5897 = vrcp.f32 %v2342_v26  ;;  %v5373_v25 = vpop.f32.mrb[88].mxu1  ;;  %v7450_v45 = vpop.permute.xlu1 %2730 }
 0x728   :  { %v2877_v7 = vadd.f32 %v5373_v25, %v7421_v22  ;;  %v2868_v29 = vpop.f32.mrb[89].mxu1 }
 0x729   :  { %v2869_v2 = vadd.f32 %v2868_v29, %v7402_v4  ;;  %v5374_v28 = vpop.f32.mrb[90].mxu1  ;;  %v2915_v29 = vld [vmem:[#allocation3 + $0x10] sm:$0xff] }
 0x72a   :  { %v5884_v6 = vpop.eup %5883  ;;  %2909 = vst.msk [vmem:[#allocation2 + $0x50] sm:$0xff] %vm230_vm2, %v2877_v7  ;;  %v2880_v62 = vadd.f32 %v5374_v28, %v7441_v10  ;;  %v2871_v38 = vpop.f32.mrb[91].mxu1  ;;  %v2916_v28 = vld [vmem:[#allocation3 + $0x18] sm:$0xff] }
 0x72b   :  { %v5886_v31 = vpop.eup %5885  ;;  %2907 = vst.msk [vmem:[#allocation2 + $0x40] sm:$0xff] %vm230_vm2, %v2869_v2  ;;  %v2872_v61 = vadd.f32 %v2871_v38, %v7446_v34  ;;  %v7457_v8 = vpop.permute.xlu1 %2735 }
 0x72c   :  { %v5888_v46 = vpop.eup %5887  ;;  %2910 = vst.msk [vmem:[#allocation2 + $0x58] sm:$0xff] %vm230_vm2, %v2880_v62 }
 0x72d   :  { %v5890_v48 = vpop.eup %5889  ;;  %2908 = vst.msk [vmem:[#allocation2 + $0x48] sm:$0xff] %vm230_vm2, %v2872_v61 }
 0x72e   :  { %v5892_v20 = vpop.eup %5891 }
 0x72f   :  { %v5894_v23 = vpop.eup %5893  ;;  %v5377_v30 = vpop.f32.mrb[92].mxu1  ;;  %v2371_v21 = vmul.f32 %v5892_v20, %v5884_v6 }
 0x730   :  { %v5896_v59 = vpop.eup %5895  ;;  %v2893_v37 = vadd.f32 %v5377_v30, %v7450_v45  ;;  %v2884_v47 = vpop.f32.mrb[93].mxu1  ;;  %v2369_v3 = vmul.f32 %v5894_v23, %v5886_v31  ;;  %v2379_v31 = vld [vmem:[#allocation2 + $0x188] sm:$0xff]  ;;  %v2384_v30 = vld [vmem:[#allocation2 + $0x1b0] sm:$0xff] }
 0x731   :  { %v5898_v5 = vpop.eup %5897  ;;  %v2885_v19 = vadd.f32 %v2884_v47, %v7404_v43  ;;  %v5378_v58 = vpop.f32.mrb[94].mxu1  ;;  %v2372_v15 = vmul.f32 %v5896_v59, %v5888_v46 }
 0x732   :  { %2913 = vst.msk [vmem:[#allocation2 + $0x70] sm:$0xff] %vm230_vm2, %v2893_v37  ;;  %v2896_v32 = vadd.f32 %v5378_v58, %v7457_v8  ;;  %v2887_v35 = vpop.f32.mrb[95].mxu1  ;;  %v2370_v26 = vmul.f32 %v5898_v5, %v5890_v48 }
 0x733   :  { %2911 = vst.msk [vmem:[#allocation2 + $0x60] sm:$0xff] %vm230_vm2, %v2885_v19  ;;  %v2888_v63 = vadd.f32 %v2887_v35, %v7407_v9  ;;  %v2374_v25 = vpack.c.bf16 %v2372_v15, %v2371_v21  ;;  %v2382_v19 = vld [vmem:[#allocation2 + $0x1a0] sm:$0xff]  ;;  %v2385_v35 = vld [vmem:[#allocation2 + $0x1b8] sm:$0xff] }
 0x734   :  { %2914 = vst.msk [vmem:[#allocation2 + $0x78] sm:$0xff] %vm230_vm2, %v2896_v32  ;;  %v2373_v7 = vpack.c.bf16 %v2370_v26, %v2369_v3 }
 0x735   :  { %2912 = vst.msk [vmem:[#allocation2 + $0x68] sm:$0xff] %vm230_vm2, %v2888_v63  ;;  %2377 = vst.msk [vmem:[#allocation3 + $0x28] sm:$0xff] %vm230_vm2, %v2374_v25 }
 0x736   :  { %2376 = vst.msk [vmem:[#allocation3 + $0x20] sm:$0xff] %vm230_vm2, %v2373_v7  ;;  %5339 = vmatprep.subr.bf16.mxu0 %v2373_v7 }
 0x737   :  { %5340 = vmatpush3.bf16.msra.mxu0 %v2373_v7 }
 0x738   :  { %5341 = vmatprep.subr.bf16.mxu0 %v2374_v25 }
 0x73b   :  { %5342 = vmatpush3.bf16.msra.mxu0 %v2374_v25 }
 0x73c   :  { %5379 = vmatprep.subr.bf16.mxu0 %v2915_v29  ;;  %v3031_v6 = vld [vmem:[#allocation3 + $0x28] sm:$0xff] }
 0x73d   :  { %v3030_v2 = vld [vmem:[#allocation3 + $0x20] sm:$0xff] }
 0x73e   :  { %5344 = vmatmul.mubr.msk.bf16.vlgmr.msra.gmra.mrb[96].mxu0 %vm1680_vm6, %v7282_v49  ;;  %5399 = vmatprep.subr.bf16.mxu1 %v3030_v2  ;;  %v7514_v49 = vld [vmem:[%s7909_s9 + $0x8] sm:$0xff]  }
 0x73f   :  { %5380 = vmatpush3.bf16.msra.mxu0 %v2915_v29  ;;  %5400 = vmatpush3.bf16.msra.mxu1 %v3030_v2  ;;  %v2383_v29 = vld [vmem:[#allocation2 + $0x1a8] sm:$0xff] }
 0x740   :  { %5381 = vmatprep.subr.bf16.mxu0 %v2916_v28  ;;  %5401 = vmatprep.subr.bf16.mxu1 %v3031_v6 }
 0x741   :  { %5347 = vmatprep.mubr.msk.bf16.mxu0 %vm1680_vm6, %v7289_v13  ;;  %v7519_v13 = vld [vmem:[%s7909_s9 + $0x10] sm:$0xff]  }
 0x743   :  { %5382 = vmatpush3.bf16.msra.mxu0 %v2916_v28  ;;  %5402 = vmatpush3.bf16.msra.mxu1 %v3031_v6 }
 0x744   :  { %5439 = vmatprep.subr.bf16.mxu1 %v6268_v41 }
 0x746   :  { %5348 = vmatmul.mubr.msk.bf16.gmra.mrb[100].mxu0 %vm1680_vm6, %v7296_v50  ;;  %5404 = vmatmul.mubr.msk.bf16.vlgmr.msra.gmra.mrb[96].mxu1 %vm1680_vm6, %v7338_v33  ;;  %v7532_v50 = vld [vmem:[%s7909_s9 + $0x18] sm:$0xff]  }
 0x747   :  { %5351 = vmatprep.mubr.msk.bf16.mxu0 %vm1680_vm6, %v7303_v42  ;;  %5407 = vmatprep.mubr.msk.bf16.mxu1 %vm1680_vm6, %v7343_v54  ;;  %v7537_v42 = vld [vmem:[%s7909_s9 + $0x20] sm:$0xff]  }
 0x748   :  { %5440 = vmatpush3.bf16.msra.mxu1 %v6268_v41  ;;  %v7501_v41 = vld [vmem:[%s7909_s9] sm:$0xff]  }
 0x74e   :  { %5352 = vmatmul.mubr.msk.bf16.gmra.mrb[104].mxu0 %vm1680_vm6, %v7310_v51  ;;  %5408 = vmatmul.mubr.msk.bf16.gmra.mrb[100].mxu1 %vm1680_vm6, %v7352_v56  ;;  %v7550_v51 = vld [vmem:[%s7909_s9 + $0x28] sm:$0xff]  }
 0x74f   :  { %5355 = vmatprep.mubr.msk.bf16.mxu0 %vm1680_vm6, %v7317_v52  ;;  %5411 = vmatprep.mubr.msk.bf16.mxu1 %vm1680_vm6, %v7357_v57  ;;  %v7555_v52 = vld [vmem:[%s7909_s9 + $0x30] sm:$0xff]  }
 0x756   :  { %5356 = vmatmul.mubr.msk.bf16.gmra.mrb[108].mxu0 %vm1680_vm6, %v7329_v53  ;;  %5412 = vmatmul.mubr.msk.bf16.gmra.mrb[104].mxu1 %vm1680_vm6, %v7366_v39  ;;  %v7568_v53 = vld [vmem:[%s7909_s9 + $0x38] sm:$0xff]  }
 0x757   :  { %5383 = vmatprep.mubr.msk.bf16.mxu0 %vm1680_vm6, %v7324_v12  ;;  %5415 = vmatprep.mubr.msk.bf16.mxu1 %vm1680_vm6, %v7371_v40 }
 0x75e   :  { %5384 = vmatmul.mubr.msk.bf16.vlgmr.msra.gmra.mrb[112].mxu0 %vm1680_vm6, %v7338_v33  ;;  %5416 = vmatmul.mubr.msk.bf16.gmra.mrb[108].mxu1 %vm1680_vm6, %v7380_v60  ;;  %v2380_v33 = vld [vmem:[#allocation2 + $0x190] sm:$0xff] }
 0x75f   :  { %5387 = vmatprep.mubr.msk.bf16.mxu0 %vm1680_vm6, %v7343_v54  ;;  %5441 = vmatprep.mubr.msk.bf16.mxu1 %vm1680_vm6, %v7501_v41 }
 0x766   :  { %5388 = vmatmul.mubr.msk.bf16.gmra.mrb[116].mxu0 %vm1680_vm6, %v7352_v56  ;;  %5442 = vmatmul.mubr.msk.bf16.vlgmr.msra.gmra.mrb[112].mxu1 %vm1680_vm6, %v7514_v49 }
 0x767   :  { %5391 = vmatprep.mubr.msk.bf16.mxu0 %vm1680_vm6, %v7357_v57  ;;  %5445 = vmatprep.mubr.msk.bf16.mxu1 %vm1680_vm6, %v7519_v13  ;;  %v2378_v57 = vld [vmem:[#allocation2 + $0x180] sm:$0xff] }
 0x76e   :  { %5392 = vmatmul.mubr.msk.bf16.gmra.mrb[120].mxu0 %vm1680_vm6, %v7366_v39  ;;  %5446 = vmatmul.mubr.msk.bf16.gmra.mrb[116].mxu1 %vm1680_vm6, %v7532_v50 }
 0x76f   :  { %5395 = vmatprep.mubr.msk.bf16.mxu0 %vm1680_vm6, %v7371_v40  ;;  %5449 = vmatprep.mubr.msk.bf16.mxu1 %vm1680_vm6, %v7537_v42 }
 0x776   :  { %5396 = vmatmul.mubr.msk.bf16.gmra.mrb[124].mxu0 %vm1680_vm6, %v7380_v60  ;;  %5450 = vmatmul.mubr.msk.bf16.gmra.mrb[120].mxu1 %vm1680_vm6, %v7550_v51  ;;  %v2381_v60 = vld [vmem:[#allocation2 + $0x198] sm:$0xff] }
 0x777   :  { %5453 = vmatprep.mubr.msk.bf16.mxu1 %vm1680_vm6, %v7555_v52  ;;  %5423 = vmatprep.mubr.msk.bf16.mxu0 %vm1680_vm6, %v7324_v12 }
 0x77e   :  { %5454 = vmatmul.mubr.msk.bf16.gmra.mrb[124].mxu1 %vm1680_vm6, %v7568_v53 }
 0x77f   :  { %5481 = vmatprep.mubr.msk.bf16.mxu1 %vm1680_vm6, %v7501_v41 }
 0x811   :  { %v5345_v54 = vpop.f32.mrb[96].mxu0 }
 0x812   :  { %v2493_v56 = vadd.f32 %v5345_v54, %v2380_v33  ;;  %v2428_v39 = vpop.f32.mrb[97].mxu0 }
 0x813   :  { %v2491_v40 = vadd.f32 %v2428_v39, %v2378_v57  ;;  %v5346_v62 = vpop.f32.mrb[98].mxu0 }
 0x814   :  { %v4743_v12 = vmul.f32 -1.442695, %v2493_v56  ;;  %v2494_v38 = vadd.f32 %v5346_v62, %v2381_v60  ;;  %v2431_v61 = vpop.f32.mrb[99].mxu0 }
 0x815   :  { %v4741_v46 = vmul.f32 -1.442695, %v2491_v40  ;;  %v2492_v48 = vadd.f32 %v2431_v61, %v2379_v31  ;;  %v2388_v61 = vld [vmem:[#allocation2 + $0x1d0] sm:$0xff] }
 0x816   :  { %5899 = vpow2.f32 %v4743_v12  ;;  %v4744_v20 = vmul.f32 -1.442695, %v2494_v38 }
 0x817   :  { %5901 = vpow2.f32 %v4741_v46  ;;  %v4742_v23 = vmul.f32 -1.442695, %v2492_v48 }
 0x818   :  { %5903 = vpow2.f32 %v4744_v20 }
 0x819   :  { %5905 = vpow2.f32 %v4742_v23  ;;  %v5349_v59 = vpop.f32.mrb[100].mxu0  ;;  %v5405_v37 = vpop.f32.mrb[96].mxu1 }
 0x81a   :  { %v2497_v47 = vadd.f32 %v5349_v59, %v2384_v30  ;;  %v3075_v5 = vadd.f32 %v5405_v37, %v7394_v18  ;;  %v2444_v58 = vpop.f32.mrb[101].mxu0  ;;  %v3066_v21 = vpop.f32.mrb[97].mxu1  ;;  %v2386_v37 = vld [vmem:[#allocation2 + $0x1c0] sm:$0xff] }
 0x81b   :  { %v2495_v15 = vadd.f32 %v2444_v58, %v2382_v19  ;;  %v3067_v32 = vadd.f32 %v3066_v21, %v7386_v0  ;;  %v5350_v3 = vpop.f32.mrb[102].mxu0  ;;  %v5406_v26 = vpop.f32.mrb[98].mxu1 }
 0x81c   :  { %v4747_v63 = vmul.f32 -1.442695, %v2497_v47  ;;  %3131 = vst.msk [vmem:[#allocation2 + $0x110] sm:$0xff] %vm230_vm2, %v3075_v5  ;;  %v2498_v25 = vadd.f32 %v5350_v3, %v2385_v35  ;;  %v3078_v7 = vadd.f32 %v5406_v26, %v7396_v27  ;;  %v2447_v2 = vpop.f32.mrb[103].mxu0  ;;  %v3069_v28 = vpop.f32.mrb[99].mxu1 }
 0x81d   :  { %v4745_v6 = vmul.f32 -1.442695, %v2495_v15  ;;  %3129 = vst.msk [vmem:[#allocation2 + $0x100] sm:$0xff] %vm230_vm2, %v3067_v32  ;;  %v2496_v33 = vadd.f32 %v2447_v2, %v2383_v29  ;;  %v3070_v54 = vadd.f32 %v3069_v28, %v7388_v1  ;;  %v2389_v15 = vld [vmem:[#allocation2 + $0x1d8] sm:$0xff] }
 0x81e   :  { %5907 = vpow2.f32 %v4747_v63  ;;  %v4748_v56 = vmul.f32 -1.442695, %v2498_v25  ;;  %3132 = vst.msk [vmem:[#allocation2 + $0x118] sm:$0xff] %vm230_vm2, %v3078_v7  ;;  %v2387_v63 = vld [vmem:[#allocation2 + $0x1c8] sm:$0xff] }
 0x81f   :  { %5909 = vpow2.f32 %v4745_v6  ;;  %v4746_v57 = vmul.f32 -1.442695, %v2496_v33  ;;  %3130 = vst.msk [vmem:[#allocation2 + $0x108] sm:$0xff] %vm230_vm2, %v3070_v54  ;;  %v2392_v6 = vld [vmem:[#allocation2 + $0x1f0] sm:$0xff] }
 0x820   :  { %v5900_v39 = vpop.eup %5899  ;;  %5911 = vpow2.f32 %v4748_v56 }
 0x821   :  { %v5902_v40 = vpop.eup %5901  ;;  %v2521_v60 = vadd.f32 1.0, %v5900_v39  ;;  %5913 = vpow2.f32 %v4746_v57  ;;  %v5353_v62 = vpop.f32.mrb[104].mxu0 }
 0x822   :  { %v5409_v12 = vpop.f32.mrb[100].mxu1  ;;  %v5904_v38 = vpop.eup %5903  ;;  %v2519_v31 = vadd.f32 1.0, %v5902_v40  ;;  %v2501_v59 = vadd.f32 %v5353_v62, %v2388_v61 }
 0x823   :  { %v3091_v46 = vadd.f32 %v5409_v12, %v7398_v16  ;;  %v2460_v48 = vpop.f32.mrb[105].mxu0  ;;  %v3082_v20 = vpop.f32.mrb[101].mxu1  ;;  %5915 = vrcp.f32 %v2521_v60  ;;  %v2522_v30 = vadd.f32 1.0, %v5904_v38  ;;  %v2390_v60 = vld [vmem:[#allocation2 + $0x1e0] sm:$0xff] }
 0x824   :  { %v5906_v23 = vpop.eup %5905  ;;  %v3083_v47 = vadd.f32 %v3082_v20, %v7390_v14  ;;  %v5354_v5 = vpop.f32.mrb[106].mxu0  ;;  %5917 = vrcp.f32 %v2519_v31  ;;  %v2499_v21 = vadd.f32 %v2460_v48, %v2386_v37  ;;  %v2393_v48 = vld [vmem:[#allocation2 + $0x1f8] sm:$0xff] }
 0x825   :  { %v5410_v19 = vpop.f32.mrb[102].mxu1  ;;  %v2520_v58 = vadd.f32 1.0, %v5906_v23  ;;  %3135 = vst.msk [vmem:[#allocation2 + $0x130] sm:$0xff] %vm230_vm2, %v3091_v46  ;;  %v2463_v35 = vpop.f32.mrb[107].mxu0  ;;  %5919 = vrcp.f32 %v2522_v30  ;;  %v2502_v26 = vadd.f32 %v5354_v5, %v2389_v15 }
 0x826   :  { %v3094_v32 = vadd.f32 %v5410_v19, %v7400_v55  ;;  %v3085_v3 = vpop.f32.mrb[103].mxu1  ;;  %3133 = vst.msk [vmem:[#allocation2 + $0x120] sm:$0xff] %vm230_vm2, %v3083_v47  ;;  %v2500_v7 = vadd.f32 %v2463_v35, %v2387_v63  ;;  %v2391_v47 = vld [vmem:[#allocation2 + $0x1e8] sm:$0xff] }
 0x827   :  { %v3086_v25 = vadd.f32 %v3085_v3, %v7392_v17  ;;  %5921 = vrcp.f32 %v2520_v58 }
 0x828   :  { %3136 = vst.msk [vmem:[#allocation2 + $0x138] sm:$0xff] %vm230_vm2, %v3094_v32  ;;  %5923 = vtanh.f32 %v2501_v59  ;;  %v5908_v29 = vpop.eup %5907 }
 0x829   :  { %3134 = vst.msk [vmem:[#allocation2 + $0x128] sm:$0xff] %vm230_vm2, %v3086_v25  ;;  %5925 = vtanh.f32 %v2499_v21  ;;  %v5910_v2 = vpop.eup %5909  ;;  %v2545_v28 = vadd.f32 1.0, %v5908_v29  ;;  %v5357_v33 = vpop.f32.mrb[108].mxu0 }
 0x82a   :  { %5927 = vtanh.f32 %v2502_v26  ;;  %v5413_v54 = vpop.f32.mrb[104].mxu1  ;;  %v5912_v56 = vpop.eup %5911  ;;  %v2543_v57 = vadd.f32 1.0, %v5910_v2  ;;  %v2505_v39 = vadd.f32 %v5357_v33, %v2392_v6 }
 0x82b   :  { %5929 = vtanh.f32 %v2500_v7  ;;  %v3107_v40 = vadd.f32 %v5413_v54, %v7421_v22  ;;  %v2476_v62 = vpop.f32.mrb[109].mxu0  ;;  %v3098_v12 = vpop.f32.mrb[105].mxu1  ;;  %v2546_v31 = vadd.f32 1.0, %v5912_v56 }
 0x82c   :  { %v5914_v38 = vpop.eup %5913  ;;  %5931 = vrcp.f32 %v2545_v28  ;;  %v2503_v61 = vadd.f32 %v2476_v62, %v2390_v60  ;;  %v3099_v46 = vadd.f32 %v3098_v12, %v7402_v4  ;;  %v5358_v20 = vpop.f32.mrb[110].mxu0  ;;  %v4751_v59 = vmul.f32 -1.442695, %v2505_v39 }
 0x82d   :  { %v5414_v23 = vpop.f32.mrb[106].mxu1  ;;  %5933 = vrcp.f32 %v2543_v57  ;;  %v2544_v30 = vadd.f32 1.0, %v5914_v38  ;;  %3139 = vst.msk [vmem:[#allocation2 + $0x150] sm:$0xff] %vm230_vm2, %v3107_v40  ;;  %v2506_v37 = vadd.f32 %v5358_v20, %v2393_v48  ;;  %v2479_v5 = vpop.f32.mrb[111].mxu0 }
 0x82e   :  { %v3101_v19 = vpop.f32.mrb[107].mxu1  ;;  %v5916_v58 = vpop.eup %5915  ;;  %5935 = vrcp.f32 %v2546_v31  ;;  %v4749_v21 = vmul.f32 -1.442695, %v2503_v61  ;;  %3137 = vst.msk [vmem:[#allocation2 + $0x140] sm:$0xff] %vm230_vm2, %v3099_v46  ;;  %v3110_v15 = vadd.f32 %v5414_v23, %v7441_v10  ;;  %v2504_v32 = vadd.f32 %v2479_v5, %v2391_v47 }
 0x82f   :  { %v5918_v35 = vpop.eup %5917  ;;  %5937 = vrcp.f32 %v2544_v30  ;;  %v4752_v3 = vmul.f32 -1.442695, %v2506_v37  ;;  %v3102_v26 = vadd.f32 %v3101_v19, %v7446_v34 }
 0x830   :  { %v5920_v63 = vpop.eup %5919  ;;  %5939 = vpow2.f32 %v4751_v59  ;;  %3140 = vst.msk [vmem:[#allocation2 + $0x158] sm:$0xff] %vm230_vm2, %v3110_v15  ;;  %v4750_v25 = vmul.f32 -1.442695, %v2504_v32 }
 0x831   :  { %v5922_v7 = vpop.eup %5921  ;;  %5941 = vpow2.f32 %v4749_v21  ;;  %3138 = vst.msk [vmem:[#allocation2 + $0x148] sm:$0xff] %vm230_vm2, %v3102_v26  ;;  %v5385_v2 = vpop.f32.mrb[112].mxu0 }
 0x832   :  { %v5924_v29 = vpop.eup %5923  ;;  %5943 = vpow2.f32 %v4752_v3  ;;  %v5417_v28 = vpop.f32.mrb[108].mxu1  ;;  %v2960_v54 = vadd.f32 %v5385_v2, %v7394_v18 }
 0x833   :  { %v5926_v6 = vpop.eup %5925  ;;  %v2589_v33 = vmul.f32 %v5924_v29, %v5916_v58  ;;  %5945 = vpow2.f32 %v4750_v25  ;;  %v3123_v56 = vadd.f32 %v5417_v28, %v7450_v45  ;;  %v2951_v57 = vpop.f32.mrb[113].mxu0 }
 0x834   :  { %v3114_v39 = vpop.f32.mrb[109].mxu1  ;;  %v5928_v40 = vpop.eup %5927  ;;  %v2587_v60 = vmul.f32 %v5926_v6, %v5918_v35  ;;  %v2952_v62 = vadd.f32 %v2951_v57, %v7386_v0  ;;  %3016 = vst.msk [vmem:[#allocation2 + $0x90] sm:$0xff] %vm230_vm2, %v2960_v54  ;;  %v3262_v6 = vld [vmem:[#allocation2 + $0x10] sm:$0xff] }
 0x835   :  { %v3115_v12 = vadd.f32 %v3114_v39, %v7404_v43  ;;  %v5386_v38 = vpop.f32.mrb[114].mxu0  ;;  %v5418_v31 = vpop.f32.mrb[110].mxu1  ;;  %v2590_v46 = vmul.f32 %v5928_v40, %v5920_v63  ;;  %3143 = vst.msk [vmem:[#allocation2 + $0x170] sm:$0xff] %vm230_vm2, %v3123_v56  ;;  %v3260_v40 = vld [vmem:[#allocation2] sm:$0xff] }
 0x836   :  { %v5930_v61 = vpop.eup %5929  ;;  %v2963_v48 = vadd.f32 %v5386_v38, %v7396_v27  ;;  %v3126_v20 = vadd.f32 %v5418_v31, %v7457_v8  ;;  %v2954_v23 = vpop.f32.mrb[115].mxu0  ;;  %3014 = vst.msk [vmem:[#allocation2 + $0x80] sm:$0xff] %vm230_vm2, %v2952_v62 }
 0x837   :  { %v3117_v30 = vpop.f32.mrb[111].mxu1  ;;  %v5932_v59 = vpop.eup %5931  ;;  %v2588_v37 = vmul.f32 %v5930_v61, %v5922_v7  ;;  %3141 = vst.msk [vmem:[#allocation2 + $0x160] sm:$0xff] %vm230_vm2, %v3115_v12  ;;  %v2955_v47 = vadd.f32 %v2954_v23, %v7388_v1  ;;  %v3263_v23 = vld [vmem:[#allocation2 + $0x18] sm:$0xff] }
 0x838   :  { %v3118_v5 = vadd.f32 %v3117_v30, %v7407_v9  ;;  %v5934_v19 = vpop.eup %5933  ;;  %v2585_v58 = vmul.f32 %v5932_v59, %v7419_v36  ;;  %3017 = vst.msk [vmem:[#allocation2 + $0x98] sm:$0xff] %vm230_vm2, %v2963_v48  ;;  %3144 = vst.msk [vmem:[#allocation2 + $0x178] sm:$0xff] %vm230_vm2, %v3126_v20 }
 0x839   :  { %v5936_v21 = vpop.eup %5935  ;;  %v2583_v15 = vmul.f32 %v5934_v19, %v7424_v24  ;;  %3015 = vst.msk [vmem:[#allocation2 + $0x88] sm:$0xff] %vm230_vm2, %v2955_v47  ;;  %v5389_v36 = vpop.f32.mrb[116].mxu0  ;;  %v3261_v47 = vld [vmem:[#allocation2 + $0x8] sm:$0xff] }
 0x83a   :  { %3142 = vst.msk [vmem:[#allocation2 + $0x168] sm:$0xff] %vm230_vm2, %v3118_v5  ;;  %v5938_v32 = vpop.eup %5937  ;;  %v2586_v35 = vmul.f32 %v5936_v21, %v7427_v44  ;;  %v2593_v3 = vadd.f32 %v2589_v33, %v2585_v58  ;;  %v5443_v7 = vpop.f32.mrb[112].mxu1  ;;  %v2976_v24 = vadd.f32 %v5389_v36, %v7398_v16 }
 0x83b   :  { %v5940_v26 = vpop.eup %5939  ;;  %v2584_v63 = vmul.f32 %v5938_v32, %v7431_v11  ;;  %v2591_v25 = vadd.f32 %v2587_v60, %v2583_v15  ;;  %v2967_v54 = vpop.f32.mrb[117].mxu0  ;;  %v3439_v33 = vadd.f32 %v5443_v7, %v3262_v6  ;;  %v3266_v32 = vld [vmem:[#allocation2 + $0x30] sm:$0xff] }
 0x83c   :  { %v5942_v29 = vpop.eup %5941  ;;  %5947 = vtanh.f32 %v2593_v3  ;;  %v2594_v2 = vadd.f32 %v2590_v46, %v2586_v35  ;;  %v2573_v28 = vadd.f32 1.0, %v5940_v26  ;;  %v3374_v56 = vpop.f32.mrb[113].mxu1  ;;  %3020 = vst.msk [vmem:[#allocation2 + $0xb0] sm:$0xff] %vm230_vm2, %v2976_v24  ;;  %v2968_v38 = vadd.f32 %v2967_v54, %v7390_v14 }
 0x83d   :  { %v5944_v57 = vpop.eup %5943  ;;  %5949 = vtanh.f32 %v2591_v25  ;;  %v2592_v39 = vadd.f32 %v2588_v37, %v2584_v63  ;;  %v2571_v44 = vadd.f32 1.0, %v5942_v29  ;;  %v5390_v62 = vpop.f32.mrb[118].mxu0  ;;  %v3437_v31 = vadd.f32 %v3374_v56, %v3260_v40  ;;  %v3264_v25 = vld [vmem:[#allocation2 + $0x20] sm:$0xff] }
 0x83e   :  { %v5444_v11 = vpop.f32.mrb[114].mxu1  ;;  %v5946_v60 = vpop.eup %5945  ;;  %5951 = vtanh.f32 %v2594_v2  ;;  %v2574_v12 = vadd.f32 1.0, %v5944_v57  ;;  %v2979_v20 = vadd.f32 %v5390_v62, %v7400_v55  ;;  %v4811_v30 = vmul.f32 -1.442695, %v3439_v33  ;;  %3018 = vst.msk [vmem:[#allocation2 + $0xa0] sm:$0xff] %vm230_vm2, %v2968_v38 }
 0x83f   :  { %v2970_v61 = vpop.f32.mrb[119].mxu0  ;;  %v3377_v46 = vpop.f32.mrb[115].mxu1  ;;  %5953 = vtanh.f32 %v2592_v39  ;;  %v2572_v48 = vadd.f32 1.0, %v5946_v60  ;;  %v3440_v59 = vadd.f32 %v5444_v11, %v3263_v23  ;;  %v4809_v5 = vmul.f32 -1.442695, %v3437_v31 }
 0x840   :  { %5955 = vrcp.f32 %v2573_v28  ;;  %v2971_v37 = vadd.f32 %v2970_v61, %v7392_v17  ;;  %3021 = vst.msk [vmem:[#allocation2 + $0xb8] sm:$0xff] %vm230_vm2, %v2979_v20  ;;  %v3438_v19 = vadd.f32 %v3377_v46, %v3261_v47  ;;  %v3267_v28 = vld [vmem:[#allocation2 + $0x38] sm:$0xff] }
 0x841   :  { %5957 = vrcp.f32 %v2571_v44  ;;  %v4812_v58 = vmul.f32 -1.442695, %v3440_v59  ;;  %v5393_v15 = vpop.f32.mrb[120].mxu0  ;;  %v5447_v35 = vpop.f32.mrb[116].mxu1  ;;  %v3265_v44 = vld [vmem:[#allocation2 + $0x28] sm:$0xff] }
 0x842   :  { %5959 = vrcp.f32 %v2574_v12  ;;  %3019 = vst.msk [vmem:[#allocation2 + $0xa8] sm:$0xff] %vm230_vm2, %v2971_v37  ;;  %v4810_v21 = vmul.f32 -1.442695, %v3438_v19  ;;  %v2992_v3 = vadd.f32 %v5393_v15, %v7421_v22  ;;  %v3443_v26 = vadd.f32 %v5447_v35, %v3266_v32  ;;  %v2983_v63 = vpop.f32.mrb[121].mxu0  ;;  %v3390_v36 = vpop.f32.mrb[117].mxu1 }
 0x843   :  { %5961 = vrcp.f32 %v2572_v48  ;;  %v2984_v7 = vadd.f32 %v2983_v63, %v7402_v4  ;;  %v3441_v29 = vadd.f32 %v3390_v36, %v3264_v25  ;;  %v5394_v2 = vpop.f32.mrb[122].mxu0  ;;  %v5448_v24 = vpop.f32.mrb[118].mxu1  ;;  %v3271_v25 = vld [vmem:[#allocation2 + $0x58] sm:$0xff] }
 0x844   :  { %5963 = vpow2.f32 %v4811_v30  ;;  %3024 = vst.msk [vmem:[#allocation2 + $0xd0] sm:$0xff] %vm230_vm2, %v2992_v3  ;;  %v4815_v54 = vmul.f32 -1.442695, %v3443_v26  ;;  %v2995_v56 = vadd.f32 %v5394_v2, %v7441_v10  ;;  %v3444_v57 = vadd.f32 %v5448_v24, %v3267_v28  ;;  %v2986_v39 = vpop.f32.mrb[123].mxu0  ;;  %v3393_v33 = vpop.f32.mrb[119].mxu1  ;;  %v3270_v30 = vld [vmem:[#allocation2 + $0x50] sm:$0xff] }
 0x845   :  { %5965 = vpow2.f32 %v4809_v5  ;;  %3022 = vst.msk [vmem:[#allocation2 + $0xc0] sm:$0xff] %vm230_vm2, %v2984_v7  ;;  %v4813_v62 = vmul.f32 -1.442695, %v3441_v29  ;;  %v2987_v11 = vadd.f32 %v2986_v39, %v7446_v34  ;;  %v3442_v60 = vadd.f32 %v3393_v33, %v3265_v44 }
 0x846   :  { %v5948_v6 = vpop.eup %5947  ;;  %5967 = vpow2.f32 %v4812_v58  ;;  %3025 = vst.msk [vmem:[#allocation2 + $0xd8] sm:$0xff] %vm230_vm2, %v2995_v56  ;;  %v4816_v38 = vmul.f32 -1.442695, %v3444_v57 }
 0x847   :  { %v5950_v40 = vpop.eup %5949  ;;  %5969 = vpow2.f32 %v4810_v21  ;;  %3023 = vst.msk [vmem:[#allocation2 + $0xc8] sm:$0xff] %vm230_vm2, %v2987_v11  ;;  %v4814_v61 = vmul.f32 -1.442695, %v3442_v60  ;;  %v3268_v21 = vld [vmem:[#allocation2 + $0x40] sm:$0xff] }
 0x848   :  { %v5952_v12 = vpop.eup %5951  ;;  %5971 = vpow2.f32 %v4815_v54 }
 0x849   :  { %v5954_v31 = vpop.eup %5953  ;;  %5973 = vpow2.f32 %v4813_v62  ;;  %v5397_v23 = vpop.f32.mrb[124].mxu0 }
 0x84a   :  { %v5956_v46 = vpop.eup %5955  ;;  %5975 = vpow2.f32 %v4816_v38  ;;  %v5451_v59 = vpop.f32.mrb[120].mxu1  ;;  %v3008_v5 = vadd.f32 %v5397_v23, %v7450_v45  ;;  %v3269_v23 = vld [vmem:[#allocation2 + $0x48] sm:$0xff] }
 0x84b   :  { %v5958_v48 = vpop.eup %5957  ;;  %v2601_v20 = vmul.f32 %v5956_v46, %v5948_v6  ;;  %5977 = vpow2.f32 %v4814_v61  ;;  %v3447_v19 = vadd.f32 %v5451_v59, %v3270_v30  ;;  %v2999_v58 = vpop.f32.mrb[125].mxu0  ;;  %v3274_v61 = vld [vmem:[#allocation2 + $0x70] sm:$0xff]  ;;  %v3272_v59 = vld [vmem:[#allocation2 + $0x60] sm:$0xff] }
 0x84c   :  { %v5960_v37 = vpop.eup %5959  ;;  %v2599_v47 = vmul.f32 %v5958_v48, %v5950_v40  ;;  %v3406_v15 = vpop.f32.mrb[121].mxu1  ;;  %v3000_v3 = vadd.f32 %v2999_v58, %v7404_v43  ;;  %3028 = vst.msk [vmem:[#allocation2 + $0xf0] sm:$0xff] %vm230_vm2, %v3008_v5 }
 0x84d   :  { %v5962_v32 = vpop.eup %5961  ;;  %v2602_v35 = vmul.f32 %v5960_v37, %v5952_v12  ;;  %v3445_v26 = vadd.f32 %v3406_v15, %v3268_v21  ;;  %v5398_v63 = vpop.f32.mrb[126].mxu0  ;;  %5979 = vtanh.f32 %v3447_v19  ;;  %v3275_v21 = vld [vmem:[#allocation2 + $0x78] sm:$0xff] }
 0x84e   :  { %v5452_v36 = vpop.f32.mrb[122].mxu1  ;;  %v5964_v7 = vpop.eup %5963  ;;  %v2600_v29 = vmul.f32 %v5962_v32, %v5954_v31  ;;  %v3011_v2 = vadd.f32 %v5398_v63, %v7457_v8  ;;  %3026 = vst.msk [vmem:[#allocation2 + $0xe0] sm:$0xff] %vm230_vm2, %v3000_v3 }
 0x84f   :  { %v3448_v28 = vadd.f32 %v5452_v36, %v3271_v25  ;;  %v3002_v24 = vpop.f32.mrb[127].mxu0  ;;  %v3409_v6 = vpop.f32.mrb[123].mxu1  ;;  %v2604_v56 = vpack.c.bf16 %v2602_v35, %v2601_v20  ;;  %v3467_v57 = vadd.f32 1.0, %v5964_v7  ;;  %5981 = vtanh.f32 %v3445_v26  ;;  %v3273_v26 = vld [vmem:[#allocation2 + $0x68] sm:$0xff] }
 0x850   :  { %v5966_v54 = vpop.eup %5965  ;;  %v3003_v39 = vadd.f32 %v3002_v24, %v7407_v9  ;;  %v2603_v33 = vpack.c.bf16 %v2600_v29, %v2599_v47  ;;  %3029 = vst.msk [vmem:[#allocation2 + $0xf8] sm:$0xff] %vm230_vm2, %v3011_v2  ;;  %v3446_v19 = vadd.f32 %v3409_v6, %v3269_v23 }
 0x851   :  { %v5968_v44 = vpop.eup %5967  ;;  %v3465_v40 = vadd.f32 1.0, %v5966_v54  ;;  %5983 = vtanh.f32 %v3448_v28  ;;  %2607 = vst.msk [vmem:[#allocation3 + $0x38] sm:$0xff] %vm230_vm2, %v2604_v56  ;;  %v5455_v46 = vpop.f32.mrb[124].mxu1 }
 0x852   :  { %v5970_v62 = vpop.eup %5969  ;;  %5985 = vrcp.f32 %v3467_v57  ;;  %v3468_v11 = vadd.f32 1.0, %v5968_v44  ;;  %3027 = vst.msk [vmem:[#allocation2 + $0xe8] sm:$0xff] %vm230_vm2, %v3003_v39  ;;  %2606 = vst.msk [vmem:[#allocation3 + $0x30] sm:$0xff] %vm230_vm2, %v2603_v33  ;;  %v3451_v30 = vadd.f32 %v5455_v46, %v3274_v61  ;;  %v3422_v37 = vpop.f32.mrb[125].mxu1 }
 0x853   :  { %v5972_v60 = vpop.eup %5971  ;;  %5987 = vrcp.f32 %v3465_v40  ;;  %v3466_v12 = vadd.f32 1.0, %v5970_v62  ;;  %v3449_v58 = vadd.f32 %v3422_v37, %v3272_v59  ;;  %v5456_v15 = vpop.f32.mrb[126].mxu1  ;;  %v6229_v37 = vld [vmem:[%s7908_s8 + $0x10] sm:$0xff]  }
 0x854   :  { %v5974_v38 = vpop.eup %5973  ;;  %5989 = vrcp.f32 %v3468_v11  ;;  %v3491_v31 = vadd.f32 1.0, %v5972_v60  ;;  %v4819_v35 = vmul.f32 -1.442695, %v3451_v30  ;;  %v3452_v3 = vadd.f32 %v5456_v15, %v3275_v21  ;;  %v3425_v63 = vpop.f32.mrb[127].mxu1 }
 0x855   :  { %v5976_v48 = vpop.eup %5975  ;;  %5991 = vrcp.f32 %v3466_v12  ;;  %v3489_v20 = vadd.f32 1.0, %v5974_v38  ;;  %v4817_v25 = vmul.f32 -1.442695, %v3449_v58  ;;  %v3450_v36 = vadd.f32 %v3425_v63, %v3273_v26 }
 0x856   :  { %v5978_v47 = vpop.eup %5977  ;;  %5993 = vrcp.f32 %v3491_v31  ;;  %v3492_v5 = vadd.f32 1.0, %v5976_v48  ;;  %v4820_v29 = vmul.f32 -1.442695, %v3452_v3 }
 0x857   :  { %5995 = vrcp.f32 %v3489_v20  ;;  %v3490_v32 = vadd.f32 1.0, %v5978_v47  ;;  %v5980_v7 = vpop.eup %5979  ;;  %v4818_v28 = vmul.f32 -1.442695, %v3450_v36  ;;  %v6228_v20 = vld [vmem:[%s7908_s8 + $0x8] sm:$0xff]   ;;  %v6231_v36 = vld [vmem:[%s7908_s8 + $0x20] sm:$0xff]  }
 0x858   :  { %5997 = vrcp.f32 %v3492_v5  ;;  %v3146_v56 = vld [vmem:[#allocation3 + $0x38] sm:$0xff] }
 0x859   :  { %5999 = vrcp.f32 %v3490_v32  ;;  %v5982_v2 = vpop.eup %5981  ;;  %v3145_v24 = vld [vmem:[#allocation3 + $0x30] sm:$0xff] }
 0x85a   :  { %6001 = vtanh.f32 %v3446_v19  ;;  %5419 = vmatprep.subr.bf16.mxu0 %v3145_v24 }
 0x85b   :  { %v5984_v6 = vpop.eup %5983  ;;  %6003 = vpow2.f32 %v4819_v35  ;;  %5420 = vmatpush3.bf16.msra.mxu0 %v3145_v24 }
 0x85c   :  { %v5986_v54 = vpop.eup %5985  ;;  %6005 = vpow2.f32 %v4817_v25  ;;  %5421 = vmatprep.subr.bf16.mxu0 %v3146_v56  ;;  %v6230_v25 = vld [vmem:[%s7908_s8 + $0x18] sm:$0xff]  }
 0x85d   :  { %v5988_v57 = vpop.eup %5987  ;;  %v3535_v39 = vmul.f32 %v5986_v54, %v5980_v7  ;;  %6007 = vpow2.f32 %v4820_v29 }
 0x85e   :  { %v5990_v44 = vpop.eup %5989  ;;  %v3533_v33 = vmul.f32 %v5988_v57, %v5982_v2  ;;  %6009 = vpow2.f32 %v4818_v28 }
 0x85f   :  { %v5992_v40 = vpop.eup %5991  ;;  %v3536_v62 = vmul.f32 %v5990_v44, %v5984_v6  ;;  %5422 = vmatpush3.bf16.msra.mxu0 %v3146_v56  ;;  %v6232_v6 = vld [vmem:[%s7908_s8 + $0x28] sm:$0xff]   ;;  %v6233_v56 = vld [vmem:[%s7908_s8 + $0x30] sm:$0xff]  }
 0x860   :  { %v5994_v11 = vpop.eup %5993 }
 0x861   :  { %v5996_v60 = vpop.eup %5995  ;;  %v3531_v12 = vmul.f32 0.0, %v5994_v11 }
 0x862   :  { %v5998_v38 = vpop.eup %5997  ;;  %v3529_v31 = vmul.f32 0.0, %v5996_v60  ;;  %5424 = vmatmul.mubr.msk.bf16.vlgmr.msra.gmra.mrb[128].mxu0 %vm1680_vm6, %v6228_v20 }
 0x863   :  { %v6000_v61 = vpop.eup %5999  ;;  %v3532_v46 = vmul.f32 0.0, %v5998_v38  ;;  %v7644_v48 = vadd.f32 %v3535_v39, %v3531_v12  ;;  %5427 = vmatprep.mubr.msk.bf16.mxu0 %vm1680_vm6, %v6229_v37  ;;  %v6234_v12 = vld [vmem:[%s7908_s8 + $0x38] sm:$0xff]  }
 0x864   :  { %v6002_v23 = vpop.eup %6001  ;;  %v3530_v30 = vmul.f32 0.0, %v6000_v61  ;;  %v7650_v59 = vadd.f32 %v3533_v33, %v3529_v31 }
 0x865   :  { %v6004_v47 = vpop.eup %6003  ;;  %6011 = vtanh.f32 %v7644_v48  ;;  %v7657_v5 = vadd.f32 %v3536_v62, %v3532_v46  ;;  %v3534_v19 = vmul.f32 %v6002_v23, %v5992_v40 }
 0x866   :  { %v6006_v58 = vpop.eup %6005  ;;  %6013 = vtanh.f32 %v7650_v59  ;;  %v3519_v21 = vadd.f32 1.0, %v6004_v47 }
 0x867   :  { %v6008_v15 = vpop.eup %6007  ;;  %6015 = vtanh.f32 %v7657_v5  ;;  %v7661_v32 = vadd.f32 %v3534_v19, %v3530_v30  ;;  %v3517_v35 = vadd.f32 1.0, %v6006_v58 }
 0x868   :  { %v6010_v3 = vpop.eup %6009  ;;  %6017 = vrcp.f32 %v3519_v21  ;;  %v3520_v26 = vadd.f32 1.0, %v6008_v15  ;;  %v3555_v15 = vld [vmem:[#allocation2 + $0x90] sm:$0xff] }
 0x869   :  { %6019 = vtanh.f32 %v7661_v32  ;;  %v3518_v63 = vadd.f32 1.0, %v6010_v3  ;;  %v3553_v3 = vld [vmem:[#allocation2 + $0x80] sm:$0xff] }
 0x86a   :  { %6021 = vrcp.f32 %v3517_v35  ;;  %5428 = vmatmul.mubr.msk.bf16.gmra.mrb[132].mxu0 %vm1680_vm6, %v6230_v25 }
 0x86b   :  { %6023 = vrcp.f32 %v3520_v26  ;;  %5431 = vmatprep.mubr.msk.bf16.mxu0 %vm1680_vm6, %v6231_v36 }
 0x86c   :  { %6025 = vrcp.f32 %v3518_v63  ;;  %v3556_v63 = vld [vmem:[#allocation2 + $0x98] sm:$0xff] }
 0x86f   :  { %v6012_v7 = vpop.eup %6011 }
 0x870   :  { %v6014_v29 = vpop.eup %6013 }
 0x871   :  { %v6016_v2 = vpop.eup %6015 }
 0x872   :  { %v6018_v28 = vpop.eup %6017  ;;  %5432 = vmatmul.mubr.msk.bf16.gmra.mrb[136].mxu0 %vm1680_vm6, %v6232_v6  ;;  %v3559_v6 = vld [vmem:[#allocation2 + $0xb0] sm:$0xff] }
 0x873   :  { %v6020_v24 = vpop.eup %6019  ;;  %5435 = vmatprep.mubr.msk.bf16.mxu0 %vm1680_vm6, %v6233_v56  ;;  %v3547_v44 = vmul.f32 %v6018_v28, %v6012_v7 }
 0x874   :  { %v6022_v54 = vpop.eup %6021 }
 0x875   :  { %v6024_v57 = vpop.eup %6023  ;;  %v3545_v40 = vmul.f32 %v6022_v54, %v6014_v29 }
 0x876   :  { %v6026_v39 = vpop.eup %6025  ;;  %v3548_v33 = vmul.f32 %v6024_v57, %v6016_v2  ;;  %v3557_v57 = vld [vmem:[#allocation2 + $0xa0] sm:$0xff] }
 0x877   :  { %v3546_v62 = vmul.f32 %v6026_v39, %v6020_v24 }
 0x878   :  { %v3550_v11 = vpack.c.bf16 %v3548_v33, %v3547_v44  ;;  %v3560_v33 = vld [vmem:[#allocation2 + $0xb8] sm:$0xff] }
 0x879   :  { %v3549_v60 = vpack.c.bf16 %v3546_v62, %v3545_v40 }
 0x87a   :  { %3552 = vst.msk [vmem:[#allocation3 + $0x8] sm:$0xff] %vm230_vm2, %v3550_v11  ;;  %5436 = vmatmul.mubr.msk.bf16.gmra.mrb[140].mxu0 %vm1680_vm6, %v6234_v12 }
 0x87b   :  { %3551 = vst.msk [vmem:[#allocation3] sm:$0xff] %vm230_vm2, %v3549_v60  ;;  %5457 = vmatprep.subr.bf16.mxu0 %v3549_v60  ;;  %5461 = vmatprep.mubr.msk.bf16.mxu0 %vm1680_vm6, %v7501_v41 }
 0x87c   :  { %5458 = vmatpush3.bf16.msra.mxu0 %v3549_v60  ;;  %v3558_v60 = vld [vmem:[#allocation2 + $0xa8] sm:$0xff] }
 0x87d   :  { %5459 = vmatprep.subr.bf16.mxu0 %v3550_v11 }
 0x880   :  { %5460 = vmatpush3.bf16.msra.mxu0 %v3550_v11 }
 0x883   :  { %5462 = vmatmul.mubr.msk.bf16.vlgmr.msra.gmra.mrb[144].mxu0 %vm1680_vm6, %v7514_v49 }
 0x884   :  { %5465 = vmatprep.mubr.msk.bf16.mxu0 %vm1680_vm6, %v7519_v13 }
 0x88b   :  { %5466 = vmatmul.mubr.msk.bf16.gmra.mrb[148].mxu0 %vm1680_vm6, %v7532_v50 }
 0x88c   :  { %5469 = vmatprep.mubr.msk.bf16.mxu0 %vm1680_vm6, %v7537_v42 }
 0x893   :  { %5470 = vmatmul.mubr.msk.bf16.gmra.mrb[152].mxu0 %vm1680_vm6, %v7550_v51 }
 0x894   :  { %5473 = vmatprep.mubr.msk.bf16.mxu0 %vm1680_vm6, %v7555_v52 }
 0x89b   :  { %5474 = vmatmul.mubr.msk.bf16.gmra.mrb[156].mxu0 %vm1680_vm6, %v7568_v53 }
 0x89c   :  { %5501 = vmatprep.mubr.msk.bf16.mxu0 %vm1680_vm6, %v7501_v41 }
 0x935   :  { %v5425_v49 = vpop.f32.mrb[128].mxu0 }
 0x936   :  { %v3190_v13 = vadd.f32 %v5425_v49, %v7394_v18  ;;  %v3181_v38 = vpop.f32.mrb[129].mxu0 }
 0x937   :  { %v3182_v50 = vadd.f32 %v3181_v38, %v7386_v0  ;;  %v5426_v31 = vpop.f32.mrb[130].mxu0 }
 0x938   :  { %3246 = vst.msk [vmem:[#allocation2 + $0x190] sm:$0xff] %vm230_vm2, %v3190_v13  ;;  %v3193_v42 = vadd.f32 %v5426_v31, %v7396_v27  ;;  %v3184_v51 = vpop.f32.mrb[131].mxu0 }
 0x939   :  { %3244 = vst.msk [vmem:[#allocation2 + $0x180] sm:$0xff] %vm230_vm2, %v3182_v50  ;;  %v3185_v52 = vadd.f32 %v3184_v51, %v7388_v1 }
 0x93a   :  { %3247 = vst.msk [vmem:[#allocation2 + $0x198] sm:$0xff] %vm230_vm2, %v3193_v42 }
 0x93b   :  { %3245 = vst.msk [vmem:[#allocation2 + $0x188] sm:$0xff] %vm230_vm2, %v3185_v52 }
 0x93d   :  { %v5429_v41 = vpop.f32.mrb[132].mxu0 }
 0x93e   :  { %v3206_v18 = vadd.f32 %v5429_v41, %v7398_v16  ;;  %v3197_v53 = vpop.f32.mrb[133].mxu0 }
 0x93f   :  { %v3198_v0 = vadd.f32 %v3197_v53, %v7390_v14  ;;  %v5430_v61 = vpop.f32.mrb[134].mxu0  ;;  %v3563_v53 = vld [vmem:[#allocation2 + $0xd0] sm:$0xff] }
 0x940   :  { %3250 = vst.msk [vmem:[#allocation2 + $0x1b0] sm:$0xff] %vm230_vm2, %v3206_v18  ;;  %v3209_v27 = vadd.f32 %v5430_v61, %v7400_v55  ;;  %v3200_v46 = vpop.f32.mrb[135].mxu0 }
 0x941   :  { %3248 = vst.msk [vmem:[#allocation2 + $0x1a0] sm:$0xff] %vm230_vm2, %v3198_v0  ;;  %v3201_v1 = vadd.f32 %v3200_v46, %v7392_v17 }
 0x942   :  { %3251 = vst.msk [vmem:[#allocation2 + $0x1b8] sm:$0xff] %vm230_vm2, %v3209_v27 }
 0x943   :  { %3249 = vst.msk [vmem:[#allocation2 + $0x1a8] sm:$0xff] %vm230_vm2, %v3201_v1  ;;  %v3561_v1 = vld [vmem:[#allocation2 + $0xc0] sm:$0xff] }
 0x945   :  { %v5433_v20 = vpop.f32.mrb[136].mxu0 }
 0x946   :  { %v3222_v16 = vadd.f32 %v5433_v20, %v7421_v22  ;;  %v3213_v23 = vpop.f32.mrb[137].mxu0 }
 0x947   :  { %v3214_v14 = vadd.f32 %v3213_v23, %v7402_v4  ;;  %v5434_v30 = vpop.f32.mrb[138].mxu0 }
 0x948   :  { %3254 = vst.msk [vmem:[#allocation2 + $0x1d0] sm:$0xff] %vm230_vm2, %v3222_v16  ;;  %v3225_v55 = vadd.f32 %v5434_v30, %v7441_v10  ;;  %v3216_v37 = vpop.f32.mrb[139].mxu0 }
 0x949   :  { %3252 = vst.msk [vmem:[#allocation2 + $0x1c0] sm:$0xff] %vm230_vm2, %v3214_v14  ;;  %v3217_v17 = vadd.f32 %v3216_v37, %v7446_v34  ;;  %v3564_v14 = vld [vmem:[#allocation2 + $0xd8] sm:$0xff]  ;;  %v3562_v37 = vld [vmem:[#allocation2 + $0xc8] sm:$0xff] }
 0x94a   :  { %3255 = vst.msk [vmem:[#allocation2 + $0x1d8] sm:$0xff] %vm230_vm2, %v3225_v55 }
 0x94b   :  { %3253 = vst.msk [vmem:[#allocation2 + $0x1c8] sm:$0xff] %vm230_vm2, %v3217_v17 }
 0x94d   :  { %v5437_v47 = vpop.f32.mrb[140].mxu0 }
 0x94e   :  { %v3238_v22 = vadd.f32 %v5437_v47, %v7450_v45  ;;  %v3229_v19 = vpop.f32.mrb[141].mxu0 }
 0x94f   :  { %v3230_v4 = vadd.f32 %v3229_v19, %v7404_v43  ;;  %v5438_v58 = vpop.f32.mrb[142].mxu0 }
 0x950   :  { %3258 = vst.msk [vmem:[#allocation2 + $0x1f0] sm:$0xff] %vm230_vm2, %v3238_v22  ;;  %v3241_v10 = vadd.f32 %v5438_v58, %v7457_v8  ;;  %v3232_v21 = vpop.f32.mrb[143].mxu0  ;;  %v3554_v8 = vld [vmem:[#allocation2 + $0x88] sm:$0xff] }
 0x951   :  { %3256 = vst.msk [vmem:[#allocation2 + $0x1e0] sm:$0xff] %vm230_vm2, %v3230_v4  ;;  %v3233_v34 = vadd.f32 %v3232_v21, %v7407_v9  ;;  %v3567_v4 = vld [vmem:[#allocation2 + $0xf0] sm:$0xff] }
 0x952   :  { %3259 = vst.msk [vmem:[#allocation2 + $0x1f8] sm:$0xff] %vm230_vm2, %v3241_v10 }
 0x953   :  { %3257 = vst.msk [vmem:[#allocation2 + $0x1e8] sm:$0xff] %vm230_vm2, %v3233_v34 }
 0x956   :  { %v5463_v35 = vpop.f32.mrb[144].mxu0 }
 0x957   :  { %v3668_v45 = vadd.f32 %v5463_v35, %v3555_v15  ;;  %v3603_v26 = vpop.f32.mrb[145].mxu0  ;;  %v3565_v15 = vld [vmem:[#allocation2 + $0xe0] sm:$0xff] }
 0x958   :  { %v3666_v43 = vadd.f32 %v3603_v26, %v3553_v3  ;;  %v5464_v25 = vpop.f32.mrb[146].mxu0 }
 0x959   :  { %v4831_v36 = vmul.f32 -1.442695, %v3668_v45  ;;  %v3669_v7 = vadd.f32 %v5464_v25, %v3556_v63  ;;  %v3606_v29 = vpop.f32.mrb[147].mxu0 }
 0x95a   :  { %v4829_v2 = vmul.f32 -1.442695, %v3666_v43  ;;  %v3667_v28 = vadd.f32 %v3606_v29, %v3554_v8  ;;  %v3568_v43 = vld [vmem:[#allocation2 + $0xf8] sm:$0xff]  ;;  %v3566_v8 = vld [vmem:[#allocation2 + $0xe8] sm:$0xff] }
 0x95b   :  { %6027 = vpow2.f32 %v4831_v36  ;;  %v4832_v9 = vmul.f32 -1.442695, %v3669_v7 }
 0x95c   :  { %6029 = vpow2.f32 %v4829_v2  ;;  %v4830_v24 = vmul.f32 -1.442695, %v3667_v28 }
 0x95d   :  { %6031 = vpow2.f32 %v4832_v9 }
 0x95e   :  { %6033 = vpow2.f32 %v4830_v24  ;;  %v5467_v54 = vpop.f32.mrb[148].mxu0 }
 0x95f   :  { %v3672_v56 = vadd.f32 %v5467_v54, %v3559_v6  ;;  %v3619_v39 = vpop.f32.mrb[149].mxu0 }
 0x960   :  { %v3670_v44 = vadd.f32 %v3619_v39, %v3557_v57  ;;  %v5468_v40 = vpop.f32.mrb[150].mxu0 }
 0x961   :  { %v4835_v62 = vmul.f32 -1.442695, %v3672_v56  ;;  %v3673_v11 = vadd.f32 %v5468_v40, %v3560_v33  ;;  %v3622_v12 = vpop.f32.mrb[151].mxu0 }
 0x962   :  { %v4833_v49 = vmul.f32 -1.442695, %v3670_v44  ;;  %v3671_v13 = vadd.f32 %v3622_v12, %v3558_v60 }
 0x963   :  { %6035 = vpow2.f32 %v4835_v62  ;;  %v4836_v38 = vmul.f32 -1.442695, %v3673_v11 }
 0x964   :  { %6037 = vpow2.f32 %v4833_v49  ;;  %v4834_v50 = vmul.f32 -1.442695, %v3671_v13 }
 0x965   :  { %v6028_v31 = vpop.eup %6027  ;;  %6039 = vpow2.f32 %v4836_v38 }
 0x966   :  { %v6030_v42 = vpop.eup %6029  ;;  %v3696_v51 = vadd.f32 1.0, %v6028_v31  ;;  %6041 = vpow2.f32 %v4834_v50  ;;  %v5471_v52 = vpop.f32.mrb[152].mxu0 }
 0x967   :  { %v6032_v41 = vpop.eup %6031  ;;  %v3694_v18 = vadd.f32 1.0, %v6030_v42  ;;  %v3635_v0 = vpop.f32.mrb[153].mxu0  ;;  %v3676_v46 = vadd.f32 %v5471_v52, %v3563_v53 }
 0x968   :  { %v6034_v61 = vpop.eup %6033  ;;  %6043 = vrcp.f32 %v3696_v51  ;;  %v3697_v27 = vadd.f32 1.0, %v6032_v41  ;;  %v5472_v20 = vpop.f32.mrb[154].mxu0  ;;  %v3674_v23 = vadd.f32 %v3635_v0, %v3561_v1 }
 0x969   :  { %6045 = vrcp.f32 %v3694_v18  ;;  %v3695_v16 = vadd.f32 1.0, %v6034_v61  ;;  %v3638_v30 = vpop.f32.mrb[155].mxu0  ;;  %v3677_v55 = vadd.f32 %v5472_v20, %v3564_v14 }
 0x96a   :  { %6047 = vrcp.f32 %v3697_v27  ;;  %v3675_v17 = vadd.f32 %v3638_v30, %v3562_v37 }
 0x96b   :  { %6049 = vrcp.f32 %v3695_v16 }
 0x96c   :  { %6051 = vtanh.f32 %v3676_v46 }
 0x96d   :  { %v6036_v47 = vpop.eup %6035  ;;  %6053 = vtanh.f32 %v3674_v23 }
 0x96e   :  { %v6038_v22 = vpop.eup %6037  ;;  %v3720_v19 = vadd.f32 1.0, %v6036_v47  ;;  %6055 = vtanh.f32 %v3677_v55  ;;  %v5475_v58 = vpop.f32.mrb[156].mxu0 }
 0x96f   :  { %v6040_v10 = vpop.eup %6039  ;;  %v3718_v21 = vadd.f32 1.0, %v6038_v22  ;;  %6057 = vtanh.f32 %v3675_v17  ;;  %v3680_v34 = vadd.f32 %v5475_v58, %v3567_v4  ;;  %v3651_v35 = vpop.f32.mrb[157].mxu0 }
 0x970   :  { %v6042_v45 = vpop.eup %6041  ;;  %6059 = vrcp.f32 %v3720_v19  ;;  %v3721_v3 = vadd.f32 1.0, %v6040_v10  ;;  %v3678_v26 = vadd.f32 %v3651_v35, %v3565_v15  ;;  %v5476_v63 = vpop.f32.mrb[158].mxu0  ;;  %v7771_v15 = vld [vmem:[%s7909_s9 + $0x18] sm:$0xff]   ;;  %v7778_v35 = vld [vmem:[%s7909_s9 + $0x20] sm:$0xff]  }
 0x971   :  { %6061 = vrcp.f32 %v3718_v21  ;;  %v3719_v25 = vadd.f32 1.0, %v6042_v45  ;;  %v4839_v36 = vmul.f32 -1.442695, %v3680_v34  ;;  %v3681_v7 = vadd.f32 %v5476_v63, %v3568_v43  ;;  %v3654_v29 = vpop.f32.mrb[159].mxu0  ;;  %v7757_v21 = vld [vmem:[%s7909_s9 + $0x8] sm:$0xff]   ;;  %v7764_v34 = vld [vmem:[%s7909_s9 + $0x10] sm:$0xff]  }
 0x972   :  { %v6044_v2 = vpop.eup %6043  ;;  %6063 = vrcp.f32 %v3721_v3  ;;  %v4837_v28 = vmul.f32 -1.442695, %v3678_v26  ;;  %v3679_v9 = vadd.f32 %v3654_v29, %v3566_v8  ;;  %v7785_v45 = vld [vmem:[%s7909_s9 + $0x28] sm:$0xff]   ;;  %v7792_v3 = vld [vmem:[%s7909_s9 + $0x30] sm:$0xff]   ;;  %v7799_v26 = vld [vmem:[%s7909_s9 + $0x38] sm:$0xff]  }
 0x973   :  { %v6046_v24 = vpop.eup %6045  ;;  %6065 = vrcp.f32 %v3719_v25  ;;  %v4840_v6 = vmul.f32 -1.442695, %v3681_v7  ;;  %v3784_v43 = vld [vmem:[#allocation2 + $0x110] sm:$0xff]  ;;  %v3785_v29 = vld [vmem:[#allocation2 + $0x118] sm:$0xff] }
 0x974   :  { %v6048_v54 = vpop.eup %6047  ;;  %6067 = vpow2.f32 %v4839_v36  ;;  %v4838_v56 = vmul.f32 -1.442695, %v3679_v9  ;;  %v3782_v36 = vld [vmem:[#allocation2 + $0x100] sm:$0xff] }
 0x975   :  { %v6050_v57 = vpop.eup %6049  ;;  %6069 = vpow2.f32 %v4837_v28 }
 0x976   :  { %v6052_v39 = vpop.eup %6051  ;;  %6071 = vpow2.f32 %v4840_v6 }
 0x977   :  { %v6054_v44 = vpop.eup %6053  ;;  %v3764_v33 = vmul.f32 %v6052_v39, %v6044_v2  ;;  %6073 = vpow2.f32 %v4838_v56 }
 0x978   :  { %v6056_v40 = vpop.eup %6055  ;;  %v3762_v62 = vmul.f32 %v6054_v44, %v6046_v24  ;;  %v3783_v24 = vld [vmem:[#allocation2 + $0x108] sm:$0xff]  ;;  %v3788_v44 = vld [vmem:[#allocation2 + $0x130] sm:$0xff] }
 0x979   :  { %v6058_v11 = vpop.eup %6057  ;;  %v3765_v60 = vmul.f32 %v6056_v40, %v6048_v54 }
 0x97a   :  { %v6060_v12 = vpop.eup %6059  ;;  %v3763_v49 = vmul.f32 %v6058_v11, %v6050_v57 }
 0x97b   :  { %v6062_v13 = vpop.eup %6061  ;;  %v3760_v38 = vmul.f32 %v6060_v12, %v7644_v48  ;;  %v3789_v12 = vld [vmem:[#allocation2 + $0x138] sm:$0xff] }
 0x97c   :  { %v6064_v50 = vpop.eup %6063  ;;  %v3758_v31 = vmul.f32 %v6062_v13, %v7650_v59 }
 0x97d   :  { %v6066_v42 = vpop.eup %6065  ;;  %v3761_v51 = vmul.f32 %v6064_v50, %v7657_v5  ;;  %v7739_v52 = vadd.f32 %v3764_v33, %v3760_v38  ;;  %v3787_v50 = vld [vmem:[#allocation2 + $0x128] sm:$0xff] }
 0x97e   :  { %v6068_v41 = vpop.eup %6067  ;;  %v3759_v18 = vmul.f32 %v6066_v42, %v7661_v32  ;;  %v7742_v53 = vadd.f32 %v3762_v62, %v3758_v31  ;;  %v3786_v62 = vld [vmem:[#allocation2 + $0x120] sm:$0xff] }
 0x97f   :  { %v6070_v0 = vpop.eup %6069  ;;  %6075 = vtanh.f32 %v7739_v52  ;;  %v7745_v61 = vadd.f32 %v3765_v60, %v3761_v51  ;;  %v3748_v27 = vadd.f32 1.0, %v6068_v41 }
 0x980   :  { %v6072_v48 = vpop.eup %6071  ;;  %6077 = vtanh.f32 %v7742_v53  ;;  %v7748_v59 = vadd.f32 %v3763_v49, %v3759_v18  ;;  %v3746_v46 = vadd.f32 1.0, %v6070_v0 }
 0x981   :  { %v6074_v5 = vpop.eup %6073  ;;  %6079 = vtanh.f32 %v7745_v61  ;;  %v3749_v1 = vadd.f32 1.0, %v6072_v48 }
 0x982   :  { %6081 = vtanh.f32 %v7748_v59  ;;  %v3747_v32 = vadd.f32 1.0, %v6074_v5 }
 0x983   :  { %6083 = vrcp.f32 %v3748_v27 }
 0x984   :  { %6085 = vrcp.f32 %v3746_v46 }
 0x985   :  { %6087 = vrcp.f32 %v3749_v1 }
 0x986   :  { %6089 = vrcp.f32 %v3747_v32  ;;  %v3792_v32 = vld [vmem:[#allocation2 + $0x150] sm:$0xff] }
 0x989   :  { %v6076_v20 = vpop.eup %6075 }
 0x98a   :  { %v6078_v16 = vpop.eup %6077 }
 0x98b   :  { %v6080_v23 = vpop.eup %6079 }
 0x98c   :  { %v6082_v14 = vpop.eup %6081 }
 0x98d   :  { %v6084_v30 = vpop.eup %6083 }
 0x98e   :  { %v6086_v55 = vpop.eup %6085  ;;  %v3776_v47 = vmul.f32 %v6084_v30, %v6076_v20  ;;  %v3790_v30 = vld [vmem:[#allocation2 + $0x140] sm:$0xff] }
 0x98f   :  { %v6088_v37 = vpop.eup %6087  ;;  %v3774_v19 = vmul.f32 %v6086_v55, %v6078_v16 }
 0x990   :  { %v6090_v17 = vpop.eup %6089  ;;  %v3777_v22 = vmul.f32 %v6088_v37, %v6080_v23 }
 0x991   :  { %v3775_v4 = vmul.f32 %v6090_v17, %v6082_v14 }
 0x992   :  { %v3779_v58 = vpack.c.bf16 %v3777_v22, %v3776_v47  ;;  %v3793_v47 = vld [vmem:[#allocation2 + $0x158] sm:$0xff] }
 0x993   :  { %v3778_v10 = vpack.c.bf16 %v3775_v4, %v3774_v19  ;;  %v3791_v4 = vld [vmem:[#allocation2 + $0x148] sm:$0xff] }
 0x994   :  { %3781 = vst.msk [vmem:[#allocation3 + $0x18] sm:$0xff] %vm230_vm2, %v3779_v58 }
 0x995   :  { %3780 = vst.msk [vmem:[#allocation3 + $0x10] sm:$0xff] %vm230_vm2, %v3778_v10  ;;  %5477 = vmatprep.subr.bf16.mxu1 %v3778_v10 }
 0x996   :  { %5478 = vmatpush3.bf16.msra.mxu1 %v3778_v10 }
 0x997   :  { %5479 = vmatprep.subr.bf16.mxu1 %v3779_v58 }
 0x99a   :  { %5480 = vmatpush3.bf16.msra.mxu1 %v3779_v58 }
 0x99d   :  { %5482 = vmatmul.mubr.msk.bf16.vlgmr.msra.gmra.mrb[128].mxu1 %vm1680_vm6, %v7757_v21 }
 0x99e   :  { %5485 = vmatprep.mubr.msk.bf16.mxu1 %vm1680_vm6, %v7764_v34 }
 0x9a5   :  { %5486 = vmatmul.mubr.msk.bf16.gmra.mrb[132].mxu1 %vm1680_vm6, %v7771_v15 }
 0x9a6   :  { %5489 = vmatprep.mubr.msk.bf16.mxu1 %vm1680_vm6, %v7778_v35 }
 0x9ad   :  { %5490 = vmatmul.mubr.msk.bf16.gmra.mrb[136].mxu1 %vm1680_vm6, %v7785_v45 }
 0x9ae   :  { %5493 = vmatprep.mubr.msk.bf16.mxu1 %vm1680_vm6, %v7792_v3 }
 0x9b5   :  { %5494 = vmatmul.mubr.msk.bf16.gmra.mrb[140].mxu1 %vm1680_vm6, %v7799_v26 }
 0xa70   :  { %v5483_v63 = vpop.f32.mrb[128].mxu1 }
 0xa71   :  { %v3897_v25 = vadd.f32 %v5483_v63, %v3784_v43  ;;  %v3832_v7 = vpop.f32.mrb[129].mxu1 }
 0xa72   :  { %v3895_v8 = vadd.f32 %v3832_v7, %v3782_v36  ;;  %v5484_v2 = vpop.f32.mrb[130].mxu1 }
 0xa73   :  { %v4851_v28 = vmul.f32 -1.442695, %v3897_v25  ;;  %v3898_v9 = vadd.f32 %v5484_v2, %v3785_v29  ;;  %v3835_v6 = vpop.f32.mrb[131].mxu1  ;;  %v3796_v25 = vld [vmem:[#allocation2 + $0x170] sm:$0xff]  ;;  %v3794_v2 = vld [vmem:[#allocation2 + $0x160] sm:$0xff] }
 0xa74   :  { %v4849_v54 = vmul.f32 -1.442695, %v3895_v8  ;;  %v3896_v56 = vadd.f32 %v3835_v6, %v3783_v24 }
 0xa75   :  { %6091 = vpow2.f32 %v4851_v28  ;;  %v4852_v57 = vmul.f32 -1.442695, %v3898_v9 }
 0xa76   :  { %6093 = vpow2.f32 %v4849_v54  ;;  %v4850_v39 = vmul.f32 -1.442695, %v3896_v56  ;;  %v3797_v54 = vld [vmem:[#allocation2 + $0x178] sm:$0xff] }
 0xa77   :  { %6095 = vpow2.f32 %v4852_v57 }
 0xa78   :  { %6097 = vpow2.f32 %v4850_v39  ;;  %v5487_v33 = vpop.f32.mrb[132].mxu1 }
 0xa79   :  { %v3901_v40 = vadd.f32 %v5487_v33, %v3788_v44  ;;  %v3848_v11 = vpop.f32.mrb[133].mxu1  ;;  %v3795_v33 = vld [vmem:[#allocation2 + $0x168] sm:$0xff] }
 0xa7a   :  { %v3899_v60 = vadd.f32 %v3848_v11, %v3786_v62  ;;  %v5488_v49 = vpop.f32.mrb[134].mxu1 }
 0xa7b   :  { %v4855_v13 = vmul.f32 -1.442695, %v3901_v40  ;;  %v3902_v38 = vadd.f32 %v5488_v49, %v3789_v12  ;;  %v3851_v31 = vpop.f32.mrb[135].mxu1 }
 0xa7c   :  { %v4853_v42 = vmul.f32 -1.442695, %v3899_v60  ;;  %v3900_v51 = vadd.f32 %v3851_v31, %v3787_v50 }
 0xa7d   :  { %6099 = vpow2.f32 %v4855_v13  ;;  %v4856_v41 = vmul.f32 -1.442695, %v3902_v38 }
 0xa7e   :  { %6101 = vpow2.f32 %v4853_v42  ;;  %v4854_v18 = vmul.f32 -1.442695, %v3900_v51 }
 0xa7f   :  { %v6092_v0 = vpop.eup %6091  ;;  %6103 = vpow2.f32 %v4856_v41 }
 0xa80   :  { %v6094_v27 = vpop.eup %6093  ;;  %v3925_v48 = vadd.f32 1.0, %v6092_v0  ;;  %6105 = vpow2.f32 %v4854_v18  ;;  %v5491_v46 = vpop.f32.mrb[136].mxu1 }
 0xa81   :  { %v6096_v5 = vpop.eup %6095  ;;  %v3923_v1 = vadd.f32 1.0, %v6094_v27  ;;  %v3864_v20 = vpop.f32.mrb[137].mxu1  ;;  %v3905_v14 = vadd.f32 %v5491_v46, %v3792_v32 }
 0xa82   :  { %v6098_v16 = vpop.eup %6097  ;;  %6107 = vrcp.f32 %v3925_v48  ;;  %v3926_v23 = vadd.f32 1.0, %v6096_v5  ;;  %v5492_v55 = vpop.f32.mrb[138].mxu1  ;;  %v3903_v17 = vadd.f32 %v3864_v20, %v3790_v30 }
 0xa83   :  { %6109 = vrcp.f32 %v3923_v1  ;;  %v3924_v37 = vadd.f32 1.0, %v6098_v16  ;;  %v3867_v22 = vpop.f32.mrb[139].mxu1  ;;  %v3906_v19 = vadd.f32 %v5492_v55, %v3793_v47 }
 0xa84   :  { %6111 = vrcp.f32 %v3926_v23  ;;  %v3904_v58 = vadd.f32 %v3867_v22, %v3791_v4 }
 0xa85   :  { %6113 = vrcp.f32 %v3924_v37 }
 0xa86   :  { %6115 = vtanh.f32 %v3905_v14 }
 0xa87   :  { %v6100_v10 = vpop.eup %6099  ;;  %6117 = vtanh.f32 %v3903_v17 }
 0xa88   :  { %v6102_v43 = vpop.eup %6101  ;;  %v3949_v63 = vadd.f32 1.0, %v6100_v10  ;;  %6119 = vtanh.f32 %v3906_v19  ;;  %v5495_v36 = vpop.f32.mrb[140].mxu1 }
 0xa89   :  { %v6104_v7 = vpop.eup %6103  ;;  %v3947_v8 = vadd.f32 1.0, %v6102_v43  ;;  %6121 = vtanh.f32 %v3904_v58  ;;  %v3909_v29 = vadd.f32 %v5495_v36, %v3796_v25  ;;  %v3880_v28 = vpop.f32.mrb[141].mxu1 }
 0xa8a   :  { %v6106_v9 = vpop.eup %6105  ;;  %6123 = vrcp.f32 %v3949_v63  ;;  %v3950_v24 = vadd.f32 1.0, %v6104_v7  ;;  %v3907_v6 = vadd.f32 %v3880_v28, %v3794_v2  ;;  %v5496_v56 = vpop.f32.mrb[142].mxu1 }
 0xa8b   :  { %6125 = vrcp.f32 %v3947_v8  ;;  %v3948_v57 = vadd.f32 1.0, %v6106_v9  ;;  %v4859_v39 = vmul.f32 -1.442695, %v3909_v29  ;;  %v3910_v44 = vadd.f32 %v5496_v56, %v3797_v54  ;;  %v3883_v40 = vpop.f32.mrb[143].mxu1  ;;  %v4011_v56 = vld [vmem:[#allocation2 + $0x180] sm:$0xff] }
 0xa8c   :  { %v6108_v62 = vpop.eup %6107  ;;  %6127 = vrcp.f32 %v3950_v24  ;;  %v4857_v11 = vmul.f32 -1.442695, %v3907_v6  ;;  %v3908_v60 = vadd.f32 %v3883_v40, %v3795_v33 }
 0xa8d   :  { %v6110_v12 = vpop.eup %6109  ;;  %6129 = vrcp.f32 %v3948_v57  ;;  %v4860_v49 = vmul.f32 -1.442695, %v3910_v44 }
 0xa8e   :  { %v6112_v13 = vpop.eup %6111  ;;  %6131 = vpow2.f32 %v4859_v39  ;;  %v4858_v38 = vmul.f32 -1.442695, %v3908_v60  ;;  %v4014_v39 = vld [vmem:[#allocation2 + $0x198] sm:$0xff] }
 0xa8f   :  { %v6114_v50 = vpop.eup %6113  ;;  %6133 = vpow2.f32 %v4857_v11 }
 0xa90   :  { %v6116_v31 = vpop.eup %6115  ;;  %6135 = vpow2.f32 %v4860_v49 }
 0xa91   :  { %v6118_v42 = vpop.eup %6117  ;;  %v3993_v51 = vmul.f32 %v6116_v31, %v6108_v62  ;;  %6137 = vpow2.f32 %v4858_v38  ;;  %v4015_v38 = vld [vmem:[#allocation2 + $0x1a0] sm:$0xff] }
 0xa92   :  { %v6120_v41 = vpop.eup %6119  ;;  %v3991_v18 = vmul.f32 %v6118_v42, %v6110_v12  ;;  %v4017_v12 = vld [vmem:[#allocation2 + $0x1b0] sm:$0xff]  ;;  %v4018_v42 = vld [vmem:[#allocation2 + $0x1b8] sm:$0xff] }
 0xa93   :  { %v6122_v0 = vpop.eup %6121  ;;  %v3994_v27 = vmul.f32 %v6120_v41, %v6112_v13 }
 0xa94   :  { %v6124_v48 = vpop.eup %6123  ;;  %v3992_v46 = vmul.f32 %v6122_v0, %v6114_v50  ;;  %v4016_v0 = vld [vmem:[#allocation2 + $0x1a8] sm:$0xff] }
 0xa95   :  { %v6126_v5 = vpop.eup %6125  ;;  %v3989_v1 = vmul.f32 %v6124_v48, %v7739_v52 }
 0xa96   :  { %v6128_v32 = vpop.eup %6127  ;;  %v3987_v20 = vmul.f32 %v6126_v5, %v7742_v53 }
 0xa97   :  { %v6130_v16 = vpop.eup %6129  ;;  %v3990_v23 = vmul.f32 %v6128_v32, %v7745_v61  ;;  %v7806_v14 = vadd.f32 %v3993_v51, %v3989_v1 }
 0xa98   :  { %v6132_v30 = vpop.eup %6131  ;;  %v3988_v55 = vmul.f32 %v6130_v16, %v7748_v59  ;;  %v7809_v37 = vadd.f32 %v3991_v18, %v3987_v20 }
 0xa99   :  { %v6134_v17 = vpop.eup %6133  ;;  %6139 = vtanh.f32 %v7806_v14  ;;  %v7812_v47 = vadd.f32 %v3994_v27, %v3990_v23  ;;  %v3977_v22 = vadd.f32 1.0, %v6132_v30 }
 0xa9a   :  { %v6136_v52 = vpop.eup %6135  ;;  %6141 = vtanh.f32 %v7809_v37  ;;  %v7815_v53 = vadd.f32 %v3992_v46, %v3988_v55  ;;  %v3975_v19 = vadd.f32 1.0, %v6134_v17  ;;  %v4021_v17 = vld [vmem:[#allocation2 + $0x1d0] sm:$0xff] }
 0xa9b   :  { %v6138_v61 = vpop.eup %6137  ;;  %6143 = vtanh.f32 %v7812_v47  ;;  %v3978_v4 = vadd.f32 1.0, %v6136_v52 }
 0xa9c   :  { %6145 = vtanh.f32 %v7815_v53  ;;  %v3976_v59 = vadd.f32 1.0, %v6138_v61 }
 0xa9d   :  { %6147 = vrcp.f32 %v3977_v22 }
 0xa9e   :  { %6149 = vrcp.f32 %v3975_v19 }
 0xa9f   :  { %6151 = vrcp.f32 %v3978_v4  ;;  %v4019_v4 = vld [vmem:[#allocation2 + $0x1c0] sm:$0xff] }
 0xaa0   :  { %6153 = vrcp.f32 %v3976_v59 }
 0xaa3   :  { %v6140_v58 = vpop.eup %6139 }
 0xaa4   :  { %v6142_v10 = vpop.eup %6141 }
 0xaa5   :  { %v6144_v43 = vpop.eup %6143 }
 0xaa6   :  { %v6146_v63 = vpop.eup %6145 }
 0xaa7   :  { %v6148_v25 = vpop.eup %6147 }
 0xaa8   :  { %v6150_v36 = vpop.eup %6149  ;;  %v4005_v29 = vmul.f32 %v6148_v25, %v6140_v58 }
 0xaa9   :  { %v6152_v7 = vpop.eup %6151  ;;  %v4003_v28 = vmul.f32 %v6150_v36, %v6142_v10  ;;  %v4020_v36 = vld [vmem:[#allocation2 + $0x1c8] sm:$0xff] }
 0xaaa   :  { %v6154_v8 = vpop.eup %6153  ;;  %v4006_v2 = vmul.f32 %v6152_v7, %v6144_v43  ;;  %v4022_v43 = vld [vmem:[#allocation2 + $0x1d8] sm:$0xff] }
 0xaab   :  { %v4004_v9 = vmul.f32 %v6154_v8, %v6146_v63 }
 0xaac   :  { %v4008_v24 = vpack.c.bf16 %v4006_v2, %v4005_v29 }
 0xaad   :  { %v4007_v6 = vpack.c.bf16 %v4004_v9, %v4003_v28  ;;  %v4025_v28 = vld [vmem:[#allocation2 + $0x1f0] sm:$0xff] }
 0xaae   :  { %4010 = vst.msk [vmem:[#allocation3 + $0x28] sm:$0xff] %vm230_vm2, %v4008_v24 }
 0xaaf   :  { %4009 = vst.msk [vmem:[#allocation3 + $0x20] sm:$0xff] %vm230_vm2, %v4007_v6  ;;  %5497 = vmatprep.subr.bf16.mxu0 %v4007_v6 }
 0xab0   :  { %5498 = vmatpush3.bf16.msra.mxu0 %v4007_v6 }
 0xab1   :  { %5499 = vmatprep.subr.bf16.mxu0 %v4008_v24 }
 0xab4   :  { %5500 = vmatpush3.bf16.msra.mxu0 %v4008_v24 }
 0xab7   :  { %5502 = vmatmul.mubr.msk.bf16.vlgmr.msra.gmra.mrb[160].mxu0 %vm1680_vm6, %v7757_v21  ;;  %v5698_v21 = vld [vmem:[%s7911_s11] sm:$0xff]  }
 0xab8   :  { %5505 = vmatprep.mubr.msk.bf16.mxu0 %vm1680_vm6, %v7764_v34  ;;  %5521 = vmatprep.mubr.msk.bf16.mxu1 %vm1680_vm6, %v5698_v21  ;;  %v4013_v34 = vld [vmem:[#allocation2 + $0x190] sm:$0xff] }
 0xabf   :  { %5506 = vmatmul.mubr.msk.bf16.gmra.mrb[164].mxu0 %vm1680_vm6, %v7771_v15 }
 0xac0   :  { %5509 = vmatprep.mubr.msk.bf16.mxu0 %vm1680_vm6, %v7778_v35 }
 0xac7   :  { %5510 = vmatmul.mubr.msk.bf16.gmra.mrb[168].mxu0 %vm1680_vm6, %v7785_v45 }
 0xac8   :  { %5513 = vmatprep.mubr.msk.bf16.mxu0 %vm1680_vm6, %v7792_v3  ;;  %v4012_v3 = vld [vmem:[#allocation2 + $0x188] sm:$0xff] }
 0xacf   :  { %5514 = vmatmul.mubr.msk.bf16.gmra.mrb[172].mxu0 %vm1680_vm6, %v7799_v26 }
 0xb8a   :  { %v5503_v15 = vpop.f32.mrb[160].mxu0 }
 0xb8b   :  { %v4126_v54 = vadd.f32 %v5503_v15, %v4013_v34  ;;  %v4061_v35 = vpop.f32.mrb[161].mxu0  ;;  %v4023_v34 = vld [vmem:[#allocation2 + $0x1e0] sm:$0xff] }
 0xb8c   :  { %v4124_v57 = vadd.f32 %v4061_v35, %v4011_v56  ;;  %v5504_v45 = vpop.f32.mrb[162].mxu0 }
 0xb8d   :  { %v4871_v44 = vmul.f32 -1.442695, %v4126_v54  ;;  %v4127_v33 = vadd.f32 %v5504_v45, %v4014_v39  ;;  %v4064_v40 = vpop.f32.mrb[163].mxu0 }
 0xb8e   :  { %v4869_v62 = vmul.f32 -1.442695, %v4124_v57  ;;  %v4125_v26 = vadd.f32 %v4064_v40, %v4012_v3  ;;  %v4026_v57 = vld [vmem:[#allocation2 + $0x1f8] sm:$0xff]  ;;  %v4024_v3 = vld [vmem:[#allocation2 + $0x1e8] sm:$0xff] }
 0xb8f   :  { %6155 = vpow2.f32 %v4871_v44  ;;  %v4872_v11 = vmul.f32 -1.442695, %v4127_v33 }
 0xb90   :  { %6157 = vpow2.f32 %v4869_v62  ;;  %v4870_v60 = vmul.f32 -1.442695, %v4125_v26 }
 0xb91   :  { %6159 = vpow2.f32 %v4872_v11 }
 0xb92   :  { %6161 = vpow2.f32 %v4870_v60  ;;  %v5507_v49 = vpop.f32.mrb[164].mxu0 }
 0xb93   :  { %v4130_v13 = vadd.f32 %v5507_v49, %v4017_v12  ;;  %v4077_v50 = vpop.f32.mrb[165].mxu0 }
 0xb94   :  { %v4128_v31 = vadd.f32 %v4077_v50, %v4015_v38  ;;  %v5508_v51 = vpop.f32.mrb[166].mxu0 }
 0xb95   :  { %v4875_v41 = vmul.f32 -1.442695, %v4130_v13  ;;  %v4131_v18 = vadd.f32 %v5508_v51, %v4018_v42  ;;  %v4080_v27 = vpop.f32.mrb[167].mxu0 }
 0xb96   :  { %v4873_v48 = vmul.f32 -1.442695, %v4128_v31  ;;  %v4129_v46 = vadd.f32 %v4080_v27, %v4016_v0 }
 0xb97   :  { %6163 = vpow2.f32 %v4875_v41  ;;  %v4876_v5 = vmul.f32 -1.442695, %v4131_v18 }
 0xb98   :  { %6165 = vpow2.f32 %v4873_v48  ;;  %v4874_v1 = vmul.f32 -1.442695, %v4129_v46 }
 0xb99   :  { %v6156_v32 = vpop.eup %6155  ;;  %6167 = vpow2.f32 %v4876_v5 }
 0xb9a   :  { %v6158_v20 = vpop.eup %6157  ;;  %v4154_v16 = vadd.f32 1.0, %v6156_v32  ;;  %6169 = vpow2.f32 %v4874_v1  ;;  %v5511_v23 = vpop.f32.mrb[168].mxu0 }
 0xb9b   :  { %v6160_v30 = vpop.eup %6159  ;;  %v4152_v55 = vadd.f32 1.0, %v6158_v20  ;;  %v4093_v22 = vpop.f32.mrb[169].mxu0  ;;  %v4134_v61 = vadd.f32 %v5511_v23, %v4021_v17 }
 0xb9c   :  { %v6162_v52 = vpop.eup %6161  ;;  %6171 = vrcp.f32 %v4154_v16  ;;  %v4155_v19 = vadd.f32 1.0, %v6160_v30  ;;  %v5512_v59 = vpop.f32.mrb[170].mxu0  ;;  %v4132_v10 = vadd.f32 %v4093_v22, %v4019_v4 }
 0xb9d   :  { %6173 = vrcp.f32 %v4152_v55  ;;  %v4153_v58 = vadd.f32 1.0, %v6162_v52  ;;  %v4096_v63 = vpop.f32.mrb[171].mxu0  ;;  %v4135_v25 = vadd.f32 %v5512_v59, %v4022_v43 }
 0xb9e   :  { %6175 = vrcp.f32 %v4155_v19  ;;  %v4133_v7 = vadd.f32 %v4096_v63, %v4020_v36 }
 0xb9f   :  { %6177 = vrcp.f32 %v4153_v58 }
 0xba0   :  { %6179 = vtanh.f32 %v4134_v61 }
 0xba1   :  { %v6164_v8 = vpop.eup %6163  ;;  %6181 = vtanh.f32 %v4132_v10 }
 0xba2   :  { %v6166_v29 = vpop.eup %6165  ;;  %v4178_v2 = vadd.f32 1.0, %v6164_v8  ;;  %6183 = vtanh.f32 %v4135_v25  ;;  %v5515_v9 = vpop.f32.mrb[172].mxu0 }
 0xba3   :  { %v6168_v24 = vpop.eup %6167  ;;  %v4176_v6 = vadd.f32 1.0, %v6166_v29  ;;  %6185 = vtanh.f32 %v4133_v7  ;;  %v4138_v21 = vadd.f32 %v5515_v9, %v4025_v28  ;;  %v4109_v15 = vpop.f32.mrb[173].mxu0 }
 0xba4   :  { %v6170_v54 = vpop.eup %6169  ;;  %6187 = vrcp.f32 %v4178_v2  ;;  %v4179_v56 = vadd.f32 1.0, %v6168_v24  ;;  %v4136_v35 = vadd.f32 %v4109_v15, %v4023_v34  ;;  %v5516_v39 = vpop.f32.mrb[174].mxu0  ;;  %v5701_v34 = vld [vmem:[%s7911_s11 + $0x18] sm:$0xff]   ;;  %v5702_v15 = vld [vmem:[%s7911_s11 + $0x20] sm:$0xff]  }
 0xba5   :  { %6189 = vrcp.f32 %v4176_v6  ;;  %v4177_v45 = vadd.f32 1.0, %v6170_v54  ;;  %v4879_v44 = vmul.f32 -1.442695, %v4138_v21  ;;  %v4139_v33 = vadd.f32 %v5516_v39, %v4026_v57  ;;  %v4112_v40 = vpop.f32.mrb[175].mxu0  ;;  %v5699_v6 = vld [vmem:[%s7911_s11 + $0x8] sm:$0xff]   ;;  %v5700_v21 = vld [vmem:[%s7911_s11 + $0x10] sm:$0xff]   ;;  %v4275_v39 = vpop.permute.xlu1 %4274 }
 0xba6   :  { %v6172_v62 = vpop.eup %6171  ;;  %6191 = vrcp.f32 %v4179_v56  ;;  %v4877_v26 = vmul.f32 -1.442695, %v4136_v35  ;;  %v4137_v11 = vadd.f32 %v4112_v40, %v4024_v3  ;;  %v5703_v54 = vld [vmem:[%s7911_s11 + $0x28] sm:$0xff]   ;;  %v5704_v56 = vld [vmem:[%s7911_s11 + $0x30] sm:$0xff]   ;;  %v5705_v35 = vld [vmem:[%s7911_s11 + $0x38] sm:$0xff]   ;;  %v6270_v57 = vmov 0.0  }
 0xba7   :  { %v6174_v60 = vpop.eup %6173  ;;  %6193 = vrcp.f32 %v4177_v45  ;;  %v4880_v12 = vmul.f32 -1.442695, %v4139_v33  ;;  %5537 = vmatprep.subr.bf16.mxu0 %v6270_v57  ;;  %5553 = vmatprep.mubr.msk.bf16.mxu0 %vm6271_vm7, %v6270_v57 }
 0xba8   :  { %v6176_v49 = vpop.eup %6175  ;;  %6195 = vpow2.f32 %v4879_v44  ;;  %v4878_v13 = vmul.f32 -1.442695, %v4137_v11 }
 0xba9   :  { %v6178_v38 = vpop.eup %6177  ;;  %6197 = vpow2.f32 %v4877_v26  ;;  %v4280_v45 = vpop.permute.xlu1 %4279 }
 0xbaa   :  { %v6180_v50 = vpop.eup %6179  ;;  %6199 = vpow2.f32 %v4880_v12 }
 0xbab   :  { %v6182_v31 = vpop.eup %6181  ;;  %v4222_v42 = vmul.f32 %v6180_v50, %v6172_v62  ;;  %6201 = vpow2.f32 %v4878_v13 }
 0xbac   :  { %v6184_v51 = vpop.eup %6183  ;;  %v4220_v41 = vmul.f32 %v6182_v31, %v6174_v60 }
 0xbad   :  { %v6186_v18 = vpop.eup %6185  ;;  %v4223_v0 = vmul.f32 %v6184_v51, %v6176_v49  ;;  %v4285_v44 = vpop.permute.xlu1 %4284 }
 0xbae   :  { %v6188_v27 = vpop.eup %6187  ;;  %v4221_v48 = vmul.f32 %v6186_v18, %v6178_v38 }
 0xbaf   :  { %v6190_v46 = vpop.eup %6189  ;;  %v4218_v5 = vmul.f32 %v6188_v27, %v7806_v14 }
 0xbb0   :  { %v6192_v1 = vpop.eup %6191  ;;  %v4216_v32 = vmul.f32 %v6190_v46, %v7809_v37 }
 0xbb1   :  { %v6194_v20 = vpop.eup %6193  ;;  %v4219_v16 = vmul.f32 %v6192_v1, %v7812_v47  ;;  %v4226_v23 = vadd.f32 %v4222_v42, %v4218_v5  ;;  %v4290_v33 = vpop.permute.xlu1 %4289 }
 0xbb2   :  { %v6196_v30 = vpop.eup %6195  ;;  %v4217_v55 = vmul.f32 %v6194_v20, %v7815_v53  ;;  %v4224_v17 = vadd.f32 %v4220_v41, %v4216_v32 }
 0xbb3   :  { %v6198_v22 = vpop.eup %6197  ;;  %6203 = vtanh.f32 %v4226_v23  ;;  %v4227_v52 = vadd.f32 %v4223_v0, %v4219_v16  ;;  %v4206_v19 = vadd.f32 1.0, %v6196_v30 }
 0xbb4   :  { %v6200_v61 = vpop.eup %6199  ;;  %6205 = vtanh.f32 %v4224_v17  ;;  %v4225_v4 = vadd.f32 %v4221_v48, %v4217_v55  ;;  %v4204_v59 = vadd.f32 1.0, %v6198_v22 }
 0xbb5   :  { %v6202_v14 = vpop.eup %6201  ;;  %6207 = vtanh.f32 %v4227_v52  ;;  %v4207_v58 = vadd.f32 1.0, %v6200_v61  ;;  %v4295_v3 = vpop.permute.xlu1 %4294 }
 0xbb6   :  { %6209 = vtanh.f32 %v4225_v4  ;;  %v4205_v37 = vadd.f32 1.0, %v6202_v14 }
 0xbb7   :  { %6211 = vrcp.f32 %v4206_v19 }
 0xbb8   :  { %6213 = vrcp.f32 %v4204_v59 }
 0xbb9   :  { %6215 = vrcp.f32 %v4207_v58  ;;  %v4300_v40 = vpop.permute.xlu1 %4299 }
 0xbba   :  { %6217 = vrcp.f32 %v4205_v37 }
 0xbbd   :  { %v6204_v47 = vpop.eup %6203  ;;  %v4305_v62 = vpop.permute.xlu1 %4304 }
 0xbbe   :  { %v6206_v53 = vpop.eup %6205 }
 0xbbf   :  { %v6208_v10 = vpop.eup %6207 }
 0xbc0   :  { %v6210_v43 = vpop.eup %6209 }
 0xbc1   :  { %v6212_v63 = vpop.eup %6211  ;;  %v4310_v26 = vpop.permute.xlu1 %4309 }
 0xbc2   :  { %v6214_v25 = vpop.eup %6213  ;;  %v4234_v36 = vmul.f32 %v6212_v63, %v6204_v47 }
 0xbc3   :  { %v6216_v7 = vpop.eup %6215  ;;  %v4232_v8 = vmul.f32 %v6214_v25, %v6206_v53 }
 0xbc4   :  { %v6218_v29 = vpop.eup %6217  ;;  %v4235_v2 = vmul.f32 %v6216_v7, %v6208_v10 }
 0xbc5   :  { %v4233_v28 = vmul.f32 %v6218_v29, %v6210_v43  ;;  %v4315_v11 = vpop.permute.xlu1 %4314 }
 0xbc6   :  { %v4237_v9 = vpack.c.bf16 %v4235_v2, %v4234_v36 }
 0xbc7   :  { %v4236_v24 = vpack.c.bf16 %v4233_v28, %v4232_v8 }
 0xbc8   :  { %4239 = vst.msk [vmem:[#allocation3 + $0x38] sm:$0xff] %vm230_vm2, %v4237_v9 }
 0xbc9   :  { %4238 = vst.msk [vmem:[#allocation3 + $0x30] sm:$0xff] %vm230_vm2, %v4236_v24  ;;  %5517 = vmatprep.subr.bf16.mxu1 %v4236_v24  ;;  %v4320_v60 = vpop.permute.xlu1 %4319 }
 0xbca   :  { %5518 = vmatpush3.bf16.msra.mxu1 %v4236_v24 }
 0xbcb   :  { %5519 = vmatprep.subr.bf16.mxu1 %v4237_v9 }
 0xbcd   :  { %v4325_v12 = vpop.permute.xlu1 %4324 }
 0xbce   :  { %5520 = vmatpush3.bf16.msra.mxu1 %v4237_v9 }
 0xbd1   :  { %5522 = vmatmul.mubr.msk.bf16.vlgmr.msra.gmra.mrb[144].mxu1 %vm1680_vm6, %v5699_v6  ;;  %v4330_v50 = vpop.permute.xlu1 %4329 }
 0xbd2   :  { %5525 = vmatprep.mubr.msk.bf16.mxu1 %vm1680_vm6, %v5700_v21 }
 0xbd5   :  { %v4335_v1 = vpop.permute.xlu1 %4334 }
 0xbd9   :  { %5526 = vmatmul.mubr.msk.bf16.gmra.mrb[148].mxu1 %vm1680_vm6, %v5701_v34  ;;  %v4340_v4 = vpop.permute.xlu1 %4339 }
 0xbda   :  { %5529 = vmatprep.mubr.msk.bf16.mxu1 %vm1680_vm6, %v5702_v15 }
 0xbdd   :  { %v4345_v7 = vpop.permute.xlu1 %4344 }
 0xbe1   :  { %5530 = vmatmul.mubr.msk.bf16.gmra.mrb[152].mxu1 %vm1680_vm6, %v5703_v54  ;;  %v4350_v54 = vpop.permute.xlu1 %4349 }
 0xbe2   :  { %5533 = vmatprep.mubr.msk.bf16.mxu1 %vm1680_vm6, %v5704_v56 }
 0xbe9   :  { %5534 = vmatmul.mubr.msk.bf16.gmra.mrb[156].mxu1 %vm1680_vm6, %v5705_v35 }
 0xca4   :  { %v5523_v49 = vpop.f32.mrb[144].mxu1 }
 0xca5   :  { %v4459_v13 = vadd.f32 %v5523_v49, %v4285_v44  ;;  %v4450_v38 = vpop.f32.mrb[145].mxu1 }
 0xca6   :  { %v4451_v31 = vadd.f32 %v4450_v38, %v4275_v39  ;;  %v5524_v42 = vpop.f32.mrb[146].mxu1 }
 0xca7   :  { %v4462_v51 = vadd.f32 %v5524_v42, %v4290_v33  ;;  %v4453_v41 = vpop.f32.mrb[147].mxu1  ;;  %v4515_v0 = vmax.f32 %v4459_v13, 0.0 }
 0xca8   :  { %v4454_v18 = vadd.f32 %v4453_v41, %v4280_v45  ;;  %v4513_v48 = vmax.f32 %v4451_v31, 0.0 }
 0xca9   :  { %v4516_v27 = vmax.f32 %v4462_v51, 0.0 }
 0xcaa   :  { %v4514_v46 = vmax.f32 %v4454_v18, 0.0 }
 0xcab   :  { %v4532_v5 = vpack.c.bf16 %v4516_v27, %v4515_v0 }
 0xcac   :  { %v4531_v32 = vpack.c.bf16 %v4514_v46, %v4513_v48  ;;  %v5527_v20 = vpop.f32.mrb[148].mxu1 }
 0xcad   :  { %v4475_v16 = vadd.f32 %v5527_v20, %v4305_v62  ;;  %v4466_v23 = vpop.f32.mrb[149].mxu1 }
 0xcae   :  { %v4467_v30 = vadd.f32 %v4466_v23, %v4295_v3  ;;  %v5528_v55 = vpop.f32.mrb[150].mxu1  ;;  %5538 = vmatpush3.bf16.msra.mxu0 %v4531_v32 }
 0xcaf   :  { %v4478_v17 = vadd.f32 %v5528_v55, %v4310_v26  ;;  %v4469_v22 = vpop.f32.mrb[151].mxu1  ;;  %5539 = vmatprep.subr.bf16.mxu0 %v6270_v57  ;;  %v4519_v19 = vmax.f32 %v4475_v16, 0.0 }
 0xcb0   :  { %v4470_v52 = vadd.f32 %v4469_v22, %v4300_v40  ;;  %v4517_v59 = vmax.f32 %v4467_v30, 0.0 }
 0xcb1   :  { %v4520_v61 = vmax.f32 %v4478_v17, 0.0 }
 0xcb2   :  { %v4518_v14 = vmax.f32 %v4470_v52, 0.0  ;;  %5540 = vmatpush3.bf16.msra.mxu0 %v4532_v5 }
 0xcb3   :  { %v4534_v58 = vpack.c.bf16 %v4520_v61, %v4519_v19  ;;  %5541 = vmatprep.subr.bf16.mxu0 %v6270_v57 }
 0xcb4   :  { %v4533_v37 = vpack.c.bf16 %v4518_v14, %v4517_v59  ;;  %v5531_v47 = vpop.f32.mrb[152].mxu1 }
 0xcb5   :  { %v4491_v53 = vadd.f32 %v5531_v47, %v4325_v12  ;;  %v4482_v10 = vpop.f32.mrb[153].mxu1  ;;  %v4544_v12 = vpop.permute.xlu1 %4543 }
 0xcb6   :  { %v4483_v43 = vadd.f32 %v4482_v10, %v4315_v11  ;;  %v5532_v63 = vpop.f32.mrb[154].mxu1  ;;  %5542 = vmatpush3.bf16.msra.mxu0 %v4533_v37 }
 0xcb7   :  { %v4494_v25 = vadd.f32 %v5532_v63, %v4330_v50  ;;  %v4485_v36 = vpop.f32.mrb[155].mxu1  ;;  %5543 = vmatprep.subr.bf16.mxu0 %v6270_v57  ;;  %v4523_v29 = vmax.f32 %v4491_v53, 0.0 }
 0xcb8   :  { %v4486_v8 = vadd.f32 %v4485_v36, %v4320_v60  ;;  %v4521_v28 = vmax.f32 %v4483_v43, 0.0  ;;  %v5706_v60 = vld [vmem:[%s7913_s13] sm:$0xff]  }
 0xcb9   :  { %v4524_v2 = vmax.f32 %v4494_v25, 0.0  ;;  %v4549_v50 = vpop.permute.xlu1 %4548 }
 0xcba   :  { %v4522_v9 = vmax.f32 %v4486_v8, 0.0  ;;  %5544 = vmatpush3.bf16.msra.mxu0 %v4534_v58 }
 0xcbb   :  { %v4536_v24 = vpack.c.bf16 %v4524_v2, %v4523_v29  ;;  %5545 = vmatprep.subr.bf16.mxu0 %v6270_v57 }
 0xcbc   :  { %v4535_v6 = vpack.c.bf16 %v4522_v9, %v4521_v28  ;;  %v5535_v21 = vpop.f32.mrb[156].mxu1 }
 0xcbd   :  { %v4507_v34 = vadd.f32 %v5535_v21, %v4345_v7  ;;  %v4498_v15 = vpop.f32.mrb[157].mxu1 }
 0xcbe   :  { %v4499_v56 = vadd.f32 %v4498_v15, %v4335_v1  ;;  %v5536_v35 = vpop.f32.mrb[158].mxu1  ;;  %5546 = vmatpush3.bf16.msra.mxu0 %v4535_v6 }
 0xcbf   :  { %v4510_v39 = vadd.f32 %v5536_v35, %v4350_v54  ;;  %v4501_v45 = vpop.f32.mrb[159].mxu1  ;;  %5547 = vmatprep.subr.bf16.mxu0 %v6270_v57  ;;  %v4527_v33 = vmax.f32 %v4507_v34, 0.0 }
 0xcc0   :  { %v4502_v44 = vadd.f32 %v4501_v45, %v4340_v4  ;;  %v4525_v40 = vmax.f32 %v4499_v56, 0.0 }
 0xcc1   :  { %v4528_v3 = vmax.f32 %v4510_v39, 0.0 }
 0xcc2   :  { %v4526_v62 = vmax.f32 %v4502_v44, 0.0  ;;  %5548 = vmatpush3.bf16.msra.mxu0 %v4536_v24 }
 0xcc3   :  { %v4538_v26 = vpack.c.bf16 %v4528_v3, %v4527_v33  ;;  %5549 = vmatprep.subr.bf16.mxu0 %v6270_v57 }
 0xcc4   :  { %v4537_v11 = vpack.c.bf16 %v4526_v62, %v4525_v40 }
 0xcc6   :  { %5550 = vmatpush3.bf16.msra.mxu0 %v4537_v11 }
 0xcc7   :  { %5551 = vmatprep.subr.bf16.mxu0 %v6270_v57 }
 0xcca   :  { %5552 = vmatpush3.bf16.msra.mxu0 %v4538_v26 }
 0xccd   :  { %5554 = vmatmul.mubr.bf16.vlgmr.msra.gmra.mrb[176].mxu0 %v5706_v60 }
 0xda0   :  { %v4591_v49 = vpop.f32.mrb[176].mxu0 }
 0xda1   :  { %v4592_v13 = vadd.f32 %v4591_v49, %v4544_v12  ;;  %v5555_v38 = vpop.f32.mrb[177].mxu0 }
 0xda2   :  { %v4594_v31 = vpop.f32.mrb[178].mxu0 }
 0xda3   :  { %4598 = vst.msk [vmem:[#allocation4] sm:$0xff] %vm230_vm2, %v4592_v13  ;;  %v4595_v42 = vadd.f32 %v4594_v31, %v4549_v50  ;;  %v5556_v51 = vpop.f32.mrb[179].mxu0 }
 0xda5   :  { %4599 = vst.msk [vmem:[#allocation4 + $0x8] sm:$0xff] %vm230_vm2, %v4595_v42 }
 0xda6   :  { %6253 = shalt.err (!%p6250_p4)
}
 0xda7   :  { %s6254_s1 = scalar_lea.hbm %s7915_s15, 256 }
 0xda8   :  { %p6255_p5 = scmp.ne.s32.totalorder %s7915_s15, %s6254_s1  ;;  %p6258_p6 = scmp.lt.u32.totalorder %s6254_s1, %s7915_s15 }
 0xdaa   :  { %p6260_p7 = pnand %p6258_p6, %p6255_p5 }
 0xdac   :  { %6263 = shalt.err (!%p6260_p7)
}
 0xdad   :  { %s6273_s24 = smov 128  }
 0xdae   :  { %4611 = dma.vmem_to_hbm [thread:$0]  %s4606_s21, 256, %s7915_s15, [#allocation5], %s6273_s24, %s6273_s24, %s6267_s16  }
 0xdaf   :  { %6264 = dma.done.wait [#allocation5], 256  }
 0xdb0   :  { %6265 = vsyncadd [#allocation5], 4294967040 }
 0xdb1   :  { %4615 = vsyncpa [#allocation5], 1 }

</bundles_post_ra>
